<compile_context>
chip_gen: v7x
topology: tpu7x:2x2x1
jax: 0.10.0
libtpu: 0.0.40
codegen_flags: <defaults>
</compile_context>

<pallas_src>
import numpy as np
import jax
import jax.numpy as jnp
from jax.experimental import pallas as pl
from jax.experimental.pallas import tpu as pltpu

# ---- small config consistent with the module ----
B = 2
H = W = 8
C = 32                      # dim
NUM_HEADS = 4
WS = 4                      # window_size
SHIFT = 2                   # shift_size (SW-MSA branch, uses attn_mask)
MLP_RATIO = 4.0
N = WS * WS                 # tokens per window
HEAD_DIM = C // NUM_HEADS
HIDDEN = int(C * MLP_RATIO)
SCALE = HEAD_DIM ** -0.5
EPS = 1e-5
NW = (H // WS) * (W // WS)  # windows per image
L = H * W                   # tokens per image
DTYPE = jnp.float32
NEG = -1e9                  # off-window-block additive mask (exp underflows to 0 exactly)


# ---------------- helpers (exact GELU via erf approx) ----------------
def _erf(x):
    # Abramowitz & Stegun 7.1.26, |err| < 1.5e-7 (~f32 rounding).
    # TODO(synk): lax.erf has no guaranteed Mosaic lowering; this preserves exact
    # (erf-based) nn.GELU semantics to f32 precision. exp() routes to the EUP.
    a1, a2, a3, a4, a5 = (0.254829592, -0.284496736, 1.421413741,
                          -1.453152027, 1.061405429)
    pc = 0.3275911
    s = jnp.where(x >= 0.0, 1.0, -1.0)
    ax = jnp.abs(x)
    t = 1.0 / (1.0 + pc * ax)
    poly = ((((a5 * t + a4) * t + a3) * t + a2) * t + a1) * t
    return s * (1.0 - poly * jnp.exp(-ax * ax))


def _gelu_exact(x):
    return 0.5 * x * (1.0 + _erf(x * (2.0 ** -0.5)))


# ---------------- constant index / permutation tables (numpy, per image) ----------------
def _relative_position_index():
    coords = np.stack(np.meshgrid(np.arange(WS), np.arange(WS), indexing="ij"))
    cf = coords.reshape(2, -1)
    rel = cf[:, :, None] - cf[:, None, :]
    rel = rel.transpose(1, 2, 0).copy()
    rel[:, :, 0] += WS - 1
    rel[:, :, 1] += WS - 1
    rel[:, :, 0] *= 2 * WS - 1
    return rel.sum(-1)                                                  # [N, N] int


REL_INDEX = _relative_position_index()


def _build_window_perm():
    """Per-image permutation: window-layout row r -> original flat token index.

    Composes torch.roll(shifts=(-SHIFT,-SHIFT)) with window_partition, exactly as
    in the PyTorch forward.  Returned as a 0/1 matrix so it can be applied inside
    the kernel as an (exact) MXU matmul; its transpose is the window_reverse +
    roll(+SHIFT) scatter-back.
    """
    perm = np.zeros((L,), np.int64)
    for hh in range(H):
        for ww in range(W):
            src_h = (hh + SHIFT) % H          # roll(-SHIFT): out[i] = in[(i+SHIFT) % H]
            src_w = (ww + SHIFT) % W
            win = (hh // WS) * (W // WS) + (ww // WS)
            n = (hh % WS) * WS + (ww % WS)
            perm[win * N + n] = src_h * W + src_w
    P = np.zeros((L, L), np.float32)
    P[np.arange(L), perm] = 1.0
    return P


P_WIN = _build_window_perm()          # [L, L]  x_window = P_WIN @ x
P_INV = P_WIN.T.copy()                # [L, L]  x_back   = P_INV @ y_window

# 0 on the diagonal window blocks, NEG off-block (forbids cross-window attention).
OFFBLOCK = (NEG * (1.0 - np.kron(np.eye(NW), np.ones((N, N))))).astype(np.float32)


def build_attn_mask():
    # Standard Swin SW-MSA mask for (Hp, Wp) = (H, W) (no padding needed here).
    img_mask = np.zeros((1, H, W, 1), np.float32)
    slices = (slice(0, -WS), slice(-WS, -SHIFT), slice(-SHIFT, None))
    cnt = 0
    for hs in slices:
        for wsl in slices:
            img_mask[:, hs, wsl, :] = cnt
            cnt += 1
    mw = img_mask.reshape(1, H // WS, WS, W // WS, WS, 1)
    mw = mw.transpose(0, 1, 3, 2, 4, 5).reshape(-1, WS * WS)            # [nW, N]
    am = mw[:, None, :] - mw[:, :, None]
    am = np.where(am != 0, -100.0, 0.0).astype(np.float32)
    return jnp.asarray(am)                                              # [nW, N, N]


# ---------------- the single fused kernel ----------------
def _swin_block_kernel(x_ref, pwin_ref, pinv_ref,
                       g1_ref, b1_ref,
                       wq_ref, bq_ref, wk_ref, bk_ref, wv_ref, bv_ref,
                       wp_ref, bp_ref, bias_ref,
                       g2_ref, b2_ref,
                       w1_ref, b1m_ref, w2_ref, b2m_ref,
                       o_ref):
    x = x_ref[...].astype(jnp.float32)                     # [L, C] original token layout

    # roll(-shift) + window partition as an exact 0/1 permutation matmul
    xw = jnp.dot(pwin_ref[...], x, preferred_element_type=jnp.float32)   # [L, C]

    # norm1 (per-token LayerNorm; commutes with the token permutation)
    mu = jnp.mean(xw, axis=-1, keepdims=True)
    var = jnp.mean((xw - mu) ** 2, axis=-1, keepdims=True)
    xn = (xw - mu) * jax.lax.rsqrt(var + EPS) * g1_ref[...] + b1_ref[...]

    # QKV projections (q-scale already folded into Wq/bq)
    q = jnp.dot(xn, wq_ref[...], preferred_element_type=jnp.float32) + bq_ref[...]
    k = jnp.dot(xn, wk_ref[...], preferred_element_type=jnp.float32) + bk_ref[...]
    v = jnp.dot(xn, wv_ref[...], preferred_element_type=jnp.float32) + bv_ref[...]

    # Per-head attention with block-diagonal (per-window) additive bias.
    ctx = []
    for h in range(NUM_HEADS):                              # 4 unrolled iterations
        lo = h * HEAD_DIM
        qh = q[:, lo:lo + HEAD_DIM]                         # [L, hd]
        kh = k[:, lo:lo + HEAD_DIM]
        vh = v[:, lo:lo + HEAD_DIM]
        s = jnp.einsum('nd,md->nm', qh, kh,
                       preferred_element_type=jnp.float32)  # [L, L]
        s = s + bias_ref[h]                                 # rel-bias + shift mask + off-block NEG
        s = s - jnp.max(s, axis=-1, keepdims=True)
        p = jnp.exp(s)                                      # off-block -> exactly 0
        p = p / jnp.sum(p, axis=-1, keepdims=True)
        ctx.append(jnp.dot(p, vh, preferred_element_type=jnp.float32))   # [L, hd]
    ctx = jnp.concatenate(ctx, axis=-1)                     # [L, C]

    attn = jnp.dot(ctx, wp_ref[...], preferred_element_type=jnp.float32) + bp_ref[...]

    # window reverse + roll(+shift) via the inverse permutation, then residual
    y = x + jnp.dot(pinv_ref[...], attn, preferred_element_type=jnp.float32)

    # norm2 + MLP + residual (dropout / drop_path are identity)
    mu2 = jnp.mean(y, axis=-1, keepdims=True)
    var2 = jnp.mean((y - mu2) ** 2, axis=-1, keepdims=True)
    z = (y - mu2) * jax.lax.rsqrt(var2 + EPS) * g2_ref[...] + b2_ref[...]
    hdn = jnp.dot(z, w1_ref[...], preferred_element_type=jnp.float32) + b1m_ref[...]
    hdn = _gelu_exact(hdn)
    out = jnp.dot(hdn, w2_ref[...], preferred_element_type=jnp.float32) + b2m_ref[...]
    o_ref[...] = (y + out).astype(o_ref.dtype)


def swin_block_pallas(x2, pwin, pinv, g1, b1, wq_t, bq, wk_t, bk, wv_t, bv,
                      wp_t, bp, bias_img, g2, b2, w1_t, b1m, w2_t, b2m):
    T = x2.shape[0]
    assert T % L == 0
    nb = T // L                                             # = batch size
    tok = pl.BlockSpec((L, C), lambda b: (b, 0))
    vec_c = pl.BlockSpec((1, C), lambda b: (0, 0))
    mat_cc = pl.BlockSpec((C, C), lambda b: (0, 0))
    perm = pl.BlockSpec((L, L), lambda b: (0, 0))
    return pl.pallas_call(
        _swin_block_kernel,
        out_shape=jax.ShapeDtypeStruct((T, C), x2.dtype),
        grid_spec=pltpu.PrefetchScalarGridSpec(
            num_scalar_prefetch=0,
            grid=(nb,),
            in_specs=[
                tok,                                        # x (original layout, per image)
                perm, perm,                                 # P_win, P_inv
                vec_c, vec_c,                               # gamma1, beta1
                mat_cc, vec_c,                              # Wq^T (scaled), bq (scaled)
                mat_cc, vec_c,                              # Wk^T, bk
                mat_cc, vec_c,                              # Wv^T, bv
                mat_cc, vec_c,                              # Wproj^T, bproj
                pl.BlockSpec((NUM_HEADS, L, L), lambda b: (0, 0, 0)),   # combined bias
                vec_c, vec_c,                               # gamma2, beta2
                pl.BlockSpec((C, HIDDEN), lambda b: (0, 0)),            # W1^T
                pl.BlockSpec((1, HIDDEN), lambda b: (0, 0)),            # b1
                pl.BlockSpec((HIDDEN, C), lambda b: (0, 0)),            # W2^T
                vec_c,                                      # b2
            ],
            out_specs=tok,
        ),
        compiler_params=pltpu.CompilerParams(dimension_semantics=("parallel",)),
    )(x2, pwin, pinv, g1, b1, wq_t, bq, wk_t, bk, wv_t, bv,
      wp_t, bp, bias_img, g2, b2, w1_t, b1m, w2_t, b2m)


# ---------------- wrapper (parameter re-layout + bias construction only) ----------------
def init_params(key):
    ks = jax.random.split(key, 9)
    nrm = lambda k, s: (jax.random.normal(k, s, DTYPE) * 0.02)
    return {
        "g1": jnp.ones((1, C), DTYPE), "b1": jnp.zeros((1, C), DTYPE),
        "wqkv": nrm(ks[0], (3 * C, C)),        # nn.Linear weight layout [out, in]
        "bqkv": nrm(ks[1], (1, 3 * C)),
        "wproj": nrm(ks[2], (C, C)),
        "bproj": nrm(ks[3], (1, C)),
        "rel_table": jax.random.truncated_normal(
            ks[4], -2.0, 2.0, ((2 * WS - 1) ** 2, NUM_HEADS), DTYPE) * 0.02,
        "g2": jnp.ones((1, C), DTYPE), "b2": jnp.zeros((1, C), DTYPE),
        "w1": nrm(ks[5], (HIDDEN, C)), "b1m": nrm(ks[6], (1, HIDDEN)),
        "w2": nrm(ks[7], (C, HIDDEN)), "b2m": nrm(ks[8], (1, C)),
    }


def swin_block_forward(x, attn_mask, p):
    Bx, Lx, Cx = x.shape
    assert Lx == L and Cx == C
    # TODO(synk): assumes H, W are multiples of WS (no spatial padding); with padding,
    # PyTorch pads zeros *after* norm1, which would not commute with the fused LN.
    assert (WS - W % WS) % WS == 0 and (WS - H % WS) % WS == 0

    # ---- attention parameter prep (constant-folded under jit) ----
    wqkv_t = p["wqkv"].T                                    # [C, 3C]
    wq_t = wqkv_t[:, :C] * SCALE                            # fold q-scale into Wq / bq
    wk_t = wqkv_t[:, C:2 * C]
    wv_t = wqkv_t[:, 2 * C:]
    bq = p["bqkv"][:, :C] * SCALE
    bk = p["bqkv"][:, C:2 * C]
    bv = p["bqkv"][:, 2 * C:]

    # rel-pos bias gather -> [NH, N, N]; combine with shift mask per (within-image) window
    rel_bias = p["rel_table"][REL_INDEX.reshape(-1)].reshape(N, N, NUM_HEADS)
    rel_bias = jnp.transpose(rel_bias, (2, 0, 1))           # [NH, N, N]
    if SHIFT > 0:
        blocks = rel_bias[:, None, :, :] + attn_mask[None, :, :, :]      # [NH, NW, N, N]
    else:
        blocks = jnp.broadcast_to(rel_bias[:, None, :, :], (NUM_HEADS, NW, N, N))
    onehot = jnp.asarray(np.eye(NW, dtype=np.float32))
    big = blocks[:, :, :, None, :] * onehot[None, :, None, :, None]      # [NH, NW, N, NW, N]
    bias_img = big.reshape(NUM_HEADS, L, L) + jnp.asarray(OFFBLOCK)      # [NH, L, L]

    out = swin_block_pallas(
        x.reshape(Bx * L, C),
        jnp.asarray(P_WIN), jnp.asarray(P_INV),
        p["g1"], p["b1"], wq_t, bq, wk_t, bk, wv_t, bv,
        p["wproj"].T, p["bproj"], bias_img,
        p["g2"], p["b2"], p["w1"].T, p["b1m"], p["w2"].T, p["b2m"])
    return out.reshape(Bx, L, C)


if __name__ == "__main__":
    key = jax.random.PRNGKey(0)
    kx, kp = jax.random.split(key)
    x = jax.random.normal(kx, (B, H * W, C), DTYPE)
    params = init_params(kp)
    attn_mask = build_attn_mask()

    fwd = jax.jit(lambda a, m: swin_block_forward(a, m, params))
    out = fwd(x, attn_mask)
    jax.block_until_ready(out)
    assert out.shape == (B, H * W, C) and out.dtype == DTYPE
    assert bool(jnp.all(jnp.isfinite(out)))
    print("KERNEL_OK")
</pallas_src>

<mosaic_0001>
module attributes {stable_mosaic.version = 11 : i64} {
  func.func @_swin_block_kernel(%arg0: i32, %arg1: memref<64x32xf32, #tpu.memory_space<vmem>>, %arg2: memref<64x64xf32, #tpu.memory_space<vmem>>, %arg3: memref<64x64xf32, #tpu.memory_space<vmem>>, %arg4: memref<1x32xf32, #tpu.memory_space<vmem>>, %arg5: memref<1x32xf32, #tpu.memory_space<vmem>>, %arg6: memref<32x32xf32, #tpu.memory_space<vmem>>, %arg7: memref<1x32xf32, #tpu.memory_space<vmem>>, %arg8: memref<32x32xf32, #tpu.memory_space<vmem>>, %arg9: memref<1x32xf32, #tpu.memory_space<vmem>>, %arg10: memref<32x32xf32, #tpu.memory_space<vmem>>, %arg11: memref<1x32xf32, #tpu.memory_space<vmem>>, %arg12: memref<32x32xf32, #tpu.memory_space<vmem>>, %arg13: memref<1x32xf32, #tpu.memory_space<vmem>>, %arg14: memref<4x64x64xf32, #tpu.memory_space<vmem>>, %arg15: memref<1x32xf32, #tpu.memory_space<vmem>>, %arg16: memref<1x32xf32, #tpu.memory_space<vmem>>, %arg17: memref<32x128xf32, #tpu.memory_space<vmem>>, %arg18: memref<1x128xf32, #tpu.memory_space<vmem>>, %arg19: memref<128x32xf32, #tpu.memory_space<vmem>>, %arg20: memref<1x32xf32, #tpu.memory_space<vmem>>, %arg21: memref<64x32xf32, #tpu.memory_space<vmem>>) attributes {dimension_semantics = [#tpu.dimension_semantics<parallel>], iteration_bounds = array<i64: 2>, scalar_prefetch = 0 : i64, scratch_operands = 0 : i64, tpu.core_type = #tpu.core_type<tc>, window_params = [{transform_indices = @transform_0, window_bounds = array<i64: 64, 32>}, {pipeline_mode = #tpu.pipeline_mode<synchronous>, transform_indices = @transform_1, window_bounds = array<i64: 64, 64>}, {pipeline_mode = #tpu.pipeline_mode<synchronous>, transform_indices = @transform_2, window_bounds = array<i64: 64, 64>}, {pipeline_mode = #tpu.pipeline_mode<synchronous>, transform_indices = @transform_3, window_bounds = array<i64: 1, 32>}, {pipeline_mode = #tpu.pipeline_mode<synchronous>, transform_indices = @transform_4, window_bounds = array<i64: 1, 32>}, {pipeline_mode = #tpu.pipeline_mode<synchronous>, transform_indices = @transform_5, window_bounds = array<i64: 32, 32>}, {pipeline_mode = #tpu.pipeline_mode<synchronous>, transform_indices = @transform_6, window_bounds = array<i64: 1, 32>}, {pipeline_mode = #tpu.pipeline_mode<synchronous>, transform_indices = @transform_7, window_bounds = array<i64: 32, 32>}, {pipeline_mode = #tpu.pipeline_mode<synchronous>, transform_indices = @transform_8, window_bounds = array<i64: 1, 32>}, {pipeline_mode = #tpu.pipeline_mode<synchronous>, transform_indices = @transform_9, window_bounds = array<i64: 32, 32>}, {pipeline_mode = #tpu.pipeline_mode<synchronous>, transform_indices = @transform_10, window_bounds = array<i64: 1, 32>}, {pipeline_mode = #tpu.pipeline_mode<synchronous>, transform_indices = @transform_11, window_bounds = array<i64: 32, 32>}, {pipeline_mode = #tpu.pipeline_mode<synchronous>, transform_indices = @transform_12, window_bounds = array<i64: 1, 32>}, {pipeline_mode = #tpu.pipeline_mode<synchronous>, transform_indices = @transform_13, window_bounds = array<i64: 4, 64, 64>}, {pipeline_mode = #tpu.pipeline_mode<synchronous>, transform_indices = @transform_14, window_bounds = array<i64: 1, 32>}, {pipeline_mode = #tpu.pipeline_mode<synchronous>, transform_indices = @transform_15, window_bounds = array<i64: 1, 32>}, {pipeline_mode = #tpu.pipeline_mode<synchronous>, transform_indices = @transform_16, window_bounds = array<i64: 32, 128>}, {pipeline_mode = #tpu.pipeline_mode<synchronous>, transform_indices = @transform_17, window_bounds = array<i64: 1, 128>}, {pipeline_mode = #tpu.pipeline_mode<synchronous>, transform_indices = @transform_18, window_bounds = array<i64: 128, 32>}, {pipeline_mode = #tpu.pipeline_mode<synchronous>, transform_indices = @transform_19, window_bounds = array<i64: 1, 32>}, {transform_indices = @transform_20, window_bounds = array<i64: 64, 32>}]} {
    %c0 = arith.constant 0 : index
    %c0_0 = arith.constant 0 : index
    %0 = vector.load %arg1[%c0, %c0_0] : memref<64x32xf32, #tpu.memory_space<vmem>>, vector<64x32xf32>
    %c0_1 = arith.constant 0 : index
    %c0_2 = arith.constant 0 : index
    %1 = vector.load %arg2[%c0_1, %c0_2] : memref<64x64xf32, #tpu.memory_space<vmem>>, vector<64x64xf32>
    %cst = arith.constant dense<0.000000e+00> : vector<64x32xf32>
    %2 = tpu.matmul %1, %0, %cst {dimension_numbers = #tpu.dot_dimension_numbers<[1], [0], [0], [1], [0, 0, 1, 1], [], []>} : vector<64x64xf32>, vector<64x32xf32>, vector<64x32xf32> -> vector<64x32xf32>
    %cst_3 = arith.constant dense<0.000000e+00> : vector<64xf32>
    %3 = vector.multi_reduction <add>, %2, %cst_3 [1] : vector<64x32xf32> to vector<64xf32>
    %4 = vector.shape_cast %3 : vector<64xf32> to vector<64x1xf32>
    %cst_4 = arith.constant 3.200000e+01 : f32
    %5 = vector.broadcast %cst_4 : f32 to vector<64x1xf32>
    %6 = arith.divf %4, %5 : vector<64x1xf32>
    %7 = vector.broadcast %6 : vector<64x1xf32> to vector<64x32xf32>
    %8 = arith.subf %2, %7 : vector<64x32xf32>
    %9 = arith.mulf %8, %8 : vector<64x32xf32>
    %cst_5 = arith.constant dense<0.000000e+00> : vector<64xf32>
    %10 = vector.multi_reduction <add>, %9, %cst_5 [1] : vector<64x32xf32> to vector<64xf32>
    %11 = vector.shape_cast %10 : vector<64xf32> to vector<64x1xf32>
    %cst_6 = arith.constant 3.200000e+01 : f32
    %12 = vector.broadcast %cst_6 : f32 to vector<64x1xf32>
    %13 = arith.divf %11, %12 : vector<64x1xf32>
    %14 = vector.broadcast %6 : vector<64x1xf32> to vector<64x32xf32>
    %15 = arith.subf %2, %14 : vector<64x32xf32>
    %cst_7 = arith.constant 9.99999974E-6 : f32
    %16 = vector.broadcast %cst_7 : f32 to vector<64x1xf32>
    %17 = arith.addf %13, %16 : vector<64x1xf32>
    %18 = math.rsqrt %17 : vector<64x1xf32>
    %19 = vector.broadcast %18 : vector<64x1xf32> to vector<64x32xf32>
    %20 = arith.mulf %15, %19 : vector<64x32xf32>
    %c0_8 = arith.constant 0 : index
    %c0_9 = arith.constant 0 : index
    %21 = vector.load %arg4[%c0_8, %c0_9] : memref<1x32xf32, #tpu.memory_space<vmem>>, vector<1x32xf32>
    %22 = vector.broadcast %21 : vector<1x32xf32> to vector<64x32xf32>
    %23 = arith.mulf %20, %22 : vector<64x32xf32>
    %c0_10 = arith.constant 0 : index
    %c0_11 = arith.constant 0 : index
    %24 = vector.load %arg5[%c0_10, %c0_11] : memref<1x32xf32, #tpu.memory_space<vmem>>, vector<1x32xf32>
    %25 = vector.broadcast %24 : vector<1x32xf32> to vector<64x32xf32>
    %26 = arith.addf %23, %25 : vector<64x32xf32>
    %c0_12 = arith.constant 0 : index
    %c0_13 = arith.constant 0 : index
    %27 = vector.load %arg6[%c0_12, %c0_13] : memref<32x32xf32, #tpu.memory_space<vmem>>, vector<32x32xf32>
    %cst_14 = arith.constant dense<0.000000e+00> : vector<64x32xf32>
    %28 = tpu.matmul %26, %27, %cst_14 {dimension_numbers = #tpu.dot_dimension_numbers<[1], [0], [0], [1], [0, 0, 1, 1], [], []>} : vector<64x32xf32>, vector<32x32xf32>, vector<64x32xf32> -> vector<64x32xf32>
    %c0_15 = arith.constant 0 : index
    %c0_16 = arith.constant 0 : index
    %29 = vector.load %arg7[%c0_15, %c0_16] : memref<1x32xf32, #tpu.memory_space<vmem>>, vector<1x32xf32>
    %30 = vector.broadcast %29 : vector<1x32xf32> to vector<64x32xf32>
    %31 = arith.addf %28, %30 : vector<64x32xf32>
    %c0_17 = arith.constant 0 : index
    %c0_18 = arith.constant 0 : index
    %32 = vector.load %arg8[%c0_17, %c0_18] : memref<32x32xf32, #tpu.memory_space<vmem>>, vector<32x32xf32>
    %cst_19 = arith.constant dense<0.000000e+00> : vector<64x32xf32>
    %33 = tpu.matmul %26, %32, %cst_19 {dimension_numbers = #tpu.dot_dimension_numbers<[1], [0], [0], [1], [0, 0, 1, 1], [], []>} : vector<64x32xf32>, vector<32x32xf32>, vector<64x32xf32> -> vector<64x32xf32>
    %c0_20 = arith.constant 0 : index
    %c0_21 = arith.constant 0 : index
    %34 = vector.load %arg9[%c0_20, %c0_21] : memref<1x32xf32, #tpu.memory_space<vmem>>, vector<1x32xf32>
    %35 = vector.broadcast %34 : vector<1x32xf32> to vector<64x32xf32>
    %36 = arith.addf %33, %35 : vector<64x32xf32>
    %c0_22 = arith.constant 0 : index
    %c0_23 = arith.constant 0 : index
    %37 = vector.load %arg10[%c0_22, %c0_23] : memref<32x32xf32, #tpu.memory_space<vmem>>, vector<32x32xf32>
    %cst_24 = arith.constant dense<0.000000e+00> : vector<64x32xf32>
    %38 = tpu.matmul %26, %37, %cst_24 {dimension_numbers = #tpu.dot_dimension_numbers<[1], [0], [0], [1], [0, 0, 1, 1], [], []>} : vector<64x32xf32>, vector<32x32xf32>, vector<64x32xf32> -> vector<64x32xf32>
    %c0_25 = arith.constant 0 : index
    %c0_26 = arith.constant 0 : index
    %39 = vector.load %arg11[%c0_25, %c0_26] : memref<1x32xf32, #tpu.memory_space<vmem>>, vector<1x32xf32>
    %40 = vector.broadcast %39 : vector<1x32xf32> to vector<64x32xf32>
    %41 = arith.addf %38, %40 : vector<64x32xf32>
    %42 = vector.extract_strided_slice %31 {offsets = [0, 0], sizes = [64, 8], strides = [1, 1]} : vector<64x32xf32> to vector<64x8xf32>
    %43 = vector.extract_strided_slice %36 {offsets = [0, 0], sizes = [64, 8], strides = [1, 1]} : vector<64x32xf32> to vector<64x8xf32>
    %44 = vector.extract_strided_slice %41 {offsets = [0, 0], sizes = [64, 8], strides = [1, 1]} : vector<64x32xf32> to vector<64x8xf32>
    "tpu.trace_start"() <{level = 10 : i32, message = "nd,md->nm"}> : () -> ()
    %cst_27 = arith.constant dense<0.000000e+00> : vector<64x64xf32>
    %45 = tpu.matmul %42, %43, %cst_27 {dimension_numbers = #tpu.dot_dimension_numbers<[1], [1], [0], [0], [0, 0, 1, 0], [], []>} : vector<64x8xf32>, vector<64x8xf32>, vector<64x64xf32> -> vector<64x64xf32>
    "tpu.trace_stop"() : () -> ()
    %c0_28 = arith.constant 0 : index
    %c0_29 = arith.constant 0 : index
    %c0_30 = arith.constant 0 : index
    %46 = vector.load %arg14[%c0_28, %c0_29, %c0_30] : memref<4x64x64xf32, #tpu.memory_space<vmem>>, vector<1x64x64xf32>
    %47 = vector.shape_cast %46 : vector<1x64x64xf32> to vector<64x64xf32>
    %48 = arith.addf %45, %47 : vector<64x64xf32>
    %cst_31 = arith.constant dense<0xFF800000> : vector<64xf32>
    %49 = vector.multi_reduction <maximumf>, %48, %cst_31 [1] : vector<64x64xf32> to vector<64xf32>
    %50 = vector.shape_cast %49 : vector<64xf32> to vector<64x1xf32>
    %51 = vector.broadcast %50 : vector<64x1xf32> to vector<64x64xf32>
    %52 = arith.subf %48, %51 : vector<64x64xf32>
    %53 = math.exp %52 : vector<64x64xf32>
    %cst_32 = arith.constant dense<0.000000e+00> : vector<64xf32>
    %54 = vector.multi_reduction <add>, %53, %cst_32 [1] : vector<64x64xf32> to vector<64xf32>
    %55 = vector.shape_cast %54 : vector<64xf32> to vector<64x1xf32>
    %56 = vector.broadcast %55 : vector<64x1xf32> to vector<64x64xf32>
    %57 = arith.divf %53, %56 : vector<64x64xf32>
    %cst_33 = arith.constant dense<0.000000e+00> : vector<64x8xf32>
    %58 = tpu.matmul %57, %44, %cst_33 {dimension_numbers = #tpu.dot_dimension_numbers<[1], [0], [0], [1], [0, 0, 1, 1], [], []>} : vector<64x64xf32>, vector<64x8xf32>, vector<64x8xf32> -> vector<64x8xf32>
    %59 = vector.extract_strided_slice %31 {offsets = [0, 8], sizes = [64, 8], strides = [1, 1]} : vector<64x32xf32> to vector<64x8xf32>
    %60 = vector.extract_strided_slice %36 {offsets = [0, 8], sizes = [64, 8], strides = [1, 1]} : vector<64x32xf32> to vector<64x8xf32>
    %61 = vector.extract_strided_slice %41 {offsets = [0, 8], sizes = [64, 8], strides = [1, 1]} : vector<64x32xf32> to vector<64x8xf32>
    "tpu.trace_start"() <{level = 10 : i32, message = "nd,md->nm"}> : () -> ()
    %cst_34 = arith.constant dense<0.000000e+00> : vector<64x64xf32>
    %62 = tpu.matmul %59, %60, %cst_34 {dimension_numbers = #tpu.dot_dimension_numbers<[1], [1], [0], [0], [0, 0, 1, 0], [], []>} : vector<64x8xf32>, vector<64x8xf32>, vector<64x64xf32> -> vector<64x64xf32>
    "tpu.trace_stop"() : () -> ()
    %c1 = arith.constant 1 : index
    %c0_35 = arith.constant 0 : index
    %c0_36 = arith.constant 0 : index
    %63 = vector.load %arg14[%c1, %c0_35, %c0_36] : memref<4x64x64xf32, #tpu.memory_space<vmem>>, vector<1x64x64xf32>
    %64 = vector.shape_cast %63 : vector<1x64x64xf32> to vector<64x64xf32>
    %65 = arith.addf %62, %64 : vector<64x64xf32>
    %cst_37 = arith.constant dense<0xFF800000> : vector<64xf32>
    %66 = vector.multi_reduction <maximumf>, %65, %cst_37 [1] : vector<64x64xf32> to vector<64xf32>
    %67 = vector.shape_cast %66 : vector<64xf32> to vector<64x1xf32>
    %68 = vector.broadcast %67 : vector<64x1xf32> to vector<64x64xf32>
    %69 = arith.subf %65, %68 : vector<64x64xf32>
    %70 = math.exp %69 : vector<64x64xf32>
    %cst_38 = arith.constant dense<0.000000e+00> : vector<64xf32>
    %71 = vector.multi_reduction <add>, %70, %cst_38 [1] : vector<64x64xf32> to vector<64xf32>
    %72 = vector.shape_cast %71 : vector<64xf32> to vector<64x1xf32>
    %73 = vector.broadcast %72 : vector<64x1xf32> to vector<64x64xf32>
    %74 = arith.divf %70, %73 : vector<64x64xf32>
    %cst_39 = arith.constant dense<0.000000e+00> : vector<64x8xf32>
    %75 = tpu.matmul %74, %61, %cst_39 {dimension_numbers = #tpu.dot_dimension_numbers<[1], [0], [0], [1], [0, 0, 1, 1], [], []>} : vector<64x64xf32>, vector<64x8xf32>, vector<64x8xf32> -> vector<64x8xf32>
    %76 = vector.extract_strided_slice %31 {offsets = [0, 16], sizes = [64, 8], strides = [1, 1]} : vector<64x32xf32> to vector<64x8xf32>
    %77 = vector.extract_strided_slice %36 {offsets = [0, 16], sizes = [64, 8], strides = [1, 1]} : vector<64x32xf32> to vector<64x8xf32>
    %78 = vector.extract_strided_slice %41 {offsets = [0, 16], sizes = [64, 8], strides = [1, 1]} : vector<64x32xf32> to vector<64x8xf32>
    "tpu.trace_start"() <{level = 10 : i32, message = "nd,md->nm"}> : () -> ()
    %cst_40 = arith.constant dense<0.000000e+00> : vector<64x64xf32>
    %79 = tpu.matmul %76, %77, %cst_40 {dimension_numbers = #tpu.dot_dimension_numbers<[1], [1], [0], [0], [0, 0, 1, 0], [], []>} : vector<64x8xf32>, vector<64x8xf32>, vector<64x64xf32> -> vector<64x64xf32>
    "tpu.trace_stop"() : () -> ()
    %c2 = arith.constant 2 : index
    %c0_41 = arith.constant 0 : index
    %c0_42 = arith.constant 0 : index
    %80 = vector.load %arg14[%c2, %c0_41, %c0_42] : memref<4x64x64xf32, #tpu.memory_space<vmem>>, vector<1x64x64xf32>
    %81 = vector.shape_cast %80 : vector<1x64x64xf32> to vector<64x64xf32>
    %82 = arith.addf %79, %81 : vector<64x64xf32>
    %cst_43 = arith.constant dense<0xFF800000> : vector<64xf32>
    %83 = vector.multi_reduction <maximumf>, %82, %cst_43 [1] : vector<64x64xf32> to vector<64xf32>
    %84 = vector.shape_cast %83 : vector<64xf32> to vector<64x1xf32>
    %85 = vector.broadcast %84 : vector<64x1xf32> to vector<64x64xf32>
    %86 = arith.subf %82, %85 : vector<64x64xf32>
    %87 = math.exp %86 : vector<64x64xf32>
    %cst_44 = arith.constant dense<0.000000e+00> : vector<64xf32>
    %88 = vector.multi_reduction <add>, %87, %cst_44 [1] : vector<64x64xf32> to vector<64xf32>
    %89 = vector.shape_cast %88 : vector<64xf32> to vector<64x1xf32>
    %90 = vector.broadcast %89 : vector<64x1xf32> to vector<64x64xf32>
    %91 = arith.divf %87, %90 : vector<64x64xf32>
    %cst_45 = arith.constant dense<0.000000e+00> : vector<64x8xf32>
    %92 = tpu.matmul %91, %78, %cst_45 {dimension_numbers = #tpu.dot_dimension_numbers<[1], [0], [0], [1], [0, 0, 1, 1], [], []>} : vector<64x64xf32>, vector<64x8xf32>, vector<64x8xf32> -> vector<64x8xf32>
    %93 = vector.extract_strided_slice %31 {offsets = [0, 24], sizes = [64, 8], strides = [1, 1]} : vector<64x32xf32> to vector<64x8xf32>
    %94 = vector.extract_strided_slice %36 {offsets = [0, 24], sizes = [64, 8], strides = [1, 1]} : vector<64x32xf32> to vector<64x8xf32>
    %95 = vector.extract_strided_slice %41 {offsets = [0, 24], sizes = [64, 8], strides = [1, 1]} : vector<64x32xf32> to vector<64x8xf32>
    "tpu.trace_start"() <{level = 10 : i32, message = "nd,md->nm"}> : () -> ()
    %cst_46 = arith.constant dense<0.000000e+00> : vector<64x64xf32>
    %96 = tpu.matmul %93, %94, %cst_46 {dimension_numbers = #tpu.dot_dimension_numbers<[1], [1], [0], [0], [0, 0, 1, 0], [], []>} : vector<64x8xf32>, vector<64x8xf32>, vector<64x64xf32> -> vector<64x64xf32>
    "tpu.trace_stop"() : () -> ()
    %c3 = arith.constant 3 : index
    %c0_47 = arith.constant 0 : index
    %c0_48 = arith.constant 0 : index
    %97 = vector.load %arg14[%c3, %c0_47, %c0_48] : memref<4x64x64xf32, #tpu.memory_space<vmem>>, vector<1x64x64xf32>
    %98 = vector.shape_cast %97 : vector<1x64x64xf32> to vector<64x64xf32>
    %99 = arith.addf %96, %98 : vector<64x64xf32>
    %cst_49 = arith.constant dense<0xFF800000> : vector<64xf32>
    %100 = vector.multi_reduction <maximumf>, %99, %cst_49 [1] : vector<64x64xf32> to vector<64xf32>
    %101 = vector.shape_cast %100 : vector<64xf32> to vector<64x1xf32>
    %102 = vector.broadcast %101 : vector<64x1xf32> to vector<64x64xf32>
    %103 = arith.subf %99, %102 : vector<64x64xf32>
    %104 = math.exp %103 : vector<64x64xf32>
    %cst_50 = arith.constant dense<0.000000e+00> : vector<64xf32>
    %105 = vector.multi_reduction <add>, %104, %cst_50 [1] : vector<64x64xf32> to vector<64xf32>
    %106 = vector.shape_cast %105 : vector<64xf32> to vector<64x1xf32>
    %107 = vector.broadcast %106 : vector<64x1xf32> to vector<64x64xf32>
    %108 = arith.divf %104, %107 : vector<64x64xf32>
    %cst_51 = arith.constant dense<0.000000e+00> : vector<64x8xf32>
    %109 = tpu.matmul %108, %95, %cst_51 {dimension_numbers = #tpu.dot_dimension_numbers<[1], [0], [0], [1], [0, 0, 1, 1], [], []>} : vector<64x64xf32>, vector<64x8xf32>, vector<64x8xf32> -> vector<64x8xf32>
    %110 = tpu.concatenate %58, %75, %92, %109 in 1 : vector<64x8xf32>, vector<64x8xf32>, vector<64x8xf32>, vector<64x8xf32> -> vector<64x32xf32>
    %c0_52 = arith.constant 0 : index
    %c0_53 = arith.constant 0 : index
    %111 = vector.load %arg12[%c0_52, %c0_53] : memref<32x32xf32, #tpu.memory_space<vmem>>, vector<32x32xf32>
    %cst_54 = arith.constant dense<0.000000e+00> : vector<64x32xf32>
    %112 = tpu.matmul %110, %111, %cst_54 {dimension_numbers = #tpu.dot_dimension_numbers<[1], [0], [0], [1], [0, 0, 1, 1], [], []>} : vector<64x32xf32>, vector<32x32xf32>, vector<64x32xf32> -> vector<64x32xf32>
    %c0_55 = arith.constant 0 : index
    %c0_56 = arith.constant 0 : index
    %113 = vector.load %arg13[%c0_55, %c0_56] : memref<1x32xf32, #tpu.memory_space<vmem>>, vector<1x32xf32>
    %114 = vector.broadcast %113 : vector<1x32xf32> to vector<64x32xf32>
    %115 = arith.addf %112, %114 : vector<64x32xf32>
    %c0_57 = arith.constant 0 : index
    %c0_58 = arith.constant 0 : index
    %116 = vector.load %arg3[%c0_57, %c0_58] : memref<64x64xf32, #tpu.memory_space<vmem>>, vector<64x64xf32>
    %cst_59 = arith.constant dense<0.000000e+00> : vector<64x32xf32>
    %117 = tpu.matmul %116, %115, %cst_59 {dimension_numbers = #tpu.dot_dimension_numbers<[1], [0], [0], [1], [0, 0, 1, 1], [], []>} : vector<64x64xf32>, vector<64x32xf32>, vector<64x32xf32> -> vector<64x32xf32>
    %118 = arith.addf %0, %117 : vector<64x32xf32>
    %cst_60 = arith.constant dense<0.000000e+00> : vector<64xf32>
    %119 = vector.multi_reduction <add>, %118, %cst_60 [1] : vector<64x32xf32> to vector<64xf32>
    %120 = vector.shape_cast %119 : vector<64xf32> to vector<64x1xf32>
    %cst_61 = arith.constant 3.200000e+01 : f32
    %121 = vector.broadcast %cst_61 : f32 to vector<64x1xf32>
    %122 = arith.divf %120, %121 : vector<64x1xf32>
    %123 = vector.broadcast %122 : vector<64x1xf32> to vector<64x32xf32>
    %124 = arith.subf %118, %123 : vector<64x32xf32>
    %125 = arith.mulf %124, %124 : vector<64x32xf32>
    %cst_62 = arith.constant dense<0.000000e+00> : vector<64xf32>
    %126 = vector.multi_reduction <add>, %125, %cst_62 [1] : vector<64x32xf32> to vector<64xf32>
    %127 = vector.shape_cast %126 : vector<64xf32> to vector<64x1xf32>
    %cst_63 = arith.constant 3.200000e+01 : f32
    %128 = vector.broadcast %cst_63 : f32 to vector<64x1xf32>
    %129 = arith.divf %127, %128 : vector<64x1xf32>
    %130 = vector.broadcast %122 : vector<64x1xf32> to vector<64x32xf32>
    %131 = arith.subf %118, %130 : vector<64x32xf32>
    %cst_64 = arith.constant 9.99999974E-6 : f32
    %132 = vector.broadcast %cst_64 : f32 to vector<64x1xf32>
    %133 = arith.addf %129, %132 : vector<64x1xf32>
    %134 = math.rsqrt %133 : vector<64x1xf32>
    %135 = vector.broadcast %134 : vector<64x1xf32> to vector<64x32xf32>
    %136 = arith.mulf %131, %135 : vector<64x32xf32>
    %c0_65 = arith.constant 0 : index
    %c0_66 = arith.constant 0 : index
    %137 = vector.load %arg15[%c0_65, %c0_66] : memref<1x32xf32, #tpu.memory_space<vmem>>, vector<1x32xf32>
    %138 = vector.broadcast %137 : vector<1x32xf32> to vector<64x32xf32>
    %139 = arith.mulf %136, %138 : vector<64x32xf32>
    %c0_67 = arith.constant 0 : index
    %c0_68 = arith.constant 0 : index
    %140 = vector.load %arg16[%c0_67, %c0_68] : memref<1x32xf32, #tpu.memory_space<vmem>>, vector<1x32xf32>
    %141 = vector.broadcast %140 : vector<1x32xf32> to vector<64x32xf32>
    %142 = arith.addf %139, %141 : vector<64x32xf32>
    %c0_69 = arith.constant 0 : index
    %c0_70 = arith.constant 0 : index
    %143 = vector.load %arg17[%c0_69, %c0_70] : memref<32x128xf32, #tpu.memory_space<vmem>>, vector<32x128xf32>
    %cst_71 = arith.constant dense<0.000000e+00> : vector<64x128xf32>
    %144 = tpu.matmul %142, %143, %cst_71 {dimension_numbers = #tpu.dot_dimension_numbers<[1], [0], [0], [1], [0, 0, 1, 1], [], []>} : vector<64x32xf32>, vector<32x128xf32>, vector<64x128xf32> -> vector<64x128xf32>
    %c0_72 = arith.constant 0 : index
    %c0_73 = arith.constant 0 : index
    %145 = vector.load %arg18[%c0_72, %c0_73] : memref<1x128xf32, #tpu.memory_space<vmem>>, vector<1x128xf32>
    %146 = vector.broadcast %145 : vector<1x128xf32> to vector<64x128xf32>
    %147 = arith.addf %144, %146 : vector<64x128xf32>
    %cst_74 = arith.constant 5.000000e-01 : f32
    %148 = vector.broadcast %cst_74 : f32 to vector<64x128xf32>
    %149 = arith.mulf %148, %147 : vector<64x128xf32>
    %cst_75 = arith.constant 0.707106769 : f32
    %150 = vector.broadcast %cst_75 : f32 to vector<64x128xf32>
    %151 = arith.mulf %147, %150 : vector<64x128xf32>
    %cst_76 = arith.constant 0.000000e+00 : f32
    %152 = vector.broadcast %cst_76 : f32 to vector<64x128xf32>
    %153 = arith.cmpf oge, %151, %152 : vector<64x128xf32>
    %cst_77 = arith.constant 1.000000e+00 : f32
    %cst_78 = arith.constant -1.000000e+00 : f32
    %154 = vector.broadcast %cst_77 : f32 to vector<64x128xf32>
    %155 = vector.broadcast %cst_78 : f32 to vector<64x128xf32>
    %156 = arith.select %153, %154, %155 : vector<64x128xi1>, vector<64x128xf32>
    %157 = math.absf %151 : vector<64x128xf32>
    %cst_79 = arith.constant 0.327591091 : f32
    %158 = vector.broadcast %cst_79 : f32 to vector<64x128xf32>
    %159 = arith.mulf %158, %157 : vector<64x128xf32>
    %cst_80 = arith.constant 1.000000e+00 : f32
    %160 = vector.broadcast %cst_80 : f32 to vector<64x128xf32>
    %161 = arith.addf %160, %159 : vector<64x128xf32>
    %cst_81 = arith.constant 1.000000e+00 : f32
    %162 = vector.broadcast %cst_81 : f32 to vector<64x128xf32>
    %163 = arith.divf %162, %161 : vector<64x128xf32>
    %cst_82 = arith.constant 1.06140542 : f32
    %164 = vector.broadcast %cst_82 : f32 to vector<64x128xf32>
    %165 = arith.mulf %164, %163 : vector<64x128xf32>
    %cst_83 = arith.constant -1.45315206 : f32
    %166 = vector.broadcast %cst_83 : f32 to vector<64x128xf32>
    %167 = arith.addf %165, %166 : vector<64x128xf32>
    %168 = arith.mulf %167, %163 : vector<64x128xf32>
    %cst_84 = arith.constant 1.42141378 : f32
    %169 = vector.broadcast %cst_84 : f32 to vector<64x128xf32>
    %170 = arith.addf %168, %169 : vector<64x128xf32>
    %171 = arith.mulf %170, %163 : vector<64x128xf32>
    %cst_85 = arith.constant -0.284496725 : f32
    %172 = vector.broadcast %cst_85 : f32 to vector<64x128xf32>
    %173 = arith.addf %171, %172 : vector<64x128xf32>
    %174 = arith.mulf %173, %163 : vector<64x128xf32>
    %cst_86 = arith.constant 0.254829586 : f32
    %175 = vector.broadcast %cst_86 : f32 to vector<64x128xf32>
    %176 = arith.addf %174, %175 : vector<64x128xf32>
    %177 = arith.mulf %176, %163 : vector<64x128xf32>
    %cst_87 = arith.constant 0.000000e+00 : f32
    %178 = vector.broadcast %cst_87 : f32 to vector<64x128xf32>
    %179 = arith.subf %178, %157 : vector<64x128xf32>
    %180 = arith.mulf %179, %157 : vector<64x128xf32>
    %181 = math.exp %180 : vector<64x128xf32>
    %182 = arith.mulf %177, %181 : vector<64x128xf32>
    %cst_88 = arith.constant 1.000000e+00 : f32
    %183 = vector.broadcast %cst_88 : f32 to vector<64x128xf32>
    %184 = arith.subf %183, %182 : vector<64x128xf32>
    %185 = arith.mulf %156, %184 : vector<64x128xf32>
    %cst_89 = arith.constant 1.000000e+00 : f32
    %186 = vector.broadcast %cst_89 : f32 to vector<64x128xf32>
    %187 = arith.addf %186, %185 : vector<64x128xf32>
    %188 = arith.mulf %149, %187 : vector<64x128xf32>
    %c0_90 = arith.constant 0 : index
    %c0_91 = arith.constant 0 : index
    %189 = vector.load %arg19[%c0_90, %c0_91] : memref<128x32xf32, #tpu.memory_space<vmem>>, vector<128x32xf32>
    %cst_92 = arith.constant dense<0.000000e+00> : vector<64x32xf32>
    %190 = tpu.matmul %188, %189, %cst_92 {dimension_numbers = #tpu.dot_dimension_numbers<[1], [0], [0], [1], [0, 0, 1, 1], [], []>} : vector<64x128xf32>, vector<128x32xf32>, vector<64x32xf32> -> vector<64x32xf32>
    %c0_93 = arith.constant 0 : index
    %c0_94 = arith.constant 0 : index
    %191 = vector.load %arg20[%c0_93, %c0_94] : memref<1x32xf32, #tpu.memory_space<vmem>>, vector<1x32xf32>
    %192 = vector.broadcast %191 : vector<1x32xf32> to vector<64x32xf32>
    %193 = arith.addf %190, %192 : vector<64x32xf32>
    %194 = arith.addf %118, %193 : vector<64x32xf32>
    %c0_95 = arith.constant 0 : index
    %c0_96 = arith.constant 0 : index
    %195 = vector.load %arg21[%c0_95, %c0_96] : memref<64x32xf32, #tpu.memory_space<vmem>>, vector<64x32xf32>
    tpu.vector_store %arg21[%c0_95, %c0_96], %194 {strides = array<i32>} : memref<64x32xf32, #tpu.memory_space<vmem>>, vector<64x32xf32>,
    return
  }
  func.func @transform_0(%arg0: i32) -> (i32, i32) {
    %c0_i32 = arith.constant 0 : i32
    %c0_i32_0 = arith.constant 0 : i32
    return %arg0, %c0_i32 : i32, i32
  }
  func.func @transform_1(%arg0: i32) -> (i32, i32) {
    %c0_i32 = arith.constant 0 : i32
    %c0_i32_0 = arith.constant 0 : i32
    %c0_i32_1 = arith.constant 0 : i32
    return %c0_i32, %c0_i32_0 : i32, i32
  }
  func.func @transform_2(%arg0: i32) -> (i32, i32) {
    %c0_i32 = arith.constant 0 : i32
    %c0_i32_0 = arith.constant 0 : i32
    %c0_i32_1 = arith.constant 0 : i32
    return %c0_i32, %c0_i32_0 : i32, i32
  }
  func.func @transform_3(%arg0: i32) -> (i32, i32) {
    %c0_i32 = arith.constant 0 : i32
    %c0_i32_0 = arith.constant 0 : i32
    %c0_i32_1 = arith.constant 0 : i32
    return %c0_i32, %c0_i32_0 : i32, i32
  }
  func.func @transform_4(%arg0: i32) -> (i32, i32) {
    %c0_i32 = arith.constant 0 : i32
    %c0_i32_0 = arith.constant 0 : i32
    %c0_i32_1 = arith.constant 0 : i32
    return %c0_i32, %c0_i32_0 : i32, i32
  }
  func.func @transform_5(%arg0: i32) -> (i32, i32) {
    %c0_i32 = arith.constant 0 : i32
    %c0_i32_0 = arith.constant 0 : i32
    %c0_i32_1 = arith.constant 0 : i32
    return %c0_i32, %c0_i32_0 : i32, i32
  }
  func.func @transform_6(%arg0: i32) -> (i32, i32) {
    %c0_i32 = arith.constant 0 : i32
    %c0_i32_0 = arith.constant 0 : i32
    %c0_i32_1 = arith.constant 0 : i32
    return %c0_i32, %c0_i32_0 : i32, i32
  }
  func.func @transform_7(%arg0: i32) -> (i32, i32) {
    %c0_i32 = arith.constant 0 : i32
    %c0_i32_0 = arith.constant 0 : i32
    %c0_i32_1 = arith.constant 0 : i32
    return %c0_i32, %c0_i32_0 : i32, i32
  }
  func.func @transform_8(%arg0: i32) -> (i32, i32) {
    %c0_i32 = arith.constant 0 : i32
    %c0_i32_0 = arith.constant 0 : i32
    %c0_i32_1 = arith.constant 0 : i32
    return %c0_i32, %c0_i32_0 : i32, i32
  }
  func.func @transform_9(%arg0: i32) -> (i32, i32) {
    %c0_i32 = arith.constant 0 : i32
    %c0_i32_0 = arith.constant 0 : i32
    %c0_i32_1 = arith.constant 0 : i32
    return %c0_i32, %c0_i32_0 : i32, i32
  }
  func.func @transform_10(%arg0: i32) -> (i32, i32) {
    %c0_i32 = arith.constant 0 : i32
    %c0_i32_0 = arith.constant 0 : i32
    %c0_i32_1 = arith.constant 0 : i32
    return %c0_i32, %c0_i32_0 : i32, i32
  }
  func.func @transform_11(%arg0: i32) -> (i32, i32) {
    %c0_i32 = arith.constant 0 : i32
    %c0_i32_0 = arith.constant 0 : i32
    %c0_i32_1 = arith.constant 0 : i32
    return %c0_i32, %c0_i32_0 : i32, i32
  }
  func.func @transform_12(%arg0: i32) -> (i32, i32) {
    %c0_i32 = arith.constant 0 : i32
    %c0_i32_0 = arith.constant 0 : i32
    %c0_i32_1 = arith.constant 0 : i32
    return %c0_i32, %c0_i32_0 : i32, i32
  }
  func.func @transform_13(%arg0: i32) -> (i32, i32, i32) {
    %c0_i32 = arith.constant 0 : i32
    %c0_i32_0 = arith.constant 0 : i32
    %c0_i32_1 = arith.constant 0 : i32
    %c0_i32_2 = arith.constant 0 : i32
    return %c0_i32, %c0_i32_0, %c0_i32_1 : i32, i32, i32
  }
  func.func @transform_14(%arg0: i32) -> (i32, i32) {
    %c0_i32 = arith.constant 0 : i32
    %c0_i32_0 = arith.constant 0 : i32
    %c0_i32_1 = arith.constant 0 : i32
    return %c0_i32, %c0_i32_0 : i32, i32
  }
  func.func @transform_15(%arg0: i32) -> (i32, i32) {
    %c0_i32 = arith.constant 0 : i32
    %c0_i32_0 = arith.constant 0 : i32
    %c0_i32_1 = arith.constant 0 : i32
    return %c0_i32, %c0_i32_0 : i32, i32
  }
  func.func @transform_16(%arg0: i32) -> (i32, i32) {
    %c0_i32 = arith.constant 0 : i32
    %c0_i32_0 = arith.constant 0 : i32
    %c0_i32_1 = arith.constant 0 : i32
    return %c0_i32, %c0_i32_0 : i32, i32
  }
  func.func @transform_17(%arg0: i32) -> (i32, i32) {
    %c0_i32 = arith.constant 0 : i32
    %c0_i32_0 = arith.constant 0 : i32
    %c0_i32_1 = arith.constant 0 : i32
    return %c0_i32, %c0_i32_0 : i32, i32
  }
  func.func @transform_18(%arg0: i32) -> (i32, i32) {
    %c0_i32 = arith.constant 0 : i32
    %c0_i32_0 = arith.constant 0 : i32
    %c0_i32_1 = arith.constant 0 : i32
    return %c0_i32, %c0_i32_0 : i32, i32
  }
  func.func @transform_19(%arg0: i32) -> (i32, i32) {
    %c0_i32 = arith.constant 0 : i32
    %c0_i32_0 = arith.constant 0 : i32
    %c0_i32_1 = arith.constant 0 : i32
    return %c0_i32, %c0_i32_0 : i32, i32
  }
  func.func @transform_20(%arg0: i32) -> (i32, i32) {
    %c0_i32 = arith.constant 0 : i32
    %c0_i32_0 = arith.constant 0 : i32
    return %arg0, %c0_i32 : i32, i32
  }
}

</mosaic_0001>

<bundles_post_ra>
// kernel: _lambda_.1
= control target key start
LH: loop header
LB: loop body
LE: loop exit
PB: predicated region body
PF: predicated region fallthrough
CT: control target
= control target key end

     0   :  { %s6903_s0 = inlined_call_operand.vmem [shape: f32[128,32], index: 0, kind: input, shape index: {}]   ;;  %s6904_s1 = inlined_call_operand.vmem [shape: f32[64,64], index: 1, kind: input, shape index: {}]   ;;  %s6905_s2 = inlined_call_operand.vmem [shape: f32[64,64], index: 2, kind: input, shape index: {}]   ;;  %s6906_s3 = inlined_call_operand.vmem [shape: f32[1,32], index: 3, kind: input, shape index: {}, may-alias: {3,14}]   ;;  %s6907_s4 = inlined_call_operand.vmem [shape: f32[1,32], index: 4, kind: input, shape index: {}, may-alias: {4,15}]   ;;  %s6908_s5 = inlined_call_operand.vmem [shape: f32[32,32], index: 5, kind: input, shape index: {}]   ;;  %s6909_s6 = inlined_call_operand.vmem [shape: f32[1,32], index: 6, kind: input, shape index: {}]   ;;  %s6910_s7 = inlined_call_operand.vmem [shape: f32[32,32], index: 7, kind: input, shape index: {}]   ;;  %s6911_s8 = inlined_call_operand.vmem [shape: f32[1,32], index: 8, kind: input, shape index: {}]   ;;  %s6912_s9 = inlined_call_operand.vmem [shape: f32[32,32], index: 9, kind: input, shape index: {}]   ;;  %s6913_s10 = inlined_call_operand.vmem [shape: f32[1,32], index: 10, kind: input, shape index: {}]   ;;  %s6914_s11 = inlined_call_operand.vmem [shape: f32[32,32], index: 11, kind: input, shape index: {}]   ;;  %s6915_s12 = inlined_call_operand.vmem [shape: f32[1,32], index: 12, kind: input, shape index: {}]   ;;  %s6916_s13 = inlined_call_operand.vmem [shape: f32[4,64,64], index: 13, kind: input, shape index: {}]   ;;  %s6917_s14 = inlined_call_operand.vmem [shape: f32[1,32], index: 14, kind: input, shape index: {}, may-alias: {3,14}]   ;;  %s6918_s15 = inlined_call_operand.vmem [shape: f32[1,32], index: 15, kind: input, shape index: {}, may-alias: {4,15}]   ;;  %s6919_s16 = inlined_call_operand.vmem [shape: f32[32,128], index: 16, kind: input, shape index: {}]   ;;  %s6920_s17 = inlined_call_operand.vmem [shape: f32[1,128], index: 17, kind: input, shape index: {}]   ;;  %s6921_s18 = inlined_call_operand.vmem [shape: f32[128,32], index: 18, kind: input, shape index: {}]   ;;  %s6922_s19 = inlined_call_operand.vmem [shape: f32[1,32], index: 19, kind: input, shape index: {}]   ;;  %s6923_s20 = inlined_call_operand.vmem [shape: f32[128,32], index: 20, kind: output, shape index: {}]  }
   0x1   :  { %6926 = sst [smem:[#allocation2_spill]] %s6903_s0 }
   0x2   :  { %6927 = sst [smem:[#allocation3_spill]] %s6904_s1  ;;  %s5620_s1 = smov 0  }
   0x3   :  { %6928 = sst [smem:[#allocation4_spill]] %s6905_s2 }
   0x4   :  { %6929 = sst [smem:[#allocation5_spill]] %s6906_s3 }
   0x5   :  { %6930 = sst [smem:[#allocation6_spill]] %s6907_s4 }
   0x6 LB: > { %s4028_s22 = sadd.s32 4294967295, %s5506_s1   ;;  %p4032_p0 = scmp.ge.s32.totalorder %s5506_s1, 1  ;;  %s5506_s1 = sphi %s5620_s1, %s30_s1  }
   0x7   : > { %p563_p1 = scmp.lt.s32.totalorder %s5506_s1, 3 }
   0x9   : > { %p564_p2 = pnand %p4032_p0, %p563_p1 }
   0xa   : > { %s4033_s23 = sshll.u32 (!%p564_p2), %s4028_s22, 3  ;;  %s6931_s25 = sld [smem:[#allocation3_spill]] (!%p564_p2)  ;;  %vm649_vm0 = vcmask (!%p564_p2), 523264   ;;  %vm779_vm1 = vcmask (!%p564_p2), 261120   ;;  %vm1295_vm2 = vcmask (!%p564_p2), 64512   ;;  %vm3035_vm4 = vcmask (!%p564_p2), 130048  }
   0xb   : > { %567 = sbr.rel (%p564_p2) target bundleno = 4815 (0x12cf), region = 100  ;;  %p622_p3 = scmp.lt.s32.totalorder (!%p564_p2), %s4033_s23, 15  ;;  %vm5838_vm3 = vmpackc.low (!%p564_p2), %vm1295_vm2, %vm1295_vm2  ;;  %vm3044_vm5 = vcmask (!%p564_p2), 195584  }
   0xc   : > { %s6932_s29 = sld [smem:[#allocation2_spill]] (!%p564_p2)  ;;  %s6933_s2 = sld [smem:[#allocation5_spill]] (!%p564_p2) }
   0xd   : > { %s6934_s28 = sld [smem:[#allocation6_spill]] (!%p564_p2)  ;;  %s5509_s22 = smov (!%p564_p2), 112  }
   0xe   : > { %s5510_s0 = smov (!%p564_p2), 104   ;;  %s5511_s4 = smov (!%p564_p2), 8  }
  0x10   : > { %v641_v0 = vld [vmem:[%s6931_s25] sm:$0xff] (!%p564_p2)  ;;  %v642_v14 = vld [vmem:[%s6931_s25 + $0x8] sm:$0xff] (!%p564_p2)  ;;  %v643_v16 = vld [vmem:[%s6931_s25 + $0x10] sm:$0xff] (!%p564_p2) }
  0x11   : > { %4485 = vmatprep.mubr.msk.f32.mxu0 (!%p564_p2), %vm649_vm0, %v641_v0  ;;  %v645_v1 = vld [vmem:[%s6931_s25 + $0x20] sm:$0xff] (!%p564_p2)  ;;  %v646_v15 = vld [vmem:[%s6931_s25 + $0x28] sm:$0xff] (!%p564_p2)  ;;  %v647_v17 = vld [vmem:[%s6931_s25 + $0x30] sm:$0xff] (!%p564_p2) }
  0x12   : > { %4491 = vmatprep.mubr.msk.f32.mxu1 %vm649_vm0, %v645_v1  ;;  %s6939_s23 = smov (!%p622_p3, %s4033_s23), 15  ;;  %v644_v18 = vld [vmem:[%s6931_s25 + $0x18] sm:$0xff] }
  0x13   : > { %s4034_s27 = sshll.u32 %s6939_s23, 3  ;;  %v648_v19 = vld [vmem:[%s6931_s25 + $0x38] sm:$0xff] }
  0x14   : > { %s5644_s30 = scalar_lea.vmem %s6932_s29, %s4034_s27  ;;  %s5512_s29 = smov 16  }
  0x15   : > { %v633_v2 = vld [vmem:[%s5644_s30] sm:$0xff]  ;;  %v634_v3 = vld [vmem:[%s5644_s30 + $0x8] sm:$0xff]  ;;  %v635_v4 = vld [vmem:[%s5644_s30 + $0x10] sm:$0xff] }
  0x16   : > { %v4893_v5 = vpack.c.bf16 %v634_v3, %v633_v2  ;;  %v636_v6 = vld [vmem:[%s5644_s30 + $0x18] sm:$0xff]  ;;  %v637_v8 = vld [vmem:[%s5644_s30 + $0x20] sm:$0xff]  ;;  %v638_v9 = vld [vmem:[%s5644_s30 + $0x28] sm:$0xff] }
  0x17   : > { %v4897_v7 = vpack.c.bf16 %v636_v6, %v635_v4  ;;  %v4901_v10 = vpack.c.bf16 %v638_v9, %v637_v8  ;;  %v639_v11 = vld [vmem:[%s5644_s30 + $0x30] sm:$0xff]  ;;  %v640_v12 = vld [vmem:[%s5644_s30 + $0x38] sm:$0xff] }
  0x18   : > { %4894 = vmatprep.subr.bf16.mxu0 %v4893_v5  ;;  %5157 = vmatprep.subr.bf16.mxu1 %v4893_v5  ;;  %v4905_v13 = vpack.c.bf16 %v640_v12, %v639_v11  ;;  %v915_v12 = vld [vmem:[%s6908_s5] sm:$0xff] }
  0x19   : > { %4896 = vmatpush3.bf16.msra.mxu0 %v4893_v5  ;;  %5161 = vmatpush3.bf16.msra.mxu1 %v4893_v5 }
  0x1a   : > { %4898 = vmatprep.subr.bf16.mxu0 %v4897_v7  ;;  %5158 = vmatprep.subr.bf16.mxu1 %v4897_v7 }
  0x1d   : > { %4900 = vmatpush3.bf16.msra.mxu0 %v4897_v7  ;;  %5162 = vmatpush3.bf16.msra.mxu1 %v4897_v7 }
  0x1e   : > { %4902 = vmatprep.subr.bf16.mxu0 %v4901_v10  ;;  %5159 = vmatprep.subr.bf16.mxu1 %v4901_v10 }
  0x21   : > { %4904 = vmatpush3.bf16.msra.mxu0 %v4901_v10  ;;  %5163 = vmatpush3.bf16.msra.mxu1 %v4901_v10 }
  0x22   : > { %4906 = vmatprep.subr.bf16.mxu0 %v4905_v13  ;;  %5160 = vmatprep.subr.bf16.mxu1 %v4905_v13 }
  0x25   : > { %4908 = vmatpush3.bf16.msra.mxu0 %v4905_v13  ;;  %5164 = vmatpush3.bf16.msra.mxu1 %v4905_v13  ;;  %v916_v13 = vld [vmem:[%s6908_s5 + $0x8] sm:$0xff] }
  0x28   : > { %4486 = vmatmul.mubr.msk.f32.vlgmr.msra.gmra.mrb[0].mxu0 %vm649_vm0, %v642_v14  ;;  %4492 = vmatmul.mubr.msk.f32.vlgmr.msra.gmra.mrb[0].mxu1 %vm649_vm0, %v646_v15  ;;  %v1171_v14 = vld [vmem:[%s6912_s9] sm:$0xff]  ;;  %v4909_v15 = vpack.c.bf16 %v916_v13, %v915_v12 }
  0x29   : > { %4488 = vmatprep.mubr.msk.f32.mxu0 %vm649_vm0, %v643_v16  ;;  %4494 = vmatprep.mubr.msk.f32.mxu1 %vm649_vm0, %v647_v17  ;;  %v1172_v16 = vld [vmem:[%s6912_s9 + $0x8] sm:$0xff] }
  0x2a   : > { %v4925_v17 = vpack.c.bf16 %v1172_v16, %v1171_v14  ;;  %4910 = vmatprep.subr.bf16.mxu1 %v4909_v15 }
  0x2b   : > { %4912 = vmatpush3.bf16.msra.mxu1 %v4909_v15 }
  0x2c   : > { %4489 = vmatmul.mubr.msk.f32.gmra.mrb[2].mxu0 %vm649_vm0, %v644_v18  ;;  %4495 = vmatmul.mubr.msk.f32.gmra.mrb[2].mxu1 %vm649_vm0, %v648_v19  ;;  %v917_v18 = vld [vmem:[%s6908_s5 + $0x10] sm:$0xff]  ;;  %v918_v19 = vld [vmem:[%s6908_s5 + $0x18] sm:$0xff] }
  0x2d   : > { %4926 = vmatprep.subr.bf16.mxu0 %v4925_v17 }
  0x2e   : > { %4928 = vmatpush3.bf16.msra.mxu0 %v4925_v17 }
  0xfb   : > { %v4487_v20 = vpop.f32.mrb[0].mxu0  ;;  %v4493_v21 = vpop.f32.mrb[0].mxu1 }
  0xfc   : > { %v740_v22 = vpop.f32.mrb[1].mxu0  ;;  %v760_v23 = vpop.f32.mrb[1].mxu1  ;;  %v783_v29 = vsel %vm779_vm1, %v4487_v20, 0.0  ;;  %v795_v34 = vsel %vm779_vm1, %v4493_v21, 0.0 }
  0xfd   : > { %v780_v24 = vsel %vm779_vm1, %v740_v22, 0.0  ;;  %v792_v31 = vsel %vm779_vm1, %v760_v23, 0.0 }
  0xfe   : > { %781 = vadd.xlane.f32.xlu0 %v780_v24  ;;  %v1055_v24 = vld [vmem:[%s6910_s7] sm:$0xff] }
  0xff   : > { %v4490_v25 = vpop.f32.mrb[2].mxu0  ;;  %v4496_v26 = vpop.f32.mrb[2].mxu1 }
 0x100   : > { %v750_v27 = vpop.f32.mrb[3].mxu0  ;;  %v770_v28 = vpop.f32.mrb[3].mxu1  ;;  %v789_v32 = vsel %vm779_vm1, %v4490_v25, 0.0  ;;  %v801_v35 = vsel %vm779_vm1, %v4496_v26, 0.0 }
 0x101   : > { %v786_v30 = vsel %vm779_vm1, %v750_v27, 0.0  ;;  %v798_v33 = vsel %vm779_vm1, %v770_v28, 0.0 }
 0x102   : > { %784 = vadd.xlane.f32.xlu0 %v783_v29  ;;  %787 = vadd.xlane.f32.xlu1 %v786_v30 }
 0x106   : > { %793 = vadd.xlane.f32.xlu0 %v792_v31  ;;  %790 = vadd.xlane.f32.xlu1 %v789_v32 }
 0x10a   : > { %799 = vadd.xlane.f32.xlu0 %v798_v33  ;;  %796 = vadd.xlane.f32.xlu1 %v795_v34 }
 0x10e   : > { %802 = vadd.xlane.f32.xlu1 %v801_v35 }
 0x18b   : > { %v782_v36 = vpop.xlane.xlu0 %781 }
 0x18c   : > { %v805_v37 = vmul.f32 0.03125, %v782_v36 }
 0x18e   : > { %v5686_v38 = vsub.f32 %v740_v22, %v805_v37  ;;  %v1174_v22 = vld [vmem:[%s6912_s9 + $0x18] sm:$0xff] }
 0x18f   : > { %v785_v39 = vpop.xlane.xlu0 %784  ;;  %v788_v40 = vpop.xlane.xlu1 %787 }
 0x190   : > { %v806_v41 = vmul.f32 0.03125, %v785_v39  ;;  %v807_v42 = vmul.f32 0.03125, %v788_v40  ;;  %v821_v43 = vmul.f32 %v5686_v38, %v5686_v38 }
 0x192   : > { %v5690_v44 = vsub.f32 %v4487_v20, %v806_v41  ;;  %v5692_v45 = vsub.f32 %v750_v27, %v807_v42  ;;  %v829_v46 = vsel %vm779_vm1, %v821_v43, 0.0  ;;  %v4913_v20 = vpack.c.bf16 %v918_v19, %v917_v18 }
 0x193   : > { %830 = vadd.xlane.f32.xlu0 %v829_v46  ;;  %v794_v47 = vpop.xlane.xlu0 %793  ;;  %v791_v48 = vpop.xlane.xlu1 %790 }
 0x194   : > { %v809_v49 = vmul.f32 0.03125, %v794_v47  ;;  %v808_v50 = vmul.f32 0.03125, %v791_v48  ;;  %v822_v51 = vmul.f32 %v5690_v44, %v5690_v44  ;;  %v823_v52 = vmul.f32 %v5692_v45, %v5692_v45  ;;  %4914 = vmatprep.subr.bf16.mxu1 %v4913_v20 }
 0x195   : > { %4916 = vmatpush3.bf16.msra.mxu1 %v4913_v20 }
 0x196   : > { %v5699_v53 = vsub.f32 %v760_v23, %v809_v49  ;;  %v5701_v54 = vsub.f32 %v4490_v25, %v808_v50  ;;  %v832_v55 = vsel %vm779_vm1, %v822_v51, 0.0  ;;  %v835_v56 = vsel %vm779_vm1, %v823_v52, 0.0  ;;  %v1056_v25 = vld [vmem:[%s6910_s7 + $0x8] sm:$0xff]  ;;  %v4045_v50 = vld [vmem:[%s6933_s2] ss:$0 sm:$0xff]  ;;  %s5508_s2 = smov 120  }
 0x197   : > { %v800_v57 = vpop.xlane.xlu0 %799  ;;  %833 = vadd.xlane.f32.xlu1 %v832_v55  ;;  %836 = vadd.xlane.f32.xlu0 %v835_v56  ;;  %v797_v58 = vpop.xlane.xlu1 %796 }
 0x198   : > { %v811_v59 = vmul.f32 0.03125, %v800_v57  ;;  %v810_v60 = vmul.f32 0.03125, %v797_v58  ;;  %v825_v61 = vmul.f32 %v5699_v53, %v5699_v53  ;;  %v824_v62 = vmul.f32 %v5701_v54, %v5701_v54  ;;  %v4046_v58 = vld [vmem:[%s6934_s28] ss:$0 sm:$0xff] }
 0x19a   : > { %v5709_v63 = vsub.f32 %v770_v28, %v811_v59  ;;  %v5711_v0 = vsub.f32 %v4493_v21, %v810_v60  ;;  %v841_v1 = vsel %vm779_vm1, %v825_v61, 0.0  ;;  %v838_v2 = vsel %vm779_vm1, %v824_v62, 0.0  ;;  %v1173_v21 = vld [vmem:[%s6912_s9 + $0x10] sm:$0xff] }
 0x19b   : > { %842 = vadd.xlane.f32.xlu0 %v841_v1  ;;  %839 = vadd.xlane.f32.xlu1 %v838_v2  ;;  %v803_v3 = vpop.xlane.xlu1 %802  ;;  %v4929_v23 = vpack.c.bf16 %v1174_v22, %v1173_v21 }
 0x19c   : > { %v812_v4 = vmul.f32 0.03125, %v803_v3  ;;  %v827_v5 = vmul.f32 %v5709_v63, %v5709_v63  ;;  %v826_v6 = vmul.f32 %v5711_v0, %v5711_v0 }
 0x19d   : > { %4930 = vmatprep.subr.bf16.mxu0 %v4929_v23 }
 0x19e   : > { %v5719_v7 = vsub.f32 %v4496_v26, %v812_v4  ;;  %v847_v8 = vsel %vm779_vm1, %v827_v5, 0.0  ;;  %v844_v9 = vsel %vm779_vm1, %v826_v6, 0.0  ;;  %4932 = vmatpush3.bf16.msra.mxu0 %v4929_v23  ;;  %v5756_v26 = vpack.c.bf16 %v1056_v25, %v1055_v24  ;;  %v1057_v4 = vld [vmem:[%s6910_s7 + $0x10] sm:$0xff]  ;;  %v1058_v5 = vld [vmem:[%s6910_s7 + $0x18] sm:$0xff]  ;;  %v5810_v25 = vld [vmem:[%s6909_s6] ss:$0 sm:$0xff] }
 0x19f   : > { %848 = vadd.xlane.f32.xlu0 %v847_v8  ;;  %845 = vadd.xlane.f32.xlu1 %v844_v9  ;;  %v4921_v12 = vpack.c.bf16 %v1058_v5, %v1057_v4 }
 0x1a0   : > { %v828_v10 = vmul.f32 %v5719_v7, %v5719_v7  ;;  %4918 = vmatprep.subr.bf16.mxu1 %v5756_v26 }
 0x1a2   : > { %v850_v11 = vsel %vm779_vm1, %v828_v10, 0.0 }
 0x1a3   : > { %851 = vadd.xlane.f32.xlu1 %v850_v11 }
 0x220   : > { %v831_v27 = vpop.xlane.xlu0 %830 }
 0x221   : > { %v853_v28 = vmul.f32 0.03125, %v831_v27 }
 0x223   : > { %v861_v29 = vadd.f32 1e-05, %v853_v28 }
 0x224   : > { %v837_v30 = vpop.xlane.xlu0 %836  ;;  %v834_v31 = vpop.xlane.xlu1 %833 }
 0x225   : > { %5300 = vrsqrt.f32 %v861_v29  ;;  %v855_v32 = vmul.f32 0.03125, %v837_v30  ;;  %v854_v33 = vmul.f32 0.03125, %v834_v31 }
 0x227   : > { %v863_v34 = vadd.f32 1e-05, %v855_v32  ;;  %v862_v35 = vadd.f32 1e-05, %v854_v33 }
 0x228   : > { %v843_v36 = vpop.xlane.xlu0 %842  ;;  %v840_v37 = vpop.xlane.xlu1 %839 }
 0x229   : > { %5302 = vrsqrt.f32 %v863_v34  ;;  %v857_v39 = vmul.f32 0.03125, %v843_v36  ;;  %v856_v40 = vmul.f32 0.03125, %v840_v37 }
 0x22a   : > { %5304 = vrsqrt.f32 %v862_v35 }
 0x22b   : > { %v865_v41 = vadd.f32 1e-05, %v857_v39  ;;  %v864_v42 = vadd.f32 1e-05, %v856_v40 }
 0x22c   : > { %v849_v43 = vpop.xlane.xlu0 %848  ;;  %v846_v46 = vpop.xlane.xlu1 %845 }
 0x22d   : > { %5306 = vrsqrt.f32 %v865_v41  ;;  %v859_v47 = vmul.f32 0.03125, %v849_v43  ;;  %v858_v48 = vmul.f32 0.03125, %v846_v46 }
 0x22e   : > { %5308 = vrsqrt.f32 %v864_v42 }
 0x22f   : > { %v5301_v49 = vpop.eup %5300  ;;  %v867_v51 = vadd.f32 1e-05, %v859_v47  ;;  %v866_v52 = vadd.f32 1e-05, %v858_v48 }
 0x230   : > { %v852_v55 = vpop.xlane.xlu1 %851  ;;  %v877_v56 = vmul.f32 %v5301_v49, %v5686_v38 }
 0x231   : > { %5310 = vrsqrt.f32 %v867_v51  ;;  %v860_v57 = vmul.f32 0.03125, %v852_v55 }
 0x232   : > { %5312 = vrsqrt.f32 %v866_v52  ;;  %v892_v59 = vmul.f32 %v4045_v50, %v877_v56 }
 0x233   : > { %v5303_v60 = vpop.eup %5302  ;;  %v868_v61 = vadd.f32 1e-05, %v860_v57 }
 0x234   : > { %v5305_v62 = vpop.eup %5304  ;;  %v907_v1 = vadd.f32 %v4046_v58, %v892_v59  ;;  %v879_v2 = vmul.f32 %v5303_v60, %v5692_v45 }
 0x235   : > { %v878_v3 = vmul.f32 %v5305_v62, %v5690_v44  ;;  %5314 = vrsqrt.f32 %v868_v61  ;;  %v4056_v62 = vld [vmem:[%s6911_s8] ss:$0 sm:$0xff] }
 0x236   : > { %4505 = vmatprep.mubr.msk.f32.mxu1 %vm779_vm1, %v907_v1  ;;  %4545 = vmatprep.mubr.msk.f32.mxu0 %vm779_vm1, %v907_v1  ;;  %v894_v38 = vmul.f32 %v4045_v50, %v879_v2 }
 0x237   : > { %v5307_v6 = vpop.eup %5306  ;;  %v893_v8 = vmul.f32 %v4045_v50, %v878_v3 }
 0x238   : > { %v5309_v9 = vpop.eup %5308  ;;  %v909_v45 = vadd.f32 %v4046_v58, %v894_v38  ;;  %v881_v44 = vmul.f32 %v5307_v6, %v5699_v53 }
 0x239   : > { %v908_v10 = vadd.f32 %v4046_v58, %v893_v8  ;;  %v880_v11 = vmul.f32 %v5309_v9, %v5701_v54 }
 0x23a   : > { %v896_v13 = vmul.f32 %v4045_v50, %v881_v44 }
 0x23b   : > { %v5311_v14 = vpop.eup %5310  ;;  %4506 = vmatmul.mubr.msk.f32.vlgmr.msra.gmra.mrb[4].mxu1 %vm779_vm1, %v908_v10  ;;  %4546 = vmatmul.mubr.msk.f32.vlgmr.msra.gmra.mrb[4].mxu0 %vm779_vm1, %v908_v10  ;;  %v895_v15 = vmul.f32 %v4045_v50, %v880_v11 }
 0x23c   : > { %v5313_v16 = vpop.eup %5312  ;;  %4508 = vmatprep.mubr.msk.f32.mxu1 %vm779_vm1, %v909_v45  ;;  %4920 = vmatpush3.bf16.msra.mxu1 %v5756_v26  ;;  %v911_v17 = vadd.f32 %v4046_v58, %v896_v13  ;;  %v883_v18 = vmul.f32 %v5311_v14, %v5709_v63 }
 0x23d   : > { %4548 = vmatprep.mubr.msk.f32.mxu0 %vm779_vm1, %v909_v45  ;;  %v910_v53 = vadd.f32 %v4046_v58, %v895_v15  ;;  %v882_v54 = vmul.f32 %v5313_v16, %v5711_v0  ;;  %4922 = vmatprep.subr.bf16.mxu1 %v4921_v12 }
 0x23e   : > { %v898_v19 = vmul.f32 %v4045_v50, %v883_v18 }
 0x23f   : > { %v5315_v20 = vpop.eup %5314  ;;  %4509 = vmatmul.mubr.msk.f32.gmra.mrb[6].mxu1 %vm779_vm1, %v910_v53  ;;  %4549 = vmatmul.mubr.msk.f32.gmra.mrb[6].mxu0 %vm779_vm1, %v910_v53  ;;  %v897_v21 = vmul.f32 %v4045_v50, %v882_v54 }
 0x240   : > { %4511 = vmatprep.mubr.msk.f32.mxu1 %vm779_vm1, %v911_v17  ;;  %4551 = vmatprep.mubr.msk.f32.mxu0 %vm779_vm1, %v911_v17  ;;  %v913_v22 = vadd.f32 %v4046_v58, %v898_v19  ;;  %v884_v63 = vmul.f32 %v5315_v20, %v5719_v7  ;;  %v4065_v7 = vld [vmem:[%s6913_s10] ss:$0 sm:$0xff] }
 0x241   : > { %v912_v23 = vadd.f32 %v4046_v58, %v897_v21  ;;  %4924 = vmatpush3.bf16.msra.mxu1 %v4921_v12 }
 0x242   : > { %v899_v24 = vmul.f32 %v4045_v50, %v884_v63 }
 0x243   : > { %4512 = vmatmul.mubr.msk.f32.gmra.mrb[8].mxu1 %vm779_vm1, %v912_v23  ;;  %4552 = vmatmul.mubr.msk.f32.gmra.mrb[8].mxu0 %vm779_vm1, %v912_v23 }
 0x244   : > { %4514 = vmatprep.mubr.msk.f32.mxu1 %vm779_vm1, %v913_v22  ;;  %4554 = vmatprep.mubr.msk.f32.mxu0 %vm779_vm1, %v913_v22  ;;  %v914_v0 = vadd.f32 %v4046_v58, %v899_v24 }
 0x247   : > { %4515 = vmatmul.mubr.msk.f32.gmra.mrb[10].mxu1 %vm779_vm1, %v914_v0  ;;  %4555 = vmatmul.mubr.msk.f32.gmra.mrb[10].mxu0 %vm779_vm1, %v914_v0 }
 0x248   : > { %4525 = vmatprep.mubr.msk.f32.mxu1 %vm779_vm1, %v907_v1 }
 0x24b   : > { %4526 = vmatmul.mubr.msk.f32.vlgmr.msra.gmra.mrb[12].mxu1 %vm779_vm1, %v908_v10 }
 0x24c   : > { %4528 = vmatprep.mubr.msk.f32.mxu1 %vm779_vm1, %v909_v45 }
 0x24f   : > { %4529 = vmatmul.mubr.msk.f32.gmra.mrb[14].mxu1 %vm779_vm1, %v910_v53 }
 0x250   : > { %4531 = vmatprep.mubr.msk.f32.mxu1 %vm779_vm1, %v911_v17 }
 0x253   : > { %4532 = vmatmul.mubr.msk.f32.gmra.mrb[16].mxu1 %vm779_vm1, %v912_v23 }
 0x254   : > { %4534 = vmatprep.mubr.msk.f32.mxu1 %vm779_vm1, %v913_v22 }
 0x257   : > { %4535 = vmatmul.mubr.msk.f32.gmra.mrb[18].mxu1 %vm779_vm1, %v914_v0 }
 0x30e   : > { %v5812_v26 = vpop.f32.mrb[4].mxu1  ;;  %v4547_v27 = vpop.f32.mrb[4].mxu0 }
 0x30f   : > { %v1254_v28 = vadd.f32 %v4547_v27, %v4065_v7  ;;  %v1016_v29 = vpop.f32.mrb[5].mxu1  ;;  %v1248_v30 = vpop.f32.mrb[5].mxu0  ;;  %v5868_v23 = vadd.f32 %v5812_v26, %v5810_v25 }
 0x310   : > { %v5815_v31 = vadd.f32 %v5810_v25, %v1016_v29  ;;  %v1249_v32 = vadd.f32 %v4065_v7, %v1248_v30  ;;  %v1288_v29 = vld [vmem:[%s6916_s13 + $0x8] sm:$0xff]  ;;  %v1287_v30 = vld [vmem:[%s6916_s13] sm:$0xff] }
 0x312   : > { %v5817_v33 = vpop.f32.mrb[6].mxu1  ;;  %v4550_v34 = vpop.f32.mrb[6].mxu0  ;;  %4573 = vmatprep.mubr.msk.f32.mxu1 %vm1295_vm2, %v5815_v31  ;;  %v4957_v35 = vpack.c.bf16 %v1254_v28, %v1249_v32  ;;  %v5821_v36 = vpack.i.bf16 %v1254_v28, %v1249_v32 }
 0x313   : > { %v1264_v37 = vadd.f32 %v4550_v34, %v4065_v7  ;;  %v5823_v39 = vpop.f32.mrb[7].mxu1  ;;  %v1258_v40 = vpop.f32.mrb[7].mxu0  ;;  %v5880_v0 = vadd.f32 %v5817_v33, %v5810_v25 }
 0x314   : > { %v1259_v41 = vadd.f32 %v4065_v7, %v1258_v40  ;;  %4958 = vmatprep.subr.bf16.mxu0 %v4957_v35  ;;  %v5872_v24 = vadd.f32 %v5810_v25, %v5823_v39  ;;  %v1289_v39 = vld [vmem:[%s6916_s13 + $0x10] sm:$0xff] }
 0x315   : > { %4960 = vmatpush3.bf16.msra.mxu0 %v4957_v35 }
 0x316   : > { %v5825_v42 = vpop.f32.mrb[8].mxu1  ;;  %v4553_v43 = vpop.f32.mrb[8].mxu0  ;;  %v4961_v46 = vpack.c.bf16 %v1264_v37, %v1259_v41  ;;  %v5827_v47 = vpack.i.bf16 %v1264_v37, %v1259_v41 }
 0x317   : > { %v1274_v48 = vadd.f32 %v4553_v43, %v4065_v7  ;;  %v1036_v49 = vpop.f32.mrb[9].mxu1  ;;  %v1268_v50 = vpop.f32.mrb[9].mxu0  ;;  %v5891_v26 = vadd.f32 %v5825_v42, %v5810_v25 }
 0x318   : > { %v1269_v51 = vadd.f32 %v4065_v7, %v1268_v50  ;;  %4962 = vmatprep.subr.bf16.mxu0 %v4961_v46  ;;  %v1291_v50 = vld [vmem:[%s6916_s13 + $0x20] sm:$0xff] }
 0x319   : > { %4964 = vmatpush3.bf16.msra.mxu0 %v4961_v46 }
 0x31a   : > { %v4516_v52 = vpop.f32.mrb[10].mxu1  ;;  %v4556_v55 = vpop.f32.mrb[10].mxu0  ;;  %v4965_v56 = vpack.c.bf16 %v1274_v48, %v1269_v51  ;;  %v5829_v57 = vpack.i.bf16 %v1274_v48, %v1269_v51  ;;  %v1292_v48 = vld [vmem:[%s6916_s13 + $0x28] sm:$0xff] }
 0x31b   : > { %v1284_v58 = vadd.f32 %v4556_v55, %v4065_v7  ;;  %v1046_v59 = vpop.f32.mrb[11].mxu1  ;;  %v1278_v60 = vpop.f32.mrb[11].mxu0  ;;  %v5901_v28 = vadd.f32 %v4516_v52, %v5810_v25 }
 0x31c   : > { %v1279_v61 = vadd.f32 %v4065_v7, %v1278_v60  ;;  %4966 = vmatprep.subr.bf16.mxu0 %v4965_v56  ;;  %v5883_v7 = vadd.f32 %v5810_v25, %v1036_v49  ;;  %v5894_v27 = vadd.f32 %v5810_v25, %v1046_v59  ;;  %v1290_v25 = vld [vmem:[%s6916_s13 + $0x18] sm:$0xff] }
 0x31d   : > { %4968 = vmatpush3.bf16.msra.mxu0 %v4965_v56  ;;  %v1294_v59 = vld [vmem:[%s6916_s13 + $0x38] sm:$0xff] }
 0x31e   : > { %v4527_v1 = vpop.f32.mrb[12].mxu1  ;;  %v4969_v2 = vpack.c.bf16 %v1284_v58, %v1279_v61  ;;  %v5834_v3 = vpack.i.bf16 %v1284_v58, %v1279_v61  ;;  %v1293_v61 = vld [vmem:[%s6916_s13 + $0x30] sm:$0xff] }
 0x31f   : > { %v1138_v38 = vadd.f32 %v4527_v1, %v4056_v62  ;;  %v1132_v4 = vpop.f32.mrb[13].mxu1 }
 0x320   : > { %v1133_v5 = vadd.f32 %v4056_v62, %v1132_v4  ;;  %4970 = vmatprep.subr.bf16.mxu0 %v4969_v2 }
 0x321   : > { %4972 = vmatpush3.bf16.msra.mxu0 %v4969_v2 }
 0x322   : > { %v4530_v8 = vpop.f32.mrb[14].mxu1  ;;  %v4933_v9 = vpack.c.bf16 %v1138_v38, %v1133_v5  ;;  %v5842_v45 = vpack.i.bf16 %v1138_v38, %v1133_v5 }
 0x323   : > { %v1148_v44 = vadd.f32 %v4530_v8, %v4056_v62  ;;  %v1142_v10 = vpop.f32.mrb[15].mxu1 }
 0x324   : > { %v1143_v11 = vadd.f32 %v4056_v62, %v1142_v10  ;;  %4935 = vmatprep.subr.msk.bf16.mxu1 %vm5838_vm3, %v4933_v9 }
 0x325   : > { %4938 = vmatpush3.bf16.xpose.msk.msra.mxu1 %vm5838_vm3, %v4933_v9 }
 0x326   : > { %v4533_v12 = vpop.f32.mrb[16].mxu1  ;;  %v4939_v13 = vpack.c.bf16 %v1148_v44, %v1143_v11  ;;  %v5848_v14 = vpack.i.bf16 %v1148_v44, %v1143_v11 }
 0x327   : > { %v1158_v15 = vadd.f32 %v4533_v12, %v4056_v62  ;;  %v1152_v16 = vpop.f32.mrb[17].mxu1 }
 0x328   : > { %v1153_v17 = vadd.f32 %v4056_v62, %v1152_v16  ;;  %4941 = vmatprep.subr.msk.bf16.mxu1 %vm5838_vm3, %v4939_v13 }
 0x32a   : > { %v4536_v18 = vpop.f32.mrb[18].mxu1  ;;  %v4945_v53 = vpack.c.bf16 %v1158_v15, %v1153_v17  ;;  %v5852_v54 = vpack.i.bf16 %v1158_v15, %v1153_v17 }
 0x32b   : > { %v1168_v19 = vadd.f32 %v4536_v18, %v4056_v62  ;;  %v1162_v20 = vpop.f32.mrb[19].mxu1 }
 0x32c   : > { %v1163_v21 = vadd.f32 %v4056_v62, %v1162_v20 }
 0x32d   : > { %4944 = vmatpush3.bf16.xpose.msk.msra.mxu1 %vm5838_vm3, %v4939_v13 }
 0x32e   : > { %4947 = vmatprep.subr.msk.bf16.mxu1 %vm5838_vm3, %v4945_v53  ;;  %v4951_v22 = vpack.c.bf16 %v1168_v19, %v1163_v21  ;;  %v5858_v63 = vpack.i.bf16 %v1168_v19, %v1163_v21 }
 0x335   : > { %4950 = vmatpush3.bf16.xpose.msk.msra.mxu1 %vm5838_vm3, %v4945_v53 }
 0x336   : > { %4953 = vmatprep.subr.msk.bf16.mxu1 %vm5838_vm3, %v4951_v22 }
 0x33d   : > { %4956 = vmatpush3.bf16.xpose.msk.msra.mxu1 %vm5838_vm3, %v4951_v22 }
 0x344   : > { %4574 = vmatmul.mubr.msk.f32.vlgmr.msra.gmra.mrb[20].mxu1 %vm1295_vm2, %v5868_v23 }
 0x345   : > { %4576 = vmatprep.mubr.msk.f32.mxu1 %vm1295_vm2, %v5872_v24 }
 0x348   : > { %4577 = vmatmul.mubr.msk.f32.gmra.mrb[22].mxu1 %vm1295_vm2, %v5880_v0 }
 0x349   : > { %4579 = vmatprep.mubr.msk.f32.mxu1 %vm1295_vm2, %v5883_v7 }
 0x34c   : > { %4580 = vmatmul.mubr.msk.f32.gmra.mrb[24].mxu1 %vm1295_vm2, %v5891_v26 }
 0x34d   : > { %4582 = vmatprep.mubr.msk.f32.mxu1 %vm1295_vm2, %v5894_v27 }
 0x350   : > { %4583 = vmatmul.mubr.msk.f32.gmra.mrb[26].mxu1 %vm1295_vm2, %v5901_v28 }
 0x417   : > { %v4575_v32 = vpop.f32.mrb[20].mxu1 }
 0x418   : > { %v1416_v33 = vadd.f32 %v4575_v32, %v1288_v29  ;;  %v1410_v34 = vpop.f32.mrb[21].mxu1 }
 0x419   : > { %v1411_v35 = vadd.f32 %v1410_v34, %v1287_v30 }
 0x41a   : > { %v1452_v37 = vsel %vm649_vm0, %v1416_v33, -inf }
 0x41b   : > { %1453 = vmax.xlane.f32.xlu1 %v1452_v37  ;;  %v4578_v40 = vpop.f32.mrb[22].mxu1  ;;  %v1449_v41 = vsel %vm649_vm0, %v1411_v35, -inf }
 0x41c   : > { %v1426_v42 = vadd.f32 %v4578_v40, %v1290_v25  ;;  %v1420_v43 = vpop.f32.mrb[23].mxu1  ;;  %1450 = vmax.xlane.f32.xlu0 %v1449_v41 }
 0x41d   : > { %v1421_v46 = vadd.f32 %v1420_v43, %v1289_v39 }
 0x41e   : > { %v1458_v49 = vsel %vm649_vm0, %v1426_v42, -inf }
 0x41f   : > { %1459 = vmax.xlane.f32.xlu1 %v1458_v49  ;;  %v4581_v51 = vpop.f32.mrb[24].mxu1  ;;  %v1455_v52 = vsel %vm649_vm0, %v1421_v46, -inf }
 0x420   : > { %v1436_v55 = vadd.f32 %v4581_v51, %v1292_v48  ;;  %v1430_v56 = vpop.f32.mrb[25].mxu1  ;;  %1456 = vmax.xlane.f32.xlu0 %v1455_v52 }
 0x421   : > { %v1431_v58 = vadd.f32 %v1430_v56, %v1291_v50 }
 0x422   : > { %v1464_v60 = vsel %vm649_vm0, %v1436_v55, -inf }
 0x423   : > { %1465 = vmax.xlane.f32.xlu1 %v1464_v60  ;;  %v4584_v62 = vpop.f32.mrb[26].mxu1  ;;  %v1461_v1 = vsel %vm649_vm0, %v1431_v58, -inf }
 0x424   : > { %v1446_v2 = vadd.f32 %v4584_v62, %v1294_v59  ;;  %1462 = vmax.xlane.f32.xlu0 %v1461_v1  ;;  %v1440_v38 = vpop.f32.mrb[27].mxu1 }
 0x425   : > { %v1441_v4 = vadd.f32 %v1440_v38, %v1293_v61 }
 0x426   : > { %v1470_v5 = vsel %vm649_vm0, %v1446_v2, -inf }
 0x427   : > { %1471 = vmax.xlane.f32.xlu1 %v1470_v5  ;;  %v1467_v8 = vsel %vm649_vm0, %v1441_v4, -inf }
 0x428   : > { %1468 = vmax.xlane.f32.xlu0 %v1467_v8 }
 0x4a8   : > { %v1454_v9 = vpop.xlane.xlu1 %1453 }
 0x4a9   : > { %v1474_v44 = vsub.f32 %v1416_v33, %v1454_v9  ;;  %v1451_v10 = vpop.xlane.xlu0 %1450 }
 0x4aa   : > { %v1473_v11 = vsub.f32 %v1411_v35, %v1451_v10 }
 0x4ab   : > { %v1483_v12 = vmul.f32 1.442695, %v1474_v44 }
 0x4ac   : > { %v1481_v13 = vmul.f32 1.442695, %v1473_v11  ;;  %v1460_v53 = vpop.xlane.xlu1 %1459 }
 0x4ad   : > { %5316 = vpow2.f32 %v1483_v12  ;;  %v1457_v19 = vpop.xlane.xlu0 %1456  ;;  %v1476_v20 = vsub.f32 %v1426_v42, %v1460_v53 }
 0x4ae   : > { %5318 = vpow2.f32 %v1481_v13  ;;  %v1475_v21 = vsub.f32 %v1421_v46, %v1457_v19 }
 0x4af   : > { %v1487_v30 = vmul.f32 1.442695, %v1476_v20 }
 0x4b0   : > { %v1466_v22 = vpop.xlane.xlu1 %1465  ;;  %v1485_v33 = vmul.f32 1.442695, %v1475_v21 }
 0x4b1   : > { %v1463_v29 = vpop.xlane.xlu0 %1462  ;;  %v1478_v32 = vsub.f32 %v1436_v55, %v1466_v22  ;;  %5320 = vpow2.f32 %v1487_v30 }
 0x4b2   : > { %v1477_v34 = vsub.f32 %v1431_v58, %v1463_v29  ;;  %5322 = vpow2.f32 %v1485_v33 }
 0x4b3   : > { %v1491_v35 = vmul.f32 1.442695, %v1478_v32 }
 0x4b4   : > { %v1489_v25 = vmul.f32 1.442695, %v1477_v34  ;;  %v1472_v49 = vpop.xlane.xlu1 %1471 }
 0x4b5   : > { %5324 = vpow2.f32 %v1491_v35  ;;  %v1480_v50 = vsub.f32 %v1446_v2, %v1472_v49  ;;  %v1469_v51 = vpop.xlane.xlu0 %1468 }
 0x4b6   : > { %5326 = vpow2.f32 %v1489_v25  ;;  %v1479_v55 = vsub.f32 %v1441_v4, %v1469_v51 }
 0x4b7   : > { %v5937_v15 = vpop.eup %5316  ;;  %v1495_v52 = vmul.f32 1.442695, %v1480_v50 }
 0x4b8   : > { %v5939_v16 = vpop.eup %5318  ;;  %v1500_v17 = vsel %vm649_vm0, %v5937_v15, 0.0  ;;  %v1493_v56 = vmul.f32 1.442695, %v1479_v55 }
 0x4b9   : > { %1501 = vadd.xlane.f32.xlu1 %v1500_v17  ;;  %v1497_v18 = vsel %vm649_vm0, %v5939_v16, 0.0  ;;  %5328 = vpow2.f32 %v1495_v52 }
 0x4ba   : > { %1498 = vadd.xlane.f32.xlu0 %v1497_v18  ;;  %5330 = vpow2.f32 %v1493_v56 }
 0x4bb   : > { %v5949_v37 = vpop.eup %5320 }
 0x4bc   : > { %v5951_v39 = vpop.eup %5322  ;;  %v1506_v40 = vsel %vm649_vm0, %v5949_v37, 0.0 }
 0x4bd   : > { %v1503_v42 = vsel %vm649_vm0, %v5951_v39, 0.0 }
 0x4bf   : > { %v5955_v41 = vpop.eup %5324 }
 0x4c0   : > { %v5959_v43 = vpop.eup %5326  ;;  %v1512_v46 = vsel %vm649_vm0, %v5955_v41, 0.0 }
 0x4c1   : > { %v1509_v48 = vsel %vm649_vm0, %v5959_v43, 0.0 }
 0x4c3   : > { %v5977_v58 = vpop.eup %5328 }
 0x4c4   : > { %v1518_v59 = vsel %vm649_vm0, %v5977_v58, 0.0  ;;  %v5981_v60 = vpop.eup %5330 }
 0x4c5   : > { %v1515_v61 = vsel %vm649_vm0, %v5981_v60, 0.0 }
 0x4ca   : > { %5186 = vrot.lane.b32.xlu1 %v5848_v14, %s5508_s2 }
 0x4d0   : > { %5181 = vrot.lane.b32.xlu0 %v5842_v45, %s5508_s2 }
 0x4ee   : > { %1507 = vadd.xlane.f32.xlu1 %v1506_v40 }
 0x4ef   : > { %1504 = vadd.xlane.f32.xlu0 %v1503_v42 }
 0x4f2   : > { %1513 = vadd.xlane.f32.xlu1 %v1512_v46 }
 0x4f3   : > { %1510 = vadd.xlane.f32.xlu0 %v1509_v48 }
 0x503   : > { %5196 = vrot.lane.b32.xlu1 %v5858_v63, %s5508_s2 }
 0x509   : > { %5191 = vrot.lane.b32.xlu0 %v5852_v54, %s5508_s2 }
 0x50d   : > { %1675 = vrot.lane.b32.xlu0 %v5815_v31, %s5508_s2 }
 0x511   : > { %1679 = vrot.lane.b32.xlu0 %v5872_v24, %s5508_s2 }
 0x515   : > { %1683 = vrot.lane.b32.xlu0 %v5883_v7, %s5508_s2 }
 0x519   : > { %1687 = vrot.lane.b32.xlu0 %v5894_v27, %s5508_s2 }
 0x527   : > { %1519 = vadd.xlane.f32.xlu1 %v1518_v59 }
 0x52b   : > { %1516 = vadd.xlane.f32.xlu1 %v1515_v61 }
 0x53c   : > { %1677 = vrot.lane.b32.xlu1 %v5868_v23, %s5508_s2 }
 0x540   : > { %1681 = vrot.lane.b32.xlu1 %v5880_v0, %s5508_s2 }
 0x544   : > { %1685 = vrot.lane.b32.xlu1 %v5891_v26, %s5508_s2 }
 0x546   : > { %v1502_v62 = vpop.xlane.xlu1 %1501 }
 0x547   : > { %5332 = vrcp.f32 %v1502_v62  ;;  %v1499_v1 = vpop.xlane.xlu0 %1498 }
 0x548   : > { %5334 = vrcp.f32 %v1499_v1  ;;  %1689 = vrot.lane.b32.xlu1 %v5901_v28, %s5508_s2 }
 0x54a   : > { %v5187_v8 = vpop.permute.xlu1 %5186 }
 0x54b   : > { %v5182_v2 = vpop.permute.xlu0 %5181  ;;  %v5189_v10 = vunpack.i.h.bf16 %v5187_v8  ;;  %v5188_v11 = vunpack.i.l.bf16 %v5187_v8 }
 0x54c   : > { %v5184_v38 = vunpack.i.h.bf16 %v5182_v2  ;;  %v5183_v4 = vunpack.i.l.bf16 %v5182_v2 }
 0x54d   : > { %v4979_v17 = vpack.c.bf16 %v5189_v10, %v5188_v11  ;;  %v4099_v10 = vld [vmem:[%s6916_s13 + $0x48] sm:$0xff]  ;;  %v4098_v11 = vld [vmem:[%s6916_s13 + $0x40] sm:$0xff] }
 0x54e   : > { %v4973_v5 = vpack.c.bf16 %v5184_v38, %v5183_v4 }
 0x550   : > { %4975 = vmatprep.subr.msk.bf16.mxu0 %vm5838_vm3, %v4973_v5 }
 0x551   : > { %v5333_v9 = vpop.eup %5332 }
 0x552   : > { %v5335_v44 = vpop.eup %5334  ;;  %v1524_v13 = vmul.f32 %v5333_v9, %v5937_v15 }
 0x553   : > { %v1522_v12 = vmul.f32 %v5335_v44, %v5939_v16 }
 0x555   : > { %4601 = vmatprep.mubr.msk.f32.mxu0 %vm649_vm0, %v1522_v12 }
 0x556   : > { %4602 = vmatmul.mubr.msk.f32.vlgmr.msra.gmra.mrb[12].mxu0 %vm649_vm0, %v1524_v13 }
 0x557   : > { %4978 = vmatpush3.bf16.xpose.msk.msra.mxu0 %vm5838_vm3, %v4973_v5 }
 0x558   : > { %4981 = vmatprep.subr.msk.bf16.mxu0 %vm5838_vm3, %v4979_v17 }
 0x55f   : > { %4984 = vmatpush3.bf16.xpose.msk.msra.mxu0 %vm5838_vm3, %v4979_v17 }
 0x57b   : > { %v1508_v18 = vpop.xlane.xlu1 %1507 }
 0x57c   : > { %5336 = vrcp.f32 %v1508_v18  ;;  %v1505_v53 = vpop.xlane.xlu0 %1504 }
 0x57d   : > { %5338 = vrcp.f32 %v1505_v53  ;;  %v4101_v53 = vld [vmem:[%s6916_s13 + $0x58] sm:$0xff] }
 0x57f   : > { %v1514_v16 = vpop.xlane.xlu1 %1513 }
 0x580   : > { %5340 = vrcp.f32 %v1514_v16  ;;  %v1511_v15 = vpop.xlane.xlu0 %1510 }
 0x581   : > { %5342 = vrcp.f32 %v1511_v15 }
 0x583   : > { %v5197_v19 = vpop.permute.xlu1 %5196 }
 0x584   : > { %v5192_v20 = vpop.permute.xlu0 %5191  ;;  %v5199_v21 = vunpack.i.h.bf16 %v5197_v19  ;;  %v5198_v22 = vunpack.i.l.bf16 %v5197_v19 }
 0x585   : > { %v5194_v29 = vunpack.i.h.bf16 %v5192_v20  ;;  %v5193_v30 = vunpack.i.l.bf16 %v5192_v20 }
 0x586   : > { %v5337_v32 = vpop.eup %5336  ;;  %v4991_v25 = vpack.c.bf16 %v5199_v21, %v5198_v22  ;;  %v4100_v22 = vld [vmem:[%s6916_s13 + $0x50] sm:$0xff] }
 0x587   : > { %v5339_v33 = vpop.eup %5338  ;;  %v4985_v34 = vpack.c.bf16 %v5194_v29, %v5193_v30  ;;  %v1528_v40 = vmul.f32 %v5337_v32, %v5949_v37  ;;  %v4103_v29 = vld [vmem:[%s6916_s13 + $0x68] sm:$0xff] }
 0x588   : > { %v1526_v35 = vmul.f32 %v5339_v33, %v5951_v39  ;;  %v1676_v50 = vpop.permute.xlu0 %1675 }
 0x589   : > { %4987 = vmatprep.subr.msk.bf16.mxu0 %vm5838_vm3, %v4985_v34 }
 0x58a   : > { %v5341_v42 = vpop.eup %5340  ;;  %4604 = vmatprep.mubr.msk.f32.mxu0 %vm649_vm0, %v1526_v35  ;;  %4990 = vmatpush3.bf16.xpose.msk.msra.mxu0 %vm5838_vm3, %v4985_v34 }
 0x58b   : > { %v5343_v46 = vpop.eup %5342  ;;  %4605 = vmatmul.mubr.msk.f32.gmra.mrb[14].mxu0 %vm649_vm0, %v1528_v40  ;;  %4993 = vmatprep.subr.msk.bf16.mxu0 %vm5838_vm3, %v4991_v25  ;;  %v1532_v48 = vmul.f32 %v5341_v42, %v5955_v41  ;;  %v4105_v40 = vld [vmem:[%s6916_s13 + $0x78] sm:$0xff] }
 0x58c   : > { %v1530_v39 = vmul.f32 %v5343_v46, %v5959_v43  ;;  %v1680_v41 = vpop.permute.xlu0 %1679 }
 0x58e   : > { %4607 = vmatprep.mubr.msk.f32.mxu0 %vm649_vm0, %v1530_v39 }
 0x58f   : > { %4608 = vmatmul.mubr.msk.f32.gmra.mrb[16].mxu0 %vm649_vm0, %v1532_v48 }
 0x590   : > { %v1684_v61 = vpop.permute.xlu0 %1683 }
 0x592   : > { %4996 = vmatpush3.bf16.xpose.msk.msra.mxu0 %vm5838_vm3, %v4991_v25  ;;  %v4102_v25 = vld [vmem:[%s6916_s13 + $0x60] sm:$0xff] }
 0x5b4   : > { %v1520_v37 = vpop.xlane.xlu1 %1519 }
 0x5b5   : > { %5344 = vrcp.f32 %v1520_v37 }
 0x5b8   : > { %v1517_v49 = vpop.xlane.xlu1 %1516 }
 0x5b9   : > { %5346 = vrcp.f32 %v1517_v49 }
 0x5bc   : > { %v1678_v55 = vpop.permute.xlu1 %1677 }
 0x5bf   : > { %v5345_v51 = vpop.eup %5344 }
 0x5c0   : > { %v1536_v43 = vmul.f32 %v5345_v51, %v5977_v58  ;;  %v1682_v59 = vpop.permute.xlu1 %1681 }
 0x5c3   : > { %v5347_v52 = vpop.eup %5346 }
 0x5c4   : > { %v1534_v56 = vmul.f32 %v5347_v52, %v5981_v60  ;;  %v1686_v62 = vpop.permute.xlu1 %1685  ;;  %v1688_v60 = vpop.permute.xlu0 %1687 }
 0x5c6   : > { %4610 = vmatprep.mubr.msk.f32.mxu0 %vm649_vm0, %v1534_v56 }
 0x5c7   : > { %4611 = vmatmul.mubr.msk.f32.gmra.mrb[18].mxu0 %vm649_vm0, %v1536_v43 }
 0x5c8   : > { %4629 = vmatprep.mubr.msk.f32.mxu0 %vm1295_vm2, %v1676_v50  ;;  %v1690_v58 = vpop.permute.xlu1 %1689  ;;  %v4104_v50 = vld [vmem:[%s6916_s13 + $0x70] sm:$0xff] }
 0x5cb   : > { %4630 = vmatmul.mubr.msk.f32.vlgmr.msra.gmra.mrb[20].mxu0 %vm1295_vm2, %v1678_v55 }
 0x5cc   : > { %4632 = vmatprep.mubr.msk.f32.mxu0 %vm1295_vm2, %v1680_v41 }
 0x5cf   : > { %4633 = vmatmul.mubr.msk.f32.gmra.mrb[22].mxu0 %vm1295_vm2, %v1682_v59 }
 0x5d0   : > { %4635 = vmatprep.mubr.msk.f32.mxu0 %vm1295_vm2, %v1684_v61 }
 0x5d3   : > { %4636 = vmatmul.mubr.msk.f32.gmra.mrb[24].mxu0 %vm1295_vm2, %v1686_v62 }
 0x5d4   : > { %4638 = vmatprep.mubr.msk.f32.mxu0 %vm1295_vm2, %v1688_v60 }
 0x5d7   : > { %4639 = vmatmul.mubr.msk.f32.gmra.mrb[26].mxu0 %vm1295_vm2, %v1690_v58 }
 0x629   : > { %v6033_v1 = vpop.f32.mrb[12].mxu0 }
 0x62a   : > { %v6035_v2 = vpop.f32.mrb[13].mxu0 }
 0x65e   : > { %v6037_v38 = vpop.f32.mrb[14].mxu0 }
 0x65f   : > { %v6039_v4 = vpop.f32.mrb[15].mxu0 }
 0x662   : > { %v6041_v5 = vpop.f32.mrb[16].mxu0 }
 0x663   : > { %v6043_v8 = vpop.f32.mrb[17].mxu0 }
 0x69a   : > { %v6045_v9 = vpop.f32.mrb[18].mxu0 }
 0x69b   : > { %v6047_v44 = vpop.f32.mrb[19].mxu0 }
 0x69e   : > { %v4631_v12 = vpop.f32.mrb[20].mxu0 }
 0x69f   : > { %v1811_v13 = vadd.f32 %v4631_v12, %v4099_v10  ;;  %v1805_v17 = vpop.f32.mrb[21].mxu0 }
 0x6a0   : > { %v1806_v18 = vadd.f32 %v4098_v11, %v1805_v17 }
 0x6a1   : > { %v1847_v16 = vsel %vm649_vm0, %v1811_v13, -inf }
 0x6a2   : > { %1848 = vmax.xlane.f32.xlu1 %v1847_v16  ;;  %v4634_v15 = vpop.f32.mrb[22].mxu0  ;;  %v1844_v19 = vsel %vm649_vm0, %v1806_v18, -inf }
 0x6a3   : > { %v1821_v20 = vadd.f32 %v4634_v15, %v4101_v53  ;;  %v1815_v21 = vpop.f32.mrb[23].mxu0  ;;  %1845 = vmax.xlane.f32.xlu0 %v1844_v19 }
 0x6a4   : > { %v1816_v32 = vadd.f32 %v4100_v22, %v1815_v21 }
 0x6a5   : > { %v1853_v30 = vsel %vm649_vm0, %v1821_v20, -inf }
 0x6a6   : > { %v4637_v33 = vpop.f32.mrb[24].mxu0  ;;  %v1850_v48 = vsel %vm649_vm0, %v1816_v32, -inf }
 0x6a7   : > { %v1831_v34 = vadd.f32 %v4637_v33, %v4103_v29  ;;  %v1825_v35 = vpop.f32.mrb[25].mxu0  ;;  %1854 = vmax.xlane.f32.xlu0 %v1853_v30 }
 0x6a8   : > { %v1826_v46 = vadd.f32 %v4102_v25, %v1825_v35 }
 0x6a9   : > { %v1859_v42 = vsel %vm649_vm0, %v1831_v34, -inf }
 0x6aa   : > { %1860 = vmax.xlane.f32.xlu1 %v1859_v42  ;;  %v4640_v39 = vpop.f32.mrb[26].mxu0  ;;  %v1856_v55 = vsel %vm649_vm0, %v1826_v46, -inf }
 0x6ab   : > { %v6075_v37 = vadd.f32 %v4640_v39, %v4105_v40  ;;  %v1835_v49 = vpop.f32.mrb[27].mxu0  ;;  %1851 = vmax.xlane.f32.xlu0 %v1850_v48 }
 0x6ac   : > { %v6082_v52 = vadd.f32 %v4104_v50, %v1835_v49 }
 0x6ad   : > { %v1865_v51 = vsel %vm649_vm0, %v6075_v37, -inf }
 0x6ae   : > { %1866 = vmax.xlane.f32.xlu1 %v1865_v51  ;;  %v1862_v56 = vsel %vm649_vm0, %v6082_v52, -inf }
 0x6af   : > { %1857 = vmax.xlane.f32.xlu0 %v1856_v55 }
 0x6b3   : > { %1863 = vmax.xlane.f32.xlu0 %v1862_v56 }
 0x6bf   : > { %5206 = vrot.lane.b32.xlu1 %v5827_v47, %s5508_s2 }
 0x6c3   : > { %5211 = vrot.lane.b32.xlu1 %v5829_v57, %s5508_s2 }
 0x6c7   : > { %5216 = vrot.lane.b32.xlu1 %v5834_v3, %s5508_s2 }
 0x6c9   : > { %5201 = vrot.lane.b32.xlu0 %v5821_v36, %s5508_s2 }
 0x6cb   : > { %5226 = vrot.lane.b32.xlu1 %v5848_v14, %s5509_s22 }
 0x6cd   : > { %5221 = vrot.lane.b32.xlu0 %v5842_v45, %s5509_s22 }
 0x72f   : > { %v1849_v43 = vpop.xlane.xlu1 %1848 }
 0x730   : > { %v1869_v41 = vsub.f32 %v1811_v13, %v1849_v43  ;;  %v1846_v59 = vpop.xlane.xlu0 %1845 }
 0x731   : > { %v1868_v61 = vsub.f32 %v1806_v18, %v1846_v59 }
 0x732   : > { %v1878_v62 = vmul.f32 1.442695, %v1869_v41 }
 0x733   : > { %v1876_v60 = vmul.f32 1.442695, %v1868_v61 }
 0x734   : > { %5348 = vpow2.f32 %v1878_v62  ;;  %v1855_v58 = vpop.xlane.xlu0 %1854 }
 0x735   : > { %5350 = vpow2.f32 %v1876_v60  ;;  %v1871_v10 = vsub.f32 %v1821_v20, %v1855_v58 }
 0x737   : > { %v1882_v11 = vmul.f32 1.442695, %v1871_v10  ;;  %v1861_v12 = vpop.xlane.xlu1 %1860 }
 0x738   : > { %v1873_v17 = vsub.f32 %v1831_v34, %v1861_v12  ;;  %v1852_v53 = vpop.xlane.xlu0 %1851 }
 0x739   : > { %5352 = vpow2.f32 %v1882_v11  ;;  %v1870_v16 = vsub.f32 %v1816_v32, %v1852_v53 }
 0x73a   : > { %v1886_v15 = vmul.f32 1.442695, %v1873_v17 }
 0x73b   : > { %v1880_v19 = vmul.f32 1.442695, %v1870_v16  ;;  %v1867_v21 = vpop.xlane.xlu1 %1866 }
 0x73c   : > { %v1858_v22 = vpop.xlane.xlu0 %1857 }
 0x73d   : > { %5354 = vpow2.f32 %v1880_v19  ;;  %v1872_v13 = vsub.f32 %v1826_v46, %v1858_v22  ;;  %v1875_v22 = vsub.f32 %v6075_v37, %v1867_v21 }
 0x73e   : > { %v6099_v29 = vpop.eup %5348  ;;  %5356 = vpow2.f32 %v1886_v15 }
 0x73f   : > { %v6101_v18 = vpop.eup %5350  ;;  %v1884_v30 = vmul.f32 1.442695, %v1872_v13  ;;  %v5207_v33 = vpop.permute.xlu1 %5206  ;;  %v1895_v20 = vsel %vm649_vm0, %v6099_v29, 0.0  ;;  %v1890_v13 = vmul.f32 1.442695, %v1875_v22 }
 0x740   : > { %1896 = vadd.xlane.f32.xlu1 %v1895_v20  ;;  %v1864_v34 = vpop.xlane.xlu0 %1863  ;;  %v1892_v32 = vsel %vm649_vm0, %v6101_v18, 0.0  ;;  %v5209_v46 = vunpack.i.h.bf16 %v5207_v33  ;;  %v5208_v39 = vunpack.i.l.bf16 %v5207_v33 }
 0x741   : > { %1893 = vadd.xlane.f32.xlu0 %v1892_v32  ;;  %5358 = vpow2.f32 %v1884_v30  ;;  %v1874_v30 = vsub.f32 %v6082_v52, %v1864_v34 }
 0x742   : > { %v5001_v59 = vpack.c.bf16 %v5209_v46, %v5208_v39  ;;  %5360 = vpow2.f32 %v1890_v13 }
 0x743   : > { %v6107_v35 = vpop.eup %5352  ;;  %v5212_v25 = vpop.permute.xlu1 %5211  ;;  %v1888_v33 = vmul.f32 1.442695, %v1874_v30 }
 0x744   : > { %v5202_v40 = vpop.permute.xlu0 %5201  ;;  %v1901_v42 = vsel %vm649_vm0, %v6107_v35, 0.0  ;;  %v5214_v43 = vunpack.i.h.bf16 %v5212_v25  ;;  %v5213_v41 = vunpack.i.l.bf16 %v5212_v25 }
 0x745   : > { %v5204_v48 = vunpack.i.h.bf16 %v5202_v40  ;;  %v5203_v49 = vunpack.i.l.bf16 %v5202_v40  ;;  %1902 = vadd.xlane.f32.xlu1 %v1901_v42  ;;  %5362 = vpow2.f32 %v1888_v33 }
 0x746   : > { %v5005_v11 = vpack.c.bf16 %v5214_v43, %v5213_v41 }
 0x747   : > { %v6111_v50 = vpop.eup %5354  ;;  %v4997_v51 = vpack.c.bf16 %v5204_v48, %v5203_v49  ;;  %v5217_v61 = vpop.permute.xlu1 %5216 }
 0x748   : > { %v1898_v55 = vsel %vm649_vm0, %v6111_v50, 0.0  ;;  %v6115_v56 = vpop.eup %5356  ;;  %v5219_v58 = vunpack.i.h.bf16 %v5217_v61  ;;  %v5218_v10 = vunpack.i.l.bf16 %v5217_v61  ;;  %v5222_v12 = vpop.permute.xlu0 %5221 }
 0x749   : > { %1899 = vadd.xlane.f32.xlu0 %v1898_v55  ;;  %4998 = vmatprep.subr.bf16.mxu1 %v4997_v51  ;;  %v1907_v62 = vsel %vm649_vm0, %v6115_v56, 0.0  ;;  %v5224_v53 = vunpack.i.h.bf16 %v5222_v12  ;;  %v5223_v16 = vunpack.i.l.bf16 %v5222_v12 }
 0x74a   : > { %5000 = vmatpush3.bf16.msra.mxu1 %v4997_v51  ;;  %v5009_v15 = vpack.c.bf16 %v5219_v58, %v5218_v10 }
 0x74b   : > { %5002 = vmatprep.subr.bf16.mxu1 %v5001_v59  ;;  %v6119_v60 = vpop.eup %5358  ;;  %v5013_v19 = vpack.c.bf16 %v5224_v53, %v5223_v16  ;;  %v5227_v34 = vpop.permute.xlu1 %5226 }
 0x74c   : > { %v1904_v17 = vsel %vm649_vm0, %v6119_v60, 0.0  ;;  %v6137_v20 = vpop.eup %5360  ;;  %v5229_v48 = vunpack.i.h.bf16 %v5227_v34  ;;  %v5228_v49 = vunpack.i.l.bf16 %v5227_v34 }
 0x74d   : > { %1908 = vadd.xlane.f32.xlu0 %v1907_v62  ;;  %v1913_v37 = vsel %vm649_vm0, %v6137_v20, 0.0 }
 0x74e   : > { %5004 = vmatpush3.bf16.msra.mxu1 %v5001_v59  ;;  %v5019_v41 = vpack.c.bf16 %v5229_v48, %v5228_v49 }
 0x74f   : > { %5006 = vmatprep.subr.bf16.mxu1 %v5005_v11  ;;  %v6143_v52 = vpop.eup %5362 }
 0x750   : > { %v1910_v21 = vsel %vm649_vm0, %v6143_v52, 0.0 }
 0x751   : > { %1905 = vadd.xlane.f32.xlu0 %v1904_v17 }
 0x752   : > { %5008 = vmatpush3.bf16.msra.mxu1 %v5005_v11 }
 0x753   : > { %5010 = vmatprep.subr.bf16.mxu1 %v5009_v15 }
 0x756   : > { %5236 = vrot.lane.b32.xlu1 %v5858_v63, %s5509_s22  ;;  %5012 = vmatpush3.bf16.msra.mxu1 %v5009_v15 }
 0x757   : > { %5015 = vmatprep.subr.msk.bf16.mxu1 %vm5838_vm3, %v5013_v19 }
 0x767   : > { %5231 = vrot.lane.b32.xlu0 %v5852_v54, %s5509_s22 }
 0x76b   : > { %2102 = vrot.lane.b32.xlu0 %v5815_v31, %s5509_s22 }
 0x76f   : > { %2106 = vrot.lane.b32.xlu0 %v5872_v24, %s5509_s22 }
 0x773   : > { %2110 = vrot.lane.b32.xlu0 %v5883_v7, %s5509_s22 }
 0x777   : > { %2114 = vrot.lane.b32.xlu0 %v5894_v27, %s5509_s22 }
 0x77a   : > { %1914 = vadd.xlane.f32.xlu1 %v1913_v37 }
 0x77e   : > { %1911 = vadd.xlane.f32.xlu1 %v1910_v21 }
 0x78f   : > { %2104 = vrot.lane.b32.xlu1 %v5868_v23, %s5509_s22 }
 0x793   : > { %2108 = vrot.lane.b32.xlu1 %v5880_v0, %s5509_s22 }
 0x797   : > { %2112 = vrot.lane.b32.xlu1 %v5891_v26, %s5509_s22 }
 0x79b   : > { %2116 = vrot.lane.b32.xlu1 %v5901_v28, %s5509_s22 }
 0x7cd   : > { %v1897_v32 = vpop.xlane.xlu1 %1896 }
 0x7ce   : > { %5364 = vrcp.f32 %v1897_v32  ;;  %v1894_v25 = vpop.xlane.xlu0 %1893 }
 0x7cf   : > { %5366 = vrcp.f32 %v1894_v25 }
 0x7d2   : > { %v1903_v40 = vpop.xlane.xlu1 %1902 }
 0x7d3   : > { %5368 = vrcp.f32 %v1903_v40 }
 0x7d6   : > { %v1900_v42 = vpop.xlane.xlu0 %1899  ;;  %v5237_v17 = vpop.permute.xlu1 %5236 }
 0x7d7   : > { %5370 = vrcp.f32 %v1900_v42  ;;  %v5239_v15 = vunpack.i.h.bf16 %v5237_v17 }
 0x7d8   : > { %v5365_v46 = vpop.eup %5364 }
 0x7d9   : > { %v5367_v39 = vpop.eup %5366  ;;  %v1919_v43 = vmul.f32 %v5365_v46, %v6099_v29 }
 0x7da   : > { %v1909_v51 = vpop.xlane.xlu0 %1908  ;;  %v1917_v55 = vmul.f32 %v5367_v39, %v6101_v18 }
 0x7db   : > { %5372 = vrcp.f32 %v1909_v51 }
 0x7dc   : > { %4657 = vmatprep.mubr.msk.f32.mxu1 %vm649_vm0, %v1917_v55 }
 0x7dd   : > { %4658 = vmatmul.mubr.msk.f32.vlgmr.msra.gmra.mrb[28].mxu1 %vm649_vm0, %v1919_v43  ;;  %v5369_v61 = vpop.eup %5368 }
 0x7de   : > { %5018 = vmatpush3.bf16.xpose.msk.msra.mxu1 %vm5838_vm3, %v5013_v19  ;;  %v1906_v59 = vpop.xlane.xlu0 %1905  ;;  %v1923_v11 = vmul.f32 %v5369_v61, %v6107_v35  ;;  %v4130_v61 = vld [vmem:[%s6916_s13 + $0x80] sm:$0xff] }
 0x7df   : > { %5374 = vrcp.f32 %v1906_v59  ;;  %5021 = vmatprep.subr.msk.bf16.mxu1 %vm5838_vm3, %v5019_v41  ;;  %v4131_v59 = vld [vmem:[%s6916_s13 + $0x88] sm:$0xff] }
 0x7e1   : > { %v5371_v62 = vpop.eup %5370 }
 0x7e2   : > { %v5232_v58 = vpop.permute.xlu0 %5231  ;;  %v1921_v18 = vmul.f32 %v5371_v62, %v6111_v50  ;;  %v5238_v50 = vunpack.i.l.bf16 %v5237_v17 }
 0x7e3   : > { %v5234_v29 = vunpack.i.h.bf16 %v5232_v58  ;;  %v5233_v10 = vunpack.i.l.bf16 %v5232_v58 }
 0x7e4   : > { %4660 = vmatprep.mubr.msk.f32.mxu1 %vm649_vm0, %v1921_v18  ;;  %v5031_v22 = vpack.c.bf16 %v5239_v15, %v5238_v50  ;;  %v4132_v15 = vld [vmem:[%s6916_s13 + $0x90] sm:$0xff]  ;;  %v4135_v50 = vld [vmem:[%s6916_s13 + $0xa8] sm:$0xff] }
 0x7e5   : > { %v5025_v12 = vpack.c.bf16 %v5234_v29, %v5233_v10  ;;  %4661 = vmatmul.mubr.msk.f32.gmra.mrb[30].mxu1 %vm649_vm0, %v1923_v11  ;;  %v5373_v53 = vpop.eup %5372  ;;  %v4133_v10 = vld [vmem:[%s6916_s13 + $0x98] sm:$0xff] }
 0x7e6   : > { %5024 = vmatpush3.bf16.xpose.msk.msra.mxu1 %vm5838_vm3, %v5019_v41  ;;  %v1927_v35 = vmul.f32 %v5373_v53, %v6115_v56 }
 0x7e7   : > { %5027 = vmatprep.subr.msk.bf16.mxu1 %vm5838_vm3, %v5025_v12 }
 0x7e9   : > { %v5375_v16 = vpop.eup %5374 }
 0x7ea   : > { %v1925_v19 = vmul.f32 %v5375_v16, %v6119_v60  ;;  %v2103_v60 = vpop.permute.xlu0 %2102 }
 0x7ec   : > { %4663 = vmatprep.mubr.msk.f32.mxu1 %vm649_vm0, %v1925_v19 }
 0x7ed   : > { %4664 = vmatmul.mubr.msk.f32.gmra.mrb[32].mxu1 %vm649_vm0, %v1927_v35 }
 0x7ee   : > { %5030 = vmatpush3.bf16.xpose.msk.msra.mxu1 %vm5838_vm3, %v5025_v12  ;;  %v2107_v32 = vpop.permute.xlu0 %2106 }
 0x7ef   : > { %5033 = vmatprep.subr.msk.bf16.mxu1 %vm5838_vm3, %v5031_v22 }
 0x7f2   : > { %v2111_v40 = vpop.permute.xlu0 %2110 }
 0x7f6   : > { %5036 = vmatpush3.bf16.xpose.msk.msra.mxu1 %vm5838_vm3, %v5031_v22 }
 0x807   : > { %v1915_v13 = vpop.xlane.xlu1 %1914 }
 0x808   : > { %5376 = vrcp.f32 %v1915_v13 }
 0x80b   : > { %v1912_v30 = vpop.xlane.xlu1 %1911 }
 0x80c   : > { %5378 = vrcp.f32 %v1912_v30 }
 0x80f   : > { %v2105_v37 = vpop.permute.xlu1 %2104 }
 0x812   : > { %v5377_v56 = vpop.eup %5376 }
 0x813   : > { %v1931_v34 = vmul.f32 %v5377_v56, %v6137_v20  ;;  %v2109_v25 = vpop.permute.xlu1 %2108  ;;  %v4137_v56 = vld [vmem:[%s6916_s13 + $0xb8] sm:$0xff] }
 0x816   : > { %v5379_v33 = vpop.eup %5378 }
 0x817   : > { %v1929_v21 = vmul.f32 %v5379_v33, %v6143_v52  ;;  %v2113_v42 = vpop.permute.xlu1 %2112  ;;  %v2115_v52 = vpop.permute.xlu0 %2114 }
 0x819   : > { %4666 = vmatprep.mubr.msk.f32.mxu1 %vm649_vm0, %v1929_v21 }
 0x81a   : > { %4667 = vmatmul.mubr.msk.f32.gmra.mrb[34].mxu1 %vm649_vm0, %v1931_v34 }
 0x81b   : > { %4685 = vmatprep.mubr.msk.f32.mxu1 %vm1295_vm2, %v2103_v60  ;;  %v2117_v20 = vpop.permute.xlu1 %2116  ;;  %v4134_v60 = vld [vmem:[%s6916_s13 + $0xa0] sm:$0xff] }
 0x81e   : > { %4686 = vmatmul.mubr.msk.f32.vlgmr.msra.gmra.mrb[36].mxu1 %vm1295_vm2, %v2105_v37 }
 0x81f   : > { %4688 = vmatprep.mubr.msk.f32.mxu1 %vm1295_vm2, %v2107_v32 }
 0x822   : > { %4689 = vmatmul.mubr.msk.f32.gmra.mrb[38].mxu1 %vm1295_vm2, %v2109_v25 }
 0x823   : > { %4691 = vmatprep.mubr.msk.f32.mxu1 %vm1295_vm2, %v2111_v40  ;;  %v4136_v40 = vld [vmem:[%s6916_s13 + $0xb0] sm:$0xff] }
 0x826   : > { %4692 = vmatmul.mubr.msk.f32.gmra.mrb[40].mxu1 %vm1295_vm2, %v2113_v42 }
 0x827   : > { %4694 = vmatprep.mubr.msk.f32.mxu1 %vm1295_vm2, %v2115_v52 }
 0x82a   : > { %4695 = vmatmul.mubr.msk.f32.gmra.mrb[42].mxu1 %vm1295_vm2, %v2117_v20 }
 0x8b0   : > { %v6193_v46 = vpop.f32.mrb[28].mxu1 }
 0x8b1   : > { %v6195_v39 = vpop.f32.mrb[29].mxu1 }
 0x8b8   : > { %v6197_v48 = vpop.f32.mrb[30].mxu1 }
 0x8b9   : > { %v6199_v49 = vpop.f32.mrb[31].mxu1 }
 0x8c0   : > { %v6201_v51 = vpop.f32.mrb[32].mxu1 }
 0x8c1   : > { %v6203_v55 = vpop.f32.mrb[33].mxu1 }
 0x8ed   : > { %v6205_v43 = vpop.f32.mrb[34].mxu1 }
 0x8ee   : > { %v6207_v41 = vpop.f32.mrb[35].mxu1 }
 0x8f1   : > { %v4687_v62 = vpop.f32.mrb[36].mxu1 }
 0x8f2   : > { %v2238_v58 = vadd.f32 %v4687_v62, %v4131_v59  ;;  %v2232_v18 = vpop.f32.mrb[37].mxu1 }
 0x8f3   : > { %v2233_v29 = vadd.f32 %v4130_v61, %v2232_v18 }
 0x8f4   : > { %v2274_v11 = vsel %vm649_vm0, %v2238_v58, -inf }
 0x8f5   : > { %2275 = vmax.xlane.f32.xlu1 %v2274_v11  ;;  %v4690_v12 = vpop.f32.mrb[38].mxu1  ;;  %v2271_v17 = vsel %vm649_vm0, %v2233_v29, -inf }
 0x8f6   : > { %v2248_v53 = vadd.f32 %v4690_v12, %v4133_v10  ;;  %v2242_v16 = vpop.f32.mrb[39].mxu1  ;;  %2272 = vmax.xlane.f32.xlu0 %v2271_v17 }
 0x8f7   : > { %v2243_v35 = vadd.f32 %v4132_v15, %v2242_v16 }
 0x8f8   : > { %v2280_v19 = vsel %vm649_vm0, %v2248_v53, -inf }
 0x8f9   : > { %v4693_v22 = vpop.f32.mrb[40].mxu1  ;;  %v2277_v34 = vsel %vm649_vm0, %v2243_v35, -inf }
 0x8fa   : > { %v2258_v13 = vadd.f32 %v4693_v22, %v4135_v50  ;;  %v2252_v30 = vpop.f32.mrb[41].mxu1  ;;  %2281 = vmax.xlane.f32.xlu0 %v2280_v19 }
 0x8fb   : > { %v2253_v37 = vadd.f32 %v4134_v60, %v2252_v30 }
 0x8fc   : > { %v2286_v33 = vsel %vm649_vm0, %v2258_v13, -inf }
 0x8fd   : > { %2287 = vmax.xlane.f32.xlu1 %v2286_v33  ;;  %v4696_v21 = vpop.f32.mrb[42].mxu1  ;;  %v2283_v20 = vsel %vm649_vm0, %v2253_v37, -inf }
 0x8fe   : > { %v6235_v32 = vadd.f32 %v4696_v21, %v4137_v56  ;;  %v2262_v25 = vpop.f32.mrb[43].mxu1  ;;  %2278 = vmax.xlane.f32.xlu0 %v2277_v34 }
 0x8ff   : > { %v6242_v52 = vadd.f32 %v4136_v40, %v2262_v25 }
 0x900   : > { %v2292_v42 = vsel %vm649_vm0, %v6235_v32, -inf }
 0x901   : > { %2293 = vmax.xlane.f32.xlu1 %v2292_v42  ;;  %v2289_v59 = vsel %vm649_vm0, %v6242_v52, -inf }
 0x902   : > { %2284 = vmax.xlane.f32.xlu0 %v2283_v20 }
 0x906   : > { %2290 = vmax.xlane.f32.xlu0 %v2289_v59 }
 0x912   : > { %5246 = vrot.lane.b32.xlu1 %v5827_v47, %s5509_s22 }
 0x916   : > { %5251 = vrot.lane.b32.xlu1 %v5829_v57, %s5509_s22 }
 0x91a   : > { %5256 = vrot.lane.b32.xlu1 %v5834_v3, %s5509_s22 }
 0x91c   : > { %5241 = vrot.lane.b32.xlu0 %v5821_v36, %s5509_s22  ;;  %s6937_s22 = sld [smem:[#allocation4_spill]] }
 0x91e   : > { %5266 = vrot.lane.b32.xlu1 %v5848_v14, %s5510_s0 }
 0x920   : > { %5261 = vrot.lane.b32.xlu0 %v5842_v45, %s5510_s0 }
 0x982   : > { %v2276_v61 = vpop.xlane.xlu1 %2275 }
 0x983   : > { %v2296_v62 = vsub.f32 %v2238_v58, %v2276_v61  ;;  %v2273_v18 = vpop.xlane.xlu0 %2272 }
 0x984   : > { %v2295_v10 = vsub.f32 %v2233_v29, %v2273_v18 }
 0x985   : > { %v2305_v11 = vmul.f32 1.442695, %v2296_v62 }
 0x986   : > { %v2303_v12 = vmul.f32 1.442695, %v2295_v10 }
 0x987   : > { %5380 = vpow2.f32 %v2305_v11  ;;  %v2282_v17 = vpop.xlane.xlu0 %2281 }
 0x988   : > { %5382 = vpow2.f32 %v2303_v12  ;;  %v2298_v16 = vsub.f32 %v2248_v53, %v2282_v17 }
 0x98a   : > { %v2309_v15 = vmul.f32 1.442695, %v2298_v16  ;;  %v2288_v50 = vpop.xlane.xlu1 %2287 }
 0x98b   : > { %v2300_v19 = vsub.f32 %v2258_v13, %v2288_v50  ;;  %v2279_v22 = vpop.xlane.xlu0 %2278 }
 0x98c   : > { %5384 = vpow2.f32 %v2309_v15  ;;  %v2297_v30 = vsub.f32 %v2243_v35, %v2279_v22 }
 0x98d   : > { %v2313_v14 = vmul.f32 1.442695, %v2300_v19 }
 0x98e   : > { %v2307_v60 = vmul.f32 1.442695, %v2297_v30  ;;  %v2294_v56 = vpop.xlane.xlu1 %2293 }
 0x98f   : > { %v2285_v45 = vpop.xlane.xlu0 %2284 }
 0x990   : > { %5386 = vpow2.f32 %v2307_v60  ;;  %v2299_v58 = vsub.f32 %v2253_v37, %v2285_v45 }
 0x991   : > { %v6259_v33 = vpop.eup %5380  ;;  %5388 = vpow2.f32 %v2313_v14 }
 0x992   : > { %v6261_v29 = vpop.eup %5382  ;;  %v2311_v21 = vmul.f32 1.442695, %v2299_v58  ;;  %v5247_v34 = vpop.permute.xlu1 %5246  ;;  %v2322_v53 = vsel %vm649_vm0, %v6259_v33, 0.0 }
 0x993   : > { %2323 = vadd.xlane.f32.xlu1 %v2322_v53  ;;  %v2291_v13 = vpop.xlane.xlu0 %2290  ;;  %v2319_v35 = vsel %vm649_vm0, %v6261_v29, 0.0  ;;  %v5249_v20 = vunpack.i.h.bf16 %v5247_v34  ;;  %v5248_v59 = vunpack.i.l.bf16 %v5247_v34 }
 0x994   : > { %2320 = vadd.xlane.f32.xlu0 %v2319_v35  ;;  %5390 = vpow2.f32 %v2311_v21 }
 0x995   : > { %v5041_v17 = vpack.c.bf16 %v5249_v20, %v5248_v59 }
 0x996   : > { %v6267_v25 = vpop.eup %5384  ;;  %v5252_v37 = vpop.permute.xlu1 %5251 }
 0x997   : > { %v5242_v40 = vpop.permute.xlu0 %5241  ;;  %v2328_v42 = vsel %vm649_vm0, %v6267_v25, 0.0  ;;  %v5254_v16 = vunpack.i.h.bf16 %v5252_v37  ;;  %v5253_v15 = vunpack.i.l.bf16 %v5252_v37  ;;  %v2302_v37 = vsub.f32 %v6235_v32, %v2294_v56 }
 0x998   : > { %v5244_v61 = vunpack.i.h.bf16 %v5242_v40  ;;  %v5243_v62 = vunpack.i.l.bf16 %v5242_v40  ;;  %2329 = vadd.xlane.f32.xlu1 %v2328_v42  ;;  %v2301_v42 = vsub.f32 %v6242_v52, %v2291_v13 }
 0x999   : > { %v5045_v30 = vpack.c.bf16 %v5254_v16, %v5253_v15  ;;  %v2317_v40 = vmul.f32 1.442695, %v2302_v37 }
 0x99a   : > { %v6271_v18 = vpop.eup %5386  ;;  %v5037_v10 = vpack.c.bf16 %v5244_v61, %v5243_v62  ;;  %v5257_v50 = vpop.permute.xlu1 %5256 }
 0x99b   : > { %v2325_v11 = vsel %vm649_vm0, %v6271_v18, 0.0  ;;  %v6275_v12 = vpop.eup %5388  ;;  %v5259_v14 = vunpack.i.h.bf16 %v5257_v50  ;;  %v5258_v60 = vunpack.i.l.bf16 %v5257_v50  ;;  %v5262_v45 = vpop.permute.xlu0 %5261  ;;  %5392 = vpow2.f32 %v2317_v40 }
 0x99c   : > { %2326 = vadd.xlane.f32.xlu0 %v2325_v11  ;;  %5038 = vmatprep.subr.bf16.mxu0 %v5037_v10  ;;  %v2334_v19 = vsel %vm649_vm0, %v6275_v12, 0.0  ;;  %v5264_v34 = vunpack.i.h.bf16 %v5262_v45  ;;  %v5263_v53 = vunpack.i.l.bf16 %v5262_v45 }
 0x99d   : > { %5040 = vmatpush3.bf16.msra.mxu0 %v5037_v10  ;;  %v5049_v21 = vpack.c.bf16 %v5259_v14, %v5258_v60 }
 0x99e   : > { %5042 = vmatprep.subr.bf16.mxu0 %v5041_v17  ;;  %v6279_v22 = vpop.eup %5390  ;;  %v5053_v35 = vpack.c.bf16 %v5264_v34, %v5263_v53 }
 0x99f   : > { %v2331_v58 = vsel %vm649_vm0, %v6279_v22, 0.0 }
 0x9a0   : > { %2335 = vadd.xlane.f32.xlu0 %v2334_v19 }
 0x9a1   : > { %5044 = vmatpush3.bf16.msra.mxu0 %v5041_v17 }
 0x9a2   : > { %5046 = vmatprep.subr.bf16.mxu0 %v5045_v30 }
 0x9a4   : > { %2332 = vadd.xlane.f32.xlu0 %v2331_v58 }
 0x9a5   : > { %5048 = vmatpush3.bf16.msra.mxu0 %v5045_v30 }
 0x9a6   : > { %5050 = vmatprep.subr.bf16.mxu0 %v5049_v21 }
 0x9a9   : > { %5276 = vrot.lane.b32.xlu1 %v5858_v63, %s5510_s0  ;;  %5052 = vmatpush3.bf16.msra.mxu0 %v5049_v21  ;;  %v2315_v63 = vmul.f32 1.442695, %v2301_v42 }
 0x9aa   : > { %5055 = vmatprep.subr.msk.bf16.mxu0 %vm5838_vm3, %v5053_v35 }
 0x9ab   : > { %5394 = vpow2.f32 %v2315_v63 }
 0x9ad   : > { %2523 = vrot.lane.b32.xlu1 %v5868_v23, %s5510_s0 }
 0x9ba   : > { %5271 = vrot.lane.b32.xlu0 %v5852_v54, %s5510_s0  ;;  %v6301_v54 = vpop.eup %5392 }
 0x9bb   : > { %v6305_v23 = vpop.eup %5394 }
 0x9be   : > { %2521 = vrot.lane.b32.xlu0 %v5815_v31, %s5510_s0  ;;  %v2340_v31 = vsel %vm649_vm0, %v6301_v54, 0.0 }
 0x9c2   : > { %2525 = vrot.lane.b32.xlu0 %v5872_v24, %s5510_s0  ;;  %v2337_v24 = vsel %vm649_vm0, %v6305_v23, 0.0 }
 0x9c6   : > { %2529 = vrot.lane.b32.xlu0 %v5883_v7, %s5510_s0  ;;  %v5267_v7 = vpop.permute.xlu1 %5266 }
 0x9c7   : > { %v5269_v59 = vunpack.i.h.bf16 %v5267_v7  ;;  %v5268_v61 = vunpack.i.l.bf16 %v5267_v7 }
 0x9ca   : > { %2533 = vrot.lane.b32.xlu0 %v5894_v27, %s5510_s0 }
 0x9d1   : > { %2341 = vadd.xlane.f32.xlu1 %v2340_v31 }
 0x9d5   : > { %2338 = vadd.xlane.f32.xlu1 %v2337_v24 }
 0x9e6   : > { %2527 = vrot.lane.b32.xlu1 %v5880_v0, %s5510_s0 }
 0x9ea   : > { %2531 = vrot.lane.b32.xlu1 %v5891_v26, %s5510_s0 }
 0x9ee   : > { %2535 = vrot.lane.b32.xlu1 %v5901_v28, %s5510_s0  ;;  %v5059_v28 = vpack.c.bf16 %v5269_v59, %v5268_v61  ;;  %v4163_v61 = vld [vmem:[%s6916_s13 + $0xc8] sm:$0xff] }
 0xa20   : > { %v2324_v27 = vpop.xlane.xlu1 %2323 }
 0xa21   : > { %5396 = vrcp.f32 %v2324_v27  ;;  %v2321_v32 = vpop.xlane.xlu0 %2320 }
 0xa22   : > { %5398 = vrcp.f32 %v2321_v32 }
 0xa25   : > { %v2330_v52 = vpop.xlane.xlu1 %2329 }
 0xa26   : > { %5400 = vrcp.f32 %v2330_v52 }
 0xa29   : > { %v2327_v56 = vpop.xlane.xlu0 %2326  ;;  %v5277_v30 = vpop.permute.xlu1 %5276 }
 0xa2a   : > { %5402 = vrcp.f32 %v2327_v56  ;;  %v5279_v45 = vunpack.i.h.bf16 %v5277_v30 }
 0xa2b   : > { %v5397_v13 = vpop.eup %5396 }
 0xa2c   : > { %v5399_v20 = vpop.eup %5398  ;;  %v2346_v26 = vmul.f32 %v5397_v13, %v6259_v33 }
 0xa2d   : > { %v2336_v0 = vpop.xlane.xlu0 %2335  ;;  %v2344_v62 = vmul.f32 %v5399_v20, %v6261_v29  ;;  %v2524_v34 = vpop.permute.xlu1 %2523 }
 0xa2e   : > { %5404 = vrcp.f32 %v2336_v0  ;;  %v4162_v0 = vld [vmem:[%s6916_s13 + $0xc0] sm:$0xff] }
 0xa2f   : > { %4713 = vmatprep.mubr.msk.f32.mxu0 %vm649_vm0, %v2344_v62 }
 0xa30   : > { %4714 = vmatmul.mubr.msk.f32.vlgmr.msra.gmra.mrb[28].mxu0 %vm649_vm0, %v2346_v26  ;;  %v5401_v11 = vpop.eup %5400 }
 0xa31   : > { %5058 = vmatpush3.bf16.xpose.msk.msra.mxu0 %vm5838_vm3, %v5053_v35  ;;  %v2333_v10 = vpop.xlane.xlu0 %2332  ;;  %v2350_v50 = vmul.f32 %v5401_v11, %v6267_v25  ;;  %v4165_v11 = vld [vmem:[%s6916_s13 + $0xd8] sm:$0xff] }
 0xa32   : > { %5406 = vrcp.f32 %v2333_v10  ;;  %5061 = vmatprep.subr.msk.bf16.mxu0 %vm5838_vm3, %v5059_v28 }
 0xa34   : > { %v5403_v17 = vpop.eup %5402 }
 0xa35   : > { %v5272_v16 = vpop.permute.xlu0 %5271  ;;  %v2348_v29 = vmul.f32 %v5403_v17, %v6271_v18  ;;  %v5278_v18 = vunpack.i.l.bf16 %v5277_v30 }
 0xa36   : > { %v5274_v33 = vunpack.i.h.bf16 %v5272_v16  ;;  %v5273_v15 = vunpack.i.l.bf16 %v5272_v16 }
 0xa37   : > { %4716 = vmatprep.mubr.msk.f32.mxu0 %vm649_vm0, %v2348_v29  ;;  %v5071_v21 = vpack.c.bf16 %v5279_v45, %v5278_v18 }
 0xa38   : > { %v5065_v19 = vpack.c.bf16 %v5274_v33, %v5273_v15  ;;  %4717 = vmatmul.mubr.msk.f32.gmra.mrb[30].mxu0 %vm649_vm0, %v2350_v50  ;;  %v5405_v14 = vpop.eup %5404  ;;  %v4164_v50 = vld [vmem:[%s6916_s13 + $0xd0] sm:$0xff] }
 0xa39   : > { %5064 = vmatpush3.bf16.xpose.msk.msra.mxu0 %vm5838_vm3, %v5059_v28  ;;  %v2354_v25 = vmul.f32 %v5405_v14, %v6275_v12  ;;  %v2522_v12 = vpop.permute.xlu0 %2521 }
 0xa3a   : > { %5067 = vmatprep.subr.msk.bf16.mxu0 %vm5838_vm3, %v5065_v19 }
 0xa3c   : > { %v5407_v60 = vpop.eup %5406 }
 0xa3d   : > { %v2352_v58 = vmul.f32 %v5407_v60, %v6279_v22  ;;  %v2526_v63 = vpop.permute.xlu0 %2525 }
 0xa3f   : > { %4719 = vmatprep.mubr.msk.f32.mxu0 %vm649_vm0, %v2352_v58  ;;  %v4166_v58 = vld [vmem:[%s6916_s13 + $0xe0] sm:$0xff] }
 0xa40   : > { %4720 = vmatmul.mubr.msk.f32.gmra.mrb[32].mxu0 %vm649_vm0, %v2354_v25  ;;  %v4169_v25 = vld [vmem:[%s6916_s13 + $0xf8] sm:$0xff] }
 0xa41   : > { %5070 = vmatpush3.bf16.xpose.msk.msra.mxu0 %vm5838_vm3, %v5065_v19  ;;  %v2530_v31 = vpop.permute.xlu0 %2529  ;;  %v4167_v19 = vld [vmem:[%s6916_s13 + $0xe8] sm:$0xff] }
 0xa42   : > { %5073 = vmatprep.subr.msk.bf16.mxu0 %vm5838_vm3, %v5071_v21 }
 0xa49   : > { %5076 = vmatpush3.bf16.xpose.msk.msra.mxu0 %vm5838_vm3, %v5071_v21 }
 0xa5e   : > { %v2342_v53 = vpop.xlane.xlu1 %2341 }
 0xa5f   : > { %5408 = vrcp.f32 %v2342_v53 }
 0xa62   : > { %v2339_v22 = vpop.xlane.xlu1 %2338 }
 0xa63   : > { %5410 = vrcp.f32 %v2339_v22 }
 0xa66   : > { %v2528_v6 = vpop.permute.xlu1 %2527 }
 0xa69   : > { %v5409_v35 = vpop.eup %5408 }
 0xa6a   : > { %v2358_v42 = vmul.f32 %v5409_v35, %v6301_v54  ;;  %v2532_v24 = vpop.permute.xlu1 %2531 }
 0xa6d   : > { %v5411_v37 = vpop.eup %5410 }
 0xa6e   : > { %v2356_v40 = vmul.f32 %v5411_v37, %v6305_v23  ;;  %v2534_v23 = vpop.permute.xlu0 %2533  ;;  %v2536_v54 = vpop.permute.xlu1 %2535  ;;  %v4168_v37 = vld [vmem:[%s6916_s13 + $0xf0] sm:$0xff] }
 0xa70   : > { %4722 = vmatprep.mubr.msk.f32.mxu0 %vm649_vm0, %v2356_v40 }
 0xa71   : > { %4723 = vmatmul.mubr.msk.f32.gmra.mrb[34].mxu0 %vm649_vm0, %v2358_v42 }
 0xa72   : > { %4741 = vmatprep.mubr.msk.f32.mxu0 %vm1295_vm2, %v2522_v12 }
 0xa75   : > { %4742 = vmatmul.mubr.msk.f32.vlgmr.msra.gmra.mrb[36].mxu0 %vm1295_vm2, %v2524_v34 }
 0xa76   : > { %4744 = vmatprep.mubr.msk.f32.mxu0 %vm1295_vm2, %v2526_v63 }
 0xa79   : > { %4745 = vmatmul.mubr.msk.f32.gmra.mrb[38].mxu0 %vm1295_vm2, %v2528_v6 }
 0xa7a   : > { %4747 = vmatprep.mubr.msk.f32.mxu0 %vm1295_vm2, %v2530_v31 }
 0xa7d   : > { %4748 = vmatmul.mubr.msk.f32.gmra.mrb[40].mxu0 %vm1295_vm2, %v2532_v24 }
 0xa7e   : > { %4750 = vmatprep.mubr.msk.f32.mxu0 %vm1295_vm2, %v2534_v23 }
 0xa81   : > { %4751 = vmatmul.mubr.msk.f32.gmra.mrb[42].mxu0 %vm1295_vm2, %v2536_v54 }
 0xb03   : > { %v6353_v7 = vpop.f32.mrb[28].mxu0 }
 0xb04   : > { %v6355_v27 = vpop.f32.mrb[29].mxu0 }
 0xb0b   : > { %v6357_v32 = vpop.f32.mrb[30].mxu0 }
 0xb0c   : > { %v6359_v52 = vpop.f32.mrb[31].mxu0 }
 0xb13   : > { %v6361_v56 = vpop.f32.mrb[32].mxu0 }
 0xb14   : > { %v6363_v13 = vpop.f32.mrb[33].mxu0 }
 0xb44   : > { %v6365_v20 = vpop.f32.mrb[34].mxu0 }
 0xb45   : > { %v6367_v59 = vpop.f32.mrb[35].mxu0 }
 0xb48   : > { %v4743_v62 = vpop.f32.mrb[36].mxu0 }
 0xb49   : > { %v2657_v26 = vadd.f32 %v4743_v62, %v4163_v61  ;;  %v2651_v28 = vpop.f32.mrb[37].mxu0 }
 0xb4a   : > { %v2652_v10 = vadd.f32 %v4162_v0, %v2651_v28 }
 0xb4b   : > { %v2693_v17 = vsel %vm649_vm0, %v2657_v26, -inf }
 0xb4c   : > { %2694 = vmax.xlane.f32.xlu1 %v2693_v17  ;;  %v4746_v16 = vpop.f32.mrb[38].mxu0  ;;  %v2690_v29 = vsel %vm649_vm0, %v2652_v10, -inf }
 0xb4d   : > { %v2667_v33 = vadd.f32 %v4746_v16, %v4165_v11  ;;  %v2661_v15 = vpop.f32.mrb[39].mxu0  ;;  %2691 = vmax.xlane.f32.xlu0 %v2690_v29 }
 0xb4e   : > { %v2662_v14 = vadd.f32 %v4164_v50, %v2661_v15 }
 0xb4f   : > { %v2699_v30 = vsel %vm649_vm0, %v2667_v33, -inf }
 0xb50   : > { %v4749_v60 = vpop.f32.mrb[40].mxu0  ;;  %v2696_v22 = vsel %vm649_vm0, %v2662_v14, -inf }
 0xb51   : > { %v2677_v45 = vadd.f32 %v4749_v60, %v4167_v19  ;;  %v2671_v18 = vpop.f32.mrb[41].mxu0  ;;  %2700 = vmax.xlane.f32.xlu0 %v2699_v30 }
 0xb52   : > { %v2672_v34 = vadd.f32 %v4166_v58, %v2671_v18 }
 0xb53   : > { %v2705_v21 = vsel %vm649_vm0, %v2677_v45, -inf }
 0xb54   : > { %2706 = vmax.xlane.f32.xlu1 %v2705_v21  ;;  %v4752_v53 = vpop.f32.mrb[42].mxu0  ;;  %v2702_v63 = vsel %vm649_vm0, %v2672_v34, -inf }
 0xb55   : > { %v2687_v12 = vadd.f32 %v4752_v53, %v4169_v25  ;;  %v2681_v35 = vpop.f32.mrb[43].mxu0  ;;  %2697 = vmax.xlane.f32.xlu0 %v2696_v22 }
 0xb56   : > { %v2682_v42 = vadd.f32 %v4168_v37, %v2681_v35 }
 0xb57   : > { %v2711_v40 = vsel %vm649_vm0, %v2687_v12, -inf }
 0xb58   : > { %2712 = vmax.xlane.f32.xlu1 %v2711_v40  ;;  %v2708_v6 = vsel %vm649_vm0, %v2682_v42, -inf }
 0xb59   : > { %2703 = vmax.xlane.f32.xlu0 %v2702_v63 }
 0xb5d   : > { %2709 = vmax.xlane.f32.xlu0 %v2708_v6 }
 0xb69   : > { %5286 = vrot.lane.b32.xlu1 %v5827_v47, %s5510_s0 }
 0xb73   : > { %5281 = vrot.lane.b32.xlu0 %v5821_v36, %s5510_s0 }
 0xbd9   : > { %v2695_v31 = vpop.xlane.xlu1 %2694 }
 0xbda   : > { %v2715_v24 = vsub.f32 %v2657_v26, %v2695_v31  ;;  %v2692_v23 = vpop.xlane.xlu0 %2691 }
 0xbdb   : > { %v2714_v54 = vsub.f32 %v2652_v10, %v2692_v23 }
 0xbdc   : > { %v2724_v61 = vmul.f32 1.442695, %v2715_v24 }
 0xbdd   : > { %v2722_v0 = vmul.f32 1.442695, %v2714_v54 }
 0xbde   : > { %5412 = vpow2.f32 %v2724_v61  ;;  %v2701_v62 = vpop.xlane.xlu0 %2700 }
 0xbdf   : > { %5414 = vpow2.f32 %v2722_v0  ;;  %v2717_v28 = vsub.f32 %v2667_v33, %v2701_v62 }
 0xbe1   : > { %v2728_v11 = vmul.f32 1.442695, %v2717_v28  ;;  %v2707_v17 = vpop.xlane.xlu1 %2706 }
 0xbe2   : > { %v2719_v16 = vsub.f32 %v2677_v45, %v2707_v17  ;;  %v2698_v29 = vpop.xlane.xlu0 %2697 }
 0xbe3   : > { %5416 = vpow2.f32 %v2728_v11  ;;  %v2716_v15 = vsub.f32 %v2662_v14, %v2698_v29 }
 0xbe4   : > { %v2732_v47 = vmul.f32 1.442695, %v2719_v16 }
 0xbe5   : > { %v2726_v50 = vmul.f32 1.442695, %v2716_v15  ;;  %v2713_v19 = vpop.xlane.xlu1 %2712 }
 0xbe6   : > { %5418 = vpow2.f32 %v2732_v47  ;;  %v2721_v36 = vsub.f32 %v2687_v12, %v2713_v19  ;;  %v2704_v26 = vpop.xlane.xlu0 %2703 }
 0xbe7   : > { %5420 = vpow2.f32 %v2726_v50  ;;  %v2718_v10 = vsub.f32 %v2672_v34, %v2704_v26 }
 0xbe8   : > { %v6405_v30 = vpop.eup %5412  ;;  %v2736_v60 = vmul.f32 1.442695, %v2721_v36 }
 0xbe9   : > { %v6407_v18 = vpop.eup %5414  ;;  %v2730_v33 = vmul.f32 1.442695, %v2718_v10  ;;  %v2741_v45 = vsel %vm649_vm0, %v6405_v30, 0.0  ;;  %v5287_v34 = vpop.permute.xlu1 %5286 }
 0xbea   : > { %5422 = vpow2.f32 %v2736_v60  ;;  %2742 = vadd.xlane.f32.xlu1 %v2741_v45  ;;  %v2710_v14 = vpop.xlane.xlu0 %2709  ;;  %v2738_v58 = vsel %vm649_vm0, %v6407_v18, 0.0  ;;  %v5289_v63 = vunpack.i.h.bf16 %v5287_v34  ;;  %v5288_v6 = vunpack.i.l.bf16 %v5287_v34  ;;  %v3056_v34 = vld [vmem:[%s6914_s11 + $0x18] sm:$0xff] }
 0xbeb   : > { %5424 = vpow2.f32 %v2730_v33  ;;  %v2720_v25 = vsub.f32 %v2682_v42, %v2710_v14  ;;  %2739 = vadd.xlane.f32.xlu0 %v2738_v58  ;;  %v3053_v14 = vld [vmem:[%s6914_s11] sm:$0xff]  ;;  %v3054_v58 = vld [vmem:[%s6914_s11 + $0x8] sm:$0xff] }
 0xbec   : > { %v5081_v61 = vpack.c.bf16 %v5289_v63, %v5288_v6 }
 0xbed   : > { %v6413_v21 = vpop.eup %5416  ;;  %v2734_v53 = vmul.f32 1.442695, %v2720_v25  ;;  %v3055_v25 = vld [vmem:[%s6914_s11 + $0x10] sm:$0xff] }
 0xbee   : > { %v5282_v22 = vpop.permute.xlu0 %5281  ;;  %v2747_v12 = vsel %vm649_vm0, %v6413_v21, 0.0 }
 0xbef   : > { %5426 = vpow2.f32 %v2734_v53  ;;  %v5284_v35 = vunpack.i.h.bf16 %v5282_v22  ;;  %v5283_v37 = vunpack.i.l.bf16 %v5282_v22  ;;  %2748 = vadd.xlane.f32.xlu1 %v2747_v12  ;;  %v5097_v53 = vpack.c.bf16 %v3056_v34, %v3055_v25 }
 0xbf0   : > { %v6417_v40 = vpop.eup %5418 }
 0xbf1   : > { %v6419_v31 = vpop.eup %5420  ;;  %v5077_v42 = vpack.c.bf16 %v5284_v35, %v5283_v37  ;;  %v2753_v24 = vsel %vm649_vm0, %v6417_v40, 0.0 }
 0xbf2   : > { %v2744_v23 = vsel %vm649_vm0, %v6419_v31, 0.0 }
 0xbf3   : > { %2754 = vadd.xlane.f32.xlu1 %v2753_v24  ;;  %2745 = vadd.xlane.f32.xlu0 %v2744_v23 }
 0xbf4   : > { %v6425_v54 = vpop.eup %5422  ;;  %5078 = vmatprep.subr.bf16.mxu1 %v5077_v42 }
 0xbf5   : > { %v6427_v0 = vpop.eup %5424  ;;  %5080 = vmatpush3.bf16.msra.mxu1 %v5077_v42  ;;  %v2759_v62 = vsel %vm649_vm0, %v6425_v54, 0.0 }
 0xbf6   : > { %5082 = vmatprep.subr.bf16.mxu1 %v5081_v61  ;;  %v2750_v28 = vsel %vm649_vm0, %v6427_v0, 0.0 }
 0xbf7   : > { %2760 = vadd.xlane.f32.xlu1 %v2759_v62  ;;  %2751 = vadd.xlane.f32.xlu0 %v2750_v28 }
 0xbf9   : > { %v6433_v11 = vpop.eup %5426  ;;  %5084 = vmatpush3.bf16.msra.mxu1 %v5081_v61 }
 0xbfa   : > { %v2756_v17 = vsel %vm649_vm0, %v6433_v11, 0.0 }
 0xbfb   : > { %2757 = vadd.xlane.f32.xlu1 %v2756_v17 }
 0xc0c   : > { %5296 = vrot.lane.b32.xlu1 %v5834_v3, %s5510_s0 }
 0xc0d   : > { %5291 = vrot.lane.b32.xlu0 %v5829_v57, %s5510_s0 }
 0xc10   : > { %2941 = vrot.lane.b32.xlu1 %v6193_v46, %s5511_s4 }
 0xc11   : > { %2939 = vrot.lane.b32.xlu0 %v6195_v39, %s5511_s4 }
 0xc14   : > { %2973 = vrot.lane.b32.xlu1 %v6353_v7, %s5512_s29 }
 0xc15   : > { %2971 = vrot.lane.b32.xlu0 %v6355_v27, %s5512_s29 }
 0xc18   : > { %2945 = vrot.lane.b32.xlu1 %v6197_v48, %s5511_s4 }
 0xc19   : > { %2943 = vrot.lane.b32.xlu0 %v6199_v49, %s5511_s4 }
 0xc1c   : > { %2977 = vrot.lane.b32.xlu1 %v6357_v32, %s5512_s29 }
 0xc1d   : > { %2975 = vrot.lane.b32.xlu0 %v6359_v52, %s5512_s29 }
 0xc20   : > { %2949 = vrot.lane.b32.xlu1 %v6201_v51, %s5511_s4 }
 0xc21   : > { %2947 = vrot.lane.b32.xlu0 %v6203_v55, %s5511_s4 }
 0xc24   : > { %2981 = vrot.lane.b32.xlu1 %v6361_v56, %s5512_s29 }
 0xc25   : > { %2979 = vrot.lane.b32.xlu0 %v6363_v13, %s5512_s29 }
 0xc28   : > { %2953 = vrot.lane.b32.xlu1 %v6205_v43, %s5511_s4 }
 0xc29   : > { %2951 = vrot.lane.b32.xlu0 %v6207_v41, %s5511_s4  ;;  %s5513_s4 = smov 24  }
 0xc2c   : > { %2985 = vrot.lane.b32.xlu1 %v6365_v20, %s5512_s29 }
 0xc2d   : > { %2983 = vrot.lane.b32.xlu0 %v6367_v59, %s5512_s29 }
 0xc77   : > { %v2743_v57 = vpop.xlane.xlu1 %2742 }
 0xc78   : > { %v2740_v3 = vpop.xlane.xlu0 %2739 }
 0xc79   : > { %5428 = vrcp.f32 %v2740_v3 }
 0xc7a   : > { %5430 = vrcp.f32 %v2743_v57 }
 0xc7c   : > { %v2749_v46 = vpop.xlane.xlu1 %2748 }
 0xc80   : > { %v2755_v39 = vpop.xlane.xlu1 %2754  ;;  %v2746_v48 = vpop.xlane.xlu0 %2745 }
 0xc81   : > { %5432 = vrcp.f32 %v2746_v48 }
 0xc82   : > { %5434 = vrcp.f32 %v2749_v46 }
 0xc83   : > { %v5429_v49 = vpop.eup %5428 }
 0xc84   : > { %v2761_v51 = vpop.xlane.xlu1 %2760  ;;  %v2752_v55 = vpop.xlane.xlu0 %2751  ;;  %v2763_v7 = vmul.f32 %v5429_v49, %v6407_v18 }
 0xc85   : > { %5436 = vrcp.f32 %v2752_v55  ;;  %v5431_v16 = vpop.eup %5430 }
 0xc86   : > { %4769 = vmatprep.mubr.msk.f32.mxu1 %vm649_vm0, %v2763_v7  ;;  %5438 = vrcp.f32 %v2755_v39  ;;  %v2765_v15 = vmul.f32 %v5431_v16, %v6405_v30 }
 0xc88   : > { %v2758_v43 = vpop.xlane.xlu1 %2757  ;;  %v5292_v41 = vpop.permute.xlu0 %5291 }
 0xc89   : > { %v5294_v27 = vunpack.i.h.bf16 %v5292_v41  ;;  %v5293_v32 = vunpack.i.l.bf16 %v5292_v41  ;;  %5440 = vrcp.f32 %v2758_v43 }
 0xc8a   : > { %5442 = vrcp.f32 %v2761_v51 }
 0xc8b   : > { %v5085_v52 = vpack.c.bf16 %v5294_v27, %v5293_v32  ;;  %v5433_v29 = vpop.eup %5432 }
 0xc8c   : > { %v5297_v56 = vpop.permute.xlu1 %5296  ;;  %v5435_v47 = vpop.eup %5434  ;;  %v2767_v50 = vmul.f32 %v5433_v29, %v6419_v31 }
 0xc8d   : > { %v5299_v13 = vunpack.i.h.bf16 %v5297_v56  ;;  %v5298_v20 = vunpack.i.l.bf16 %v5297_v56  ;;  %5086 = vmatprep.subr.bf16.mxu1 %v5085_v52  ;;  %v2769_v36 = vmul.f32 %v5435_v47, %v6413_v21  ;;  %v5093_v21 = vpack.c.bf16 %v3054_v58, %v3053_v14  ;;  %v2940_v24 = vpop.permute.xlu0 %2939 }
 0xc8e   : > { %5088 = vmatpush3.bf16.msra.mxu1 %v5085_v52  ;;  %v3027_v51 = vsel %vm1295_vm2, %v6035_v2, %v2940_v24 }
 0xc8f   : > { %v5089_v59 = vpack.c.bf16 %v5299_v13, %v5298_v20  ;;  %v5437_v19 = vpop.eup %5436 }
 0xc90   : > { %v5439_v26 = vpop.eup %5438  ;;  %v2771_v10 = vmul.f32 %v5437_v19, %v6427_v0  ;;  %v2942_v42 = vpop.permute.xlu1 %2941 }
 0xc91   : > { %5090 = vmatprep.subr.bf16.mxu1 %v5089_v59  ;;  %v2773_v30 = vmul.f32 %v5439_v26, %v6417_v40  ;;  %v3028_v7 = vsel %vm1295_vm2, %v6033_v1, %v2942_v42 }
 0xc92   : > { %5092 = vmatpush3.bf16.msra.mxu1 %v5089_v59 }
 0xc93   : > { %v5441_v60 = vpop.eup %5440  ;;  %5094 = vmatprep.subr.bf16.mxu1 %v5093_v21 }
 0xc94   : > { %v5443_v18 = vpop.eup %5442  ;;  %v2775_v33 = vmul.f32 %v5441_v60, %v6433_v11  ;;  %v2974_v23 = vpop.permute.xlu1 %2973 }
 0xc95   : > { %4770 = vmatmul.mubr.msk.f32.vlgmr.msra.gmra.mrb[44].mxu1 %vm649_vm0, %v2765_v15  ;;  %v2777_v45 = vmul.f32 %v5443_v18, %v6425_v54  ;;  %v2972_v54 = vpop.permute.xlu0 %2971  ;;  %v3037_v27 = vsel %vm3035_vm4, %v3028_v7, %v2974_v23 }
 0xc96   : > { %4772 = vmatprep.mubr.msk.f32.mxu1 %vm649_vm0, %v2767_v50  ;;  %5096 = vmatpush3.bf16.msra.mxu1 %v5093_v21  ;;  %v3036_v43 = vsel %vm3035_vm4, %v3027_v51, %v2972_v54 }
 0xc97   : > { %5098 = vmatprep.subr.bf16.mxu1 %v5097_v53 }
 0xc98   : > { %v2946_v61 = vpop.permute.xlu1 %2945 }
 0xc99   : > { %4773 = vmatmul.mubr.msk.f32.gmra.mrb[46].mxu1 %vm649_vm0, %v2769_v36  ;;  %v2944_v0 = vpop.permute.xlu0 %2943  ;;  %v3030_v1 = vsel %vm1295_vm2, %v6037_v38, %v2946_v61 }
 0xc9a   : > { %4775 = vmatprep.mubr.msk.f32.mxu1 %vm649_vm0, %v2771_v10  ;;  %5100 = vmatpush3.bf16.msra.mxu1 %v5097_v53  ;;  %v3029_v56 = vsel %vm1295_vm2, %v6039_v4, %v2944_v0 }
 0xc9c   : > { %v2978_v62 = vpop.permute.xlu1 %2977 }
 0xc9d   : > { %4776 = vmatmul.mubr.msk.f32.gmra.mrb[48].mxu1 %vm649_vm0, %v2773_v30  ;;  %v2976_v28 = vpop.permute.xlu0 %2975  ;;  %v3039_v59 = vsel %vm3035_vm4, %v3030_v1, %v2978_v62  ;;  %v3194_v62 = vld [vmem:[%s6937_s22 + $0x8] sm:$0xff]  ;;  %v5495_v1 = vld [vmem:[%s5644_s30 + $0x10] sm:$0xff] }
 0xc9e   : > { %4778 = vmatprep.mubr.msk.f32.mxu1 %vm649_vm0, %v2775_v33  ;;  %v3038_v13 = vsel %vm3035_vm4, %v3029_v56, %v2976_v28  ;;  %v3195_v28 = vld [vmem:[%s6937_s22 + $0x10] sm:$0xff] }
 0xca0   : > { %v2950_v11 = vpop.permute.xlu1 %2949 }
 0xca1   : > { %4779 = vmatmul.mubr.msk.f32.gmra.mrb[50].mxu1 %vm649_vm0, %v2777_v45  ;;  %v2948_v17 = vpop.permute.xlu0 %2947  ;;  %v3032_v38 = vsel %vm1295_vm2, %v6041_v5, %v2950_v11  ;;  %v3196_v11 = vld [vmem:[%s6937_s22 + $0x18] sm:$0xff] }
 0xca2   : > { %v3031_v4 = vsel %vm1295_vm2, %v6043_v8, %v2948_v17  ;;  %v3197_v17 = vld [vmem:[%s6937_s22 + $0x20] sm:$0xff] }
 0xca4   : > { %v2982_v57 = vpop.permute.xlu1 %2981 }
 0xca5   : > { %v2980_v3 = vpop.permute.xlu0 %2979  ;;  %v3041_v19 = vsel %vm3035_vm4, %v3032_v38, %v2982_v57  ;;  %v3198_v57 = vld [vmem:[%s6937_s22 + $0x28] sm:$0xff] }
 0xca6   : > { %v3040_v47 = vsel %vm3035_vm4, %v3031_v4, %v2980_v3  ;;  %v3199_v3 = vld [vmem:[%s6937_s22 + $0x30] sm:$0xff]  ;;  %v5497_v4 = vld [vmem:[%s5644_s30 + $0x20] sm:$0xff] }
 0xca8   : > { %v2954_v46 = vpop.permute.xlu1 %2953 }
 0xca9   : > { %v2952_v39 = vpop.permute.xlu0 %2951  ;;  %v3034_v5 = vsel %vm1295_vm2, %v6045_v9, %v2954_v46  ;;  %v4194_v9 = vld [vmem:[%s6915_s12] ss:$0 sm:$0xff]  ;;  %v3200_v46 = vld [vmem:[%s6937_s22 + $0x38] sm:$0xff] }
 0xcaa   : > { %v3033_v8 = vsel %vm1295_vm2, %v6047_v44, %v2952_v39  ;;  %v3193_v44 = vld [vmem:[%s6937_s22] sm:$0xff] }
 0xcab   : > { %4817 = vmatprep.mubr.msk.f32.mxu0 %vm649_vm0, %v3193_v44 }
 0xcac   : > { %v2986_v48 = vpop.permute.xlu1 %2985 }
 0xcad   : > { %v2984_v49 = vpop.permute.xlu0 %2983  ;;  %v3043_v18 = vsel %vm3035_vm4, %v3034_v5, %v2986_v48  ;;  %v5492_v48 = vld [vmem:[%s5644_s30 + $0x8] sm:$0xff] }
 0xcae   : > { %v3042_v60 = vsel %vm3035_vm4, %v3033_v8, %v2984_v49 }
 0xd68   : > { %v4771_v22 = vpop.f32.mrb[44].mxu1 }
 0xd69   : > { %3005 = vrot.lane.b32.xlu1 %v4771_v22, %s5513_s4  ;;  %v2892_v12 = vpop.f32.mrb[45].mxu1 }
 0xd6a   : > { %3003 = vrot.lane.b32.xlu0 %v2892_v12, %s5513_s4 }
 0xd6c   : > { %v4774_v35 = vpop.f32.mrb[46].mxu1 }
 0xd6d   : > { %3009 = vrot.lane.b32.xlu1 %v4774_v35, %s5513_s4  ;;  %v2902_v37 = vpop.f32.mrb[47].mxu1 }
 0xd6e   : > { %3007 = vrot.lane.b32.xlu0 %v2902_v37, %s5513_s4 }
 0xd70   : > { %v4777_v40 = vpop.f32.mrb[48].mxu1 }
 0xd71   : > { %3013 = vrot.lane.b32.xlu1 %v4777_v40, %s5513_s4  ;;  %v2912_v63 = vpop.f32.mrb[49].mxu1 }
 0xd72   : > { %3011 = vrot.lane.b32.xlu0 %v2912_v63, %s5513_s4 }
 0xd74   : > { %v4780_v6 = vpop.f32.mrb[50].mxu1 }
 0xd75   : > { %3017 = vrot.lane.b32.xlu1 %v4780_v6, %s5513_s4  ;;  %v2922_v31 = vpop.f32.mrb[51].mxu1 }
 0xd76   : > { %3015 = vrot.lane.b32.xlu0 %v2922_v31, %s5513_s4 }
 0xddb   : > { %v3006_v55 = vpop.permute.xlu1 %3005 }
 0xddc   : > { %v3004_v41 = vpop.permute.xlu0 %3003  ;;  %v3046_v52 = vsel %vm3044_vm5, %v3037_v27, %v3006_v55  ;;  %v5493_v55 = vld [vmem:[%s5644_s30] sm:$0xff] }
 0xddd   : > { %v3045_v32 = vsel %vm3044_vm5, %v3036_v43, %v3004_v41 }
 0xdde   : > { %4789 = vmatprep.mubr.msk.f32.mxu1 %vm779_vm1, %v3045_v32  ;;  %v5494_v32 = vld [vmem:[%s5644_s30 + $0x18] sm:$0xff] }
 0xddf   : > { %4790 = vmatmul.mubr.msk.f32.vlgmr.msra.gmra.mrb[52].mxu1 %vm779_vm1, %v3046_v52  ;;  %v3010_v2 = vpop.permute.xlu1 %3009 }
 0xde0   : > { %v3008_v20 = vpop.permute.xlu0 %3007  ;;  %v3048_v29 = vsel %vm3044_vm5, %v3039_v59, %v3010_v2  ;;  %v5496_v59 = vld [vmem:[%s5644_s30 + $0x28] sm:$0xff] }
 0xde1   : > { %v3047_v16 = vsel %vm3044_vm5, %v3038_v13, %v3008_v20 }
 0xde2   : > { %4792 = vmatprep.mubr.msk.f32.mxu1 %vm779_vm1, %v3047_v16 }
 0xde3   : > { %4793 = vmatmul.mubr.msk.f32.gmra.mrb[54].mxu1 %vm779_vm1, %v3048_v29  ;;  %v3014_v15 = vpop.permute.xlu1 %3013 }
 0xde4   : > { %v3012_v50 = vpop.permute.xlu0 %3011  ;;  %v3050_v26 = vsel %vm3044_vm5, %v3041_v19, %v3014_v15  ;;  %v5498_v19 = vld [vmem:[%s5644_s30 + $0x38] sm:$0xff] }
 0xde5   : > { %v3049_v36 = vsel %vm3044_vm5, %v3040_v47, %v3012_v50 }
 0xde6   : > { %4795 = vmatprep.mubr.msk.f32.mxu1 %vm779_vm1, %v3049_v36 }
 0xde7   : > { %4796 = vmatmul.mubr.msk.f32.gmra.mrb[56].mxu1 %vm779_vm1, %v3050_v26  ;;  %v3018_v10 = vpop.permute.xlu1 %3017 }
 0xde8   : > { %v3016_v30 = vpop.permute.xlu0 %3015  ;;  %v3052_v45 = vsel %vm3044_vm5, %v3043_v18, %v3018_v10  ;;  %v5499_v10 = vld [vmem:[%s5644_s30 + $0x30] sm:$0xff]  ;;  %s631_s30 = scalar_lea.vmem %s6923_s20, %s4034_s27 }
 0xde9   : > { %v3051_v33 = vsel %vm3044_vm5, %v3042_v60, %v3016_v30 }
 0xdea   : > { %4798 = vmatprep.mubr.msk.f32.mxu1 %vm779_vm1, %v3051_v33 }
 0xdeb   : > { %4799 = vmatmul.mubr.msk.f32.gmra.mrb[58].mxu1 %vm779_vm1, %v3052_v45 }
 0xeb2   : > { %v4791_v14 = vpop.f32.mrb[52].mxu1 }
 0xeb3   : > { %v3160_v58 = vadd.f32 %v4791_v14, %v4194_v9  ;;  %v3154_v25 = vpop.f32.mrb[53].mxu1 }
 0xeb4   : > { %v3155_v21 = vadd.f32 %v4194_v9, %v3154_v25 }
 0xeb6   : > { %v5101_v34 = vpack.c.bf16 %v3160_v58, %v3155_v21  ;;  %v4794_v53 = vpop.f32.mrb[54].mxu1 }
 0xeb7   : > { %v3170_v22 = vadd.f32 %v4794_v53, %v4194_v9  ;;  %v3164_v12 = vpop.f32.mrb[55].mxu1 }
 0xeb8   : > { %v3165_v35 = vadd.f32 %v4194_v9, %v3164_v12  ;;  %5102 = vmatprep.subr.bf16.mxu0 %v5101_v34 }
 0xeb9   : > { %5104 = vmatpush3.bf16.msra.mxu0 %v5101_v34 }
 0xeba   : > { %v5105_v37 = vpack.c.bf16 %v3170_v22, %v3165_v35  ;;  %v4797_v40 = vpop.f32.mrb[56].mxu1 }
 0xebb   : > { %v3180_v63 = vadd.f32 %v4797_v40, %v4194_v9  ;;  %v3174_v6 = vpop.f32.mrb[57].mxu1 }
 0xebc   : > { %v3175_v31 = vadd.f32 %v4194_v9, %v3174_v6  ;;  %5106 = vmatprep.subr.bf16.mxu0 %v5105_v37 }
 0xebd   : > { %5108 = vmatpush3.bf16.msra.mxu0 %v5105_v37 }
 0xebe   : > { %v5109_v42 = vpack.c.bf16 %v3180_v63, %v3175_v31  ;;  %v4800_v24 = vpop.f32.mrb[58].mxu1 }
 0xebf   : > { %v3190_v23 = vadd.f32 %v4800_v24, %v4194_v9  ;;  %v3184_v54 = vpop.f32.mrb[59].mxu1 }
 0xec0   : > { %v3185_v61 = vadd.f32 %v4194_v9, %v3184_v54  ;;  %5110 = vmatprep.subr.bf16.mxu0 %v5109_v42 }
 0xec1   : > { %5112 = vmatpush3.bf16.msra.mxu0 %v5109_v42 }
 0xec2   : > { %v5113_v0 = vpack.c.bf16 %v3190_v23, %v3185_v61 }
 0xec4   : > { %5114 = vmatprep.subr.bf16.mxu0 %v5113_v0 }
 0xec5   : > { %5116 = vmatpush3.bf16.msra.mxu0 %v5113_v0 }
 0xec8   : > { %4818 = vmatmul.mubr.msk.f32.vlgmr.msra.gmra.mrb[44].mxu0 %vm649_vm0, %v3194_v62 }
 0xec9   : > { %4820 = vmatprep.mubr.msk.f32.mxu0 %vm649_vm0, %v3195_v28 }
 0xecc   : > { %4821 = vmatmul.mubr.msk.f32.gmra.mrb[46].mxu0 %vm649_vm0, %v3196_v11 }
 0xecd   : > { %4823 = vmatprep.mubr.msk.f32.mxu0 %vm649_vm0, %v3197_v17 }
 0xed0   : > { %4824 = vmatmul.mubr.msk.f32.gmra.mrb[48].mxu0 %vm649_vm0, %v3198_v57 }
 0xed1   : > { %4826 = vmatprep.mubr.msk.f32.mxu0 %vm649_vm0, %v3199_v3 }
 0xed4   : > { %4827 = vmatmul.mubr.msk.f32.gmra.mrb[50].mxu0 %vm649_vm0, %v3200_v46 }
 0xf9b   : > { %v4819_v39 = vpop.f32.mrb[44].mxu0 }
 0xf9c   : > { %v6561_v49 = vadd.f32 %v5492_v48, %v4819_v39  ;;  %v3291_v51 = vpop.f32.mrb[45].mxu0 }
 0xf9d   : > { %v6564_v7 = vadd.f32 %v5493_v55, %v3291_v51 }
 0xf9e   : > { %v3341_v43 = vsel %vm779_vm1, %v6561_v49, 0.0 }
 0xf9f   : > { %3342 = vadd.xlane.f32.xlu1 %v3341_v43  ;;  %v3338_v41 = vsel %vm779_vm1, %v6564_v7, 0.0  ;;  %v4822_v27 = vpop.f32.mrb[46].mxu0 }
 0xfa0   : > { %3339 = vadd.xlane.f32.xlu0 %v3338_v41  ;;  %v6571_v52 = vadd.f32 %v5494_v32, %v4822_v27  ;;  %v3301_v56 = vpop.f32.mrb[47].mxu0 }
 0xfa1   : > { %v6576_v13 = vadd.f32 %v5495_v1, %v3301_v56  ;;  %v3472_v56 = vld [vmem:[%s6919_s16] sm:$0xff] }
 0xfa2   : > { %v3347_v2 = vsel %vm779_vm1, %v6571_v52, 0.0 }
 0xfa3   : > { %v4825_v20 = vpop.f32.mrb[48].mxu0  ;;  %v3344_v50 = vsel %vm779_vm1, %v6576_v13, 0.0 }
 0xfa4   : > { %v6579_v16 = vadd.f32 %v5496_v59, %v4825_v20  ;;  %3348 = vadd.xlane.f32.xlu0 %v3347_v2  ;;  %v3311_v29 = vpop.f32.mrb[49].mxu0  ;;  %v3473_v2 = vld [vmem:[%s6919_s16 + $0x8] sm:$0xff]  ;;  %v3474_v20 = vld [vmem:[%s6919_s16 + $0x10] sm:$0xff]  ;;  %v3475_v59 = vld [vmem:[%s6919_s16 + $0x18] sm:$0xff] }
 0xfa5   : > { %v6582_v15 = vadd.f32 %v5497_v4, %v3311_v29  ;;  %v5117_v1 = vpack.c.bf16 %v3473_v2, %v3472_v56  ;;  %v5121_v29 = vpack.c.bf16 %v3475_v59, %v3474_v20 }
 0xfa6   : > { %v3353_v38 = vsel %vm779_vm1, %v6579_v16, 0.0 }
 0xfa7   : > { %3354 = vadd.xlane.f32.xlu1 %v3353_v38  ;;  %v4828_v47 = vpop.f32.mrb[50].mxu0  ;;  %v3350_v8 = vsel %vm779_vm1, %v6582_v15, 0.0  ;;  %5118 = vmatprep.subr.bf16.mxu1 %v5117_v1 }
 0xfa8   : > { %v6589_v36 = vadd.f32 %v5498_v19, %v4828_v47  ;;  %3345 = vadd.xlane.f32.xlu0 %v3344_v50  ;;  %v3321_v26 = vpop.f32.mrb[51].mxu0  ;;  %5120 = vmatpush3.bf16.msra.mxu1 %v5117_v1 }
 0xfa9   : > { %v6594_v5 = vadd.f32 %v5499_v10, %v3321_v26  ;;  %5122 = vmatprep.subr.bf16.mxu1 %v5121_v29 }
 0xfaa   : > { %v3359_v60 = vsel %vm779_vm1, %v6589_v36, 0.0 }
 0xfab   : > { %3360 = vadd.xlane.f32.xlu1 %v3359_v60  ;;  %v3356_v30 = vsel %vm779_vm1, %v6594_v5, 0.0 }
 0xfac   : > { %3351 = vadd.xlane.f32.xlu0 %v3350_v8  ;;  %5124 = vmatpush3.bf16.msra.mxu1 %v5121_v29 }
 0xfb0   : > { %3357 = vadd.xlane.f32.xlu0 %v3356_v30 }
0x102c   : > { %v3343_v18 = vpop.xlane.xlu1 %3342 }
0x102d   : > { %v3363_v33 = vmul.f32 0.03125, %v3343_v18  ;;  %v3340_v45 = vpop.xlane.xlu0 %3339 }
0x102e   : > { %v3362_v44 = vmul.f32 0.03125, %v3340_v45 }
0x102f   : > { %v6601_v9 = vsub.f32 %v6561_v49, %v3363_v33 }
0x1030   : > { %v6604_v14 = vsub.f32 %v6564_v7, %v3362_v44 }
0x1031   : > { %v3349_v58 = vpop.xlane.xlu0 %3348  ;;  %v3379_v25 = vmul.f32 %v6601_v9, %v6601_v9 }
0x1032   : > { %v3365_v21 = vmul.f32 0.03125, %v3349_v58  ;;  %v3378_v34 = vmul.f32 %v6604_v14, %v6604_v14 }
0x1033   : > { %v3389_v53 = vsel %vm779_vm1, %v3379_v25, 0.0 }
0x1034   : > { %v6612_v22 = vsub.f32 %v6571_v52, %v3365_v21  ;;  %v3355_v12 = vpop.xlane.xlu1 %3354  ;;  %3390 = vadd.xlane.f32.xlu1 %v3389_v53  ;;  %v3386_v35 = vsel %vm779_vm1, %v3378_v34, 0.0 }
0x1035   : > { %v3367_v37 = vmul.f32 0.03125, %v3355_v12  ;;  %v3346_v40 = vpop.xlane.xlu0 %3345  ;;  %3387 = vadd.xlane.f32.xlu0 %v3386_v35  ;;  %v4211_v35 = vld [vmem:[%s6917_s14] ss:$0 sm:$0xff] }
0x1036   : > { %v3364_v63 = vmul.f32 0.03125, %v3346_v40  ;;  %v3381_v6 = vmul.f32 %v6612_v22, %v6612_v22 }
0x1037   : > { %v6618_v31 = vsub.f32 %v6579_v16, %v3367_v37 }
0x1038   : > { %v6621_v42 = vsub.f32 %v6576_v13, %v3364_v63  ;;  %v3361_v24 = vpop.xlane.xlu1 %3360  ;;  %v3395_v23 = vsel %vm779_vm1, %v3381_v6, 0.0 }
0x1039   : > { %v3369_v54 = vmul.f32 0.03125, %v3361_v24  ;;  %v3352_v61 = vpop.xlane.xlu0 %3351  ;;  %3396 = vadd.xlane.f32.xlu1 %v3395_v23  ;;  %v3383_v0 = vmul.f32 %v6618_v31, %v6618_v31 }
0x103a   : > { %v3366_v62 = vmul.f32 0.03125, %v3352_v61  ;;  %v3380_v28 = vmul.f32 %v6621_v42, %v6621_v42 }
0x103b   : > { %v6629_v11 = vsub.f32 %v6589_v36, %v3369_v54  ;;  %v3401_v17 = vsel %vm779_vm1, %v3383_v0, 0.0  ;;  %v4212_v54 = vld [vmem:[%s6918_s15] ss:$0 sm:$0xff] }
0x103c   : > { %v6633_v57 = vsub.f32 %v6582_v15, %v3366_v62  ;;  %v3392_v3 = vsel %vm779_vm1, %v3380_v28, 0.0 }
0x103d   : > { %3402 = vadd.xlane.f32.xlu1 %v3401_v17  ;;  %3393 = vadd.xlane.f32.xlu0 %v3392_v3  ;;  %v3358_v46 = vpop.xlane.xlu0 %3357  ;;  %v3385_v39 = vmul.f32 %v6629_v11, %v6629_v11 }
0x103e   : > { %v3368_v48 = vmul.f32 0.03125, %v3358_v46  ;;  %v3382_v51 = vmul.f32 %v6633_v57, %v6633_v57 }
0x103f   : > { %v3407_v55 = vsel %vm779_vm1, %v3385_v39, 0.0 }
0x1040   : > { %v6642_v43 = vsub.f32 %v6594_v5, %v3368_v48  ;;  %v3398_v41 = vsel %vm779_vm1, %v3382_v51, 0.0 }
0x1041   : > { %3408 = vadd.xlane.f32.xlu1 %v3407_v55  ;;  %3399 = vadd.xlane.f32.xlu0 %v3398_v41 }
0x1042   : > { %v3384_v27 = vmul.f32 %v6642_v43, %v6642_v43 }
0x1044   : > { %v3404_v32 = vsel %vm779_vm1, %v3384_v27, 0.0 }
0x1045   : > { %3405 = vadd.xlane.f32.xlu0 %v3404_v32 }
0x10c1   : > { %v3391_v4 = vpop.xlane.xlu1 %3390 }
0x10c2   : > { %v3411_v38 = vmul.f32 0.03125, %v3391_v4  ;;  %v3388_v47 = vpop.xlane.xlu0 %3387 }
0x10c3   : > { %v3410_v50 = vmul.f32 0.03125, %v3388_v47 }
0x10c4   : > { %v3419_v19 = vadd.f32 1e-05, %v3411_v38 }
0x10c5   : > { %v3418_v26 = vadd.f32 1e-05, %v3410_v50  ;;  %v3828_v50 = vld [vmem:[%s6921_s18] sm:$0xff] }
0x10c6   : > { %5444 = vrsqrt.f32 %v3419_v19  ;;  %v3397_v8 = vpop.xlane.xlu1 %3396 }
0x10c7   : > { %5446 = vrsqrt.f32 %v3418_v26  ;;  %v3413_v10 = vmul.f32 0.03125, %v3397_v8  ;;  %v3830_v26 = vld [vmem:[%s6921_s18 + $0x10] sm:$0xff]  ;;  %v3831_v8 = vld [vmem:[%s6921_s18 + $0x18] sm:$0xff] }
0x10c9   : > { %v3421_v60 = vadd.f32 1e-05, %v3413_v10  ;;  %v5129_v10 = vpack.c.bf16 %v3831_v8, %v3830_v26 }
0x10ca   : > { %v3403_v30 = vpop.xlane.xlu1 %3402  ;;  %v3394_v18 = vpop.xlane.xlu0 %3393 }
0x10cb   : > { %5448 = vrsqrt.f32 %v3421_v60  ;;  %v3415_v33 = vmul.f32 0.03125, %v3403_v30  ;;  %v3412_v45 = vmul.f32 0.03125, %v3394_v18  ;;  %v3832_v60 = vld [vmem:[%s6921_s18 + $0x20] sm:$0xff]  ;;  %v3833_v30 = vld [vmem:[%s6921_s18 + $0x28] sm:$0xff] }
0x10cc   : > { %v5133_v18 = vpack.c.bf16 %v3833_v30, %v3832_v60 }
0x10cd   : > { %v3423_v44 = vadd.f32 1e-05, %v3415_v33  ;;  %v3420_v58 = vadd.f32 1e-05, %v3412_v45  ;;  %v3834_v33 = vld [vmem:[%s6921_s18 + $0x30] sm:$0xff]  ;;  %v3835_v45 = vld [vmem:[%s6921_s18 + $0x38] sm:$0xff] }
0x10ce   : > { %v3409_v25 = vpop.xlane.xlu1 %3408  ;;  %v3400_v21 = vpop.xlane.xlu0 %3399 }
0x10cf   : > { %5450 = vrsqrt.f32 %v3423_v44  ;;  %v3417_v34 = vmul.f32 0.03125, %v3409_v25  ;;  %v3414_v53 = vmul.f32 0.03125, %v3400_v21  ;;  %v5137_v44 = vpack.c.bf16 %v3835_v45, %v3834_v33  ;;  %v3837_v25 = vld [vmem:[%s6921_s18 + $0x48] sm:$0xff] }
0x10d0   : > { %v5445_v12 = vpop.eup %5444  ;;  %5452 = vrsqrt.f32 %v3420_v58  ;;  %v3836_v58 = vld [vmem:[%s6921_s18 + $0x40] sm:$0xff] }
0x10d1   : > { %v5447_v37 = vpop.eup %5446  ;;  %v3435_v40 = vmul.f32 %v5445_v12, %v6601_v9  ;;  %v3425_v63 = vadd.f32 1e-05, %v3417_v34  ;;  %v3422_v6 = vadd.f32 1e-05, %v3414_v53  ;;  %v5141_v21 = vpack.c.bf16 %v3837_v25, %v3836_v58  ;;  %v3838_v34 = vld [vmem:[%s6921_s18 + $0x50] sm:$0xff]  ;;  %v3839_v53 = vld [vmem:[%s6921_s18 + $0x58] sm:$0xff] }
0x10d2   : > { %v3406_v24 = vpop.xlane.xlu0 %3405  ;;  %v3434_v23 = vmul.f32 %v5447_v37, %v6604_v14  ;;  %v5145_v12 = vpack.c.bf16 %v3839_v53, %v3838_v34  ;;  %v3841_v37 = vld [vmem:[%s6921_s18 + $0x68] sm:$0xff] }
0x10d3   : > { %v3450_v61 = vmul.f32 %v4211_v35, %v3435_v40  ;;  %5454 = vrsqrt.f32 %v3425_v63  ;;  %v3416_v0 = vmul.f32 0.03125, %v3406_v24  ;;  %v3842_v40 = vld [vmem:[%s6921_s18 + $0x70] sm:$0xff] }
0x10d4   : > { %5456 = vrsqrt.f32 %v3422_v6  ;;  %v3449_v62 = vmul.f32 %v4211_v35, %v3434_v23  ;;  %v3843_v6 = vld [vmem:[%s6921_s18 + $0x78] sm:$0xff]  ;;  %v4213_v23 = vld [vmem:[%s6920_s17] ss:$0 sm:$0xff] }
0x10d5   : > { %v5449_v28 = vpop.eup %5448  ;;  %v3424_v17 = vadd.f32 1e-05, %v3416_v0  ;;  %v3465_v46 = vadd.f32 %v4212_v54, %v3450_v61  ;;  %v5153_v24 = vpack.c.bf16 %v3843_v6, %v3842_v40 }
0x10d6   : > { %v3464_v3 = vadd.f32 %v4212_v54, %v3449_v62  ;;  %v3437_v9 = vmul.f32 %v5449_v28, %v6612_v22 }
0x10d7   : > { %5458 = vrsqrt.f32 %v3424_v17 }
0x10d8   : > { %4837 = vmatprep.mubr.msk.f32.mxu1 %vm779_vm1, %v3464_v3  ;;  %v3452_v51 = vmul.f32 %v4211_v35, %v3437_v9 }
0x10d9   : > { %v5451_v39 = vpop.eup %5450  ;;  %4838 = vmatmul.mubr.msk.f32.vlgmr.msra.gmra.mrb[60].mxu1 %vm779_vm1, %v3465_v46 }
0x10da   : > { %v5453_v14 = vpop.eup %5452  ;;  %v3439_v55 = vmul.f32 %v5451_v39, %v6618_v31  ;;  %v3467_v1 = vadd.f32 %v4212_v54, %v3452_v51 }
0x10db   : > { %v3436_v48 = vmul.f32 %v5453_v14, %v6621_v42 }
0x10dc   : > { %v3454_v20 = vmul.f32 %v4211_v35, %v3439_v55 }
0x10dd   : > { %v5455_v41 = vpop.eup %5454  ;;  %v3451_v27 = vmul.f32 %v4211_v35, %v3436_v48 }
0x10de   : > { %v5457_v32 = vpop.eup %5456  ;;  %v3441_v59 = vmul.f32 %v5455_v41, %v6629_v11  ;;  %v3469_v31 = vadd.f32 %v4212_v54, %v3454_v20 }
0x10df   : > { %v3466_v56 = vadd.f32 %v4212_v54, %v3451_v27  ;;  %v3438_v2 = vmul.f32 %v5457_v32, %v6633_v57 }
0x10e0   : > { %v3456_v47 = vmul.f32 %v4211_v35, %v3441_v59 }
0x10e1   : > { %v5459_v22 = vpop.eup %5458  ;;  %4840 = vmatprep.mubr.msk.f32.mxu1 %vm779_vm1, %v3466_v56  ;;  %v3453_v29 = vmul.f32 %v4211_v35, %v3438_v2 }
0x10e2   : > { %4841 = vmatmul.mubr.msk.f32.gmra.mrb[62].mxu1 %vm779_vm1, %v3467_v1  ;;  %v3440_v42 = vmul.f32 %v5459_v22, %v6642_v43  ;;  %v3471_v11 = vadd.f32 %v4212_v54, %v3456_v47  ;;  %v3829_v43 = vld [vmem:[%s6921_s18 + $0x8] sm:$0xff] }
0x10e3   : > { %v3468_v4 = vadd.f32 %v4212_v54, %v3453_v29  ;;  %v5125_v19 = vpack.c.bf16 %v3829_v43, %v3828_v50 }
0x10e4   : > { %v3455_v38 = vmul.f32 %v4211_v35, %v3440_v42  ;;  %v3840_v35 = vld [vmem:[%s6921_s18 + $0x60] sm:$0xff] }
0x10e5   : > { %4843 = vmatprep.mubr.msk.f32.mxu1 %vm779_vm1, %v3468_v4  ;;  %5126 = vmatprep.subr.bf16.mxu0 %v5125_v19  ;;  %v5149_v63 = vpack.c.bf16 %v3841_v37, %v3840_v35  ;;  %v5514_v35 = vmov -1.0  }
0x10e6   : > { %4844 = vmatmul.mubr.msk.f32.gmra.mrb[64].mxu1 %vm779_vm1, %v3469_v31  ;;  %v3470_v57 = vadd.f32 %v4212_v54, %v3455_v38  ;;  %5128 = vmatpush3.bf16.msra.mxu0 %v5125_v19 }
0x10e7   : > { %5130 = vmatprep.subr.bf16.mxu0 %v5129_v10 }
0x10e8   : > { %4846 = vmatprep.mubr.msk.f32.mxu1 %vm779_vm1, %v3470_v57 }
0x10ea   : > { %4847 = vmatmul.mubr.msk.f32.gmra.mrb[66].mxu1 %vm779_vm1, %v3471_v11  ;;  %5132 = vmatpush3.bf16.msra.mxu0 %v5129_v10 }
0x10eb   : > { %5134 = vmatprep.subr.bf16.mxu0 %v5133_v18 }
0x10ee   : > { %5136 = vmatpush3.bf16.msra.mxu0 %v5133_v18 }
0x10ef   : > { %5138 = vmatprep.subr.bf16.mxu0 %v5137_v44 }
0x10f2   : > { %5140 = vmatpush3.bf16.msra.mxu0 %v5137_v44 }
0x10f3   : > { %5142 = vmatprep.subr.bf16.mxu0 %v5141_v21 }
0x10f6   : > { %5144 = vmatpush3.bf16.msra.mxu0 %v5141_v21 }
0x10f7   : > { %5146 = vmatprep.subr.bf16.mxu0 %v5145_v12 }
0x10fa   : > { %5148 = vmatpush3.bf16.msra.mxu0 %v5145_v12 }
0x10fb   : > { %5150 = vmatprep.subr.bf16.mxu0 %v5149_v63 }
0x10fe   : > { %5152 = vmatpush3.bf16.msra.mxu0 %v5149_v63 }
0x10ff   : > { %5154 = vmatprep.subr.bf16.mxu0 %v5153_v24 }
0x1102   : > { %5156 = vmatpush3.bf16.msra.mxu0 %v5153_v24 }
0x11ac   : > { %v4839_v54 = vpop.f32.mrb[60].mxu1 }
0x11ad   : > { %v3579_v61 = vadd.f32 %v4839_v54, %v4213_v23  ;;  %v3573_v0 = vpop.f32.mrb[61].mxu1 }
0x11ae   : > { %v3574_v62 = vadd.f32 %v4213_v23, %v3573_v0 }
0x11af   : > { %v3621_v28 = vmul.f32 0.70710677, %v3579_v61  ;;  %v6755_v60 = vmul.f32 0.5, %v3579_v61 }
0x11b0   : > { %v3620_v17 = vmul.f32 0.70710677, %v3574_v62  ;;  %v6766_v40 = vmul.f32 0.5, %v3574_v62 }
0x11b1   : > { %v3645_v3 = vand.u32 2147483647, %v3621_v28  ;;  %vm3629_vm6 = vcmp.ge.f32.partialorder %v3621_v28, 0.0 }
0x11b2   : > { %v3644_v46 = vand.u32 2147483647, %v3620_v17  ;;  %vm3628_vm7 = vcmp.ge.f32.partialorder %v3620_v17, 0.0  ;;  %v6764_v37 = vsel %vm3629_vm6, 1.0, %v5514_v35 }
0x11b3   : > { %v3653_v9 = vmul.f32 0.3275911, %v3645_v3  ;;  %v3757_v22 = vsub.f32 0.0, %v3645_v3  ;;  %v6774_v24 = vsel %vm3628_vm7, 1.0, %v5514_v35 }
0x11b4   : > { %v3652_v14 = vmul.f32 0.3275911, %v3644_v46  ;;  %v3756_v8 = vsub.f32 0.0, %v3644_v46 }
0x11b5   : > { %v3661_v39 = vadd.f32 1.0, %v3653_v9  ;;  %v4842_v48 = vpop.f32.mrb[62].mxu1  ;;  %v3765_v50 = vmul.f32 %v3757_v22, %v3645_v3 }
0x11b6   : > { %v6733_v51 = vadd.f32 %v4842_v48, %v4213_v23  ;;  %v3583_v55 = vpop.f32.mrb[63].mxu1  ;;  %v3660_v32 = vadd.f32 1.0, %v3652_v14  ;;  %v3764_v34 = vmul.f32 %v3756_v8, %v3644_v46 }
0x11b7   : > { %5460 = vrcp.f32 %v3661_v39  ;;  %v3584_v41 = vadd.f32 %v4213_v23, %v3583_v55  ;;  %v3774_v45 = vmul.f32 1.442695, %v3765_v50 }
0x11b8   : > { %v6736_v27 = vmul.f32 0.70710677, %v6733_v51  ;;  %5462 = vrcp.f32 %v3660_v32  ;;  %v3772_v46 = vmul.f32 1.442695, %v3764_v34 }
0x11b9   : > { %v6738_v56 = vmul.f32 0.70710677, %v3584_v41  ;;  %v4845_v2 = vpop.f32.mrb[64].mxu1  ;;  %v6782_v9 = vmul.f32 0.5, %v3584_v41 }
0x11ba   : > { %v3647_v1 = vand.u32 2147483647, %v6736_v27  ;;  %v6741_v20 = vadd.f32 %v4845_v2, %v4213_v23  ;;  %v3593_v59 = vpop.f32.mrb[65].mxu1  ;;  %vm3631_vm8 = vcmp.ge.f32.partialorder %v6736_v27, 0.0 }
0x11bb   : > { %v3646_v29 = vand.u32 2147483647, %v6738_v56  ;;  %v6744_v42 = vadd.f32 %v4213_v23, %v3593_v59  ;;  %vm3630_vm9 = vcmp.ge.f32.partialorder %v6738_v56, 0.0 }
0x11bc   : > { %v3655_v4 = vmul.f32 0.3275911, %v3647_v1  ;;  %v6747_v38 = vmul.f32 0.70710677, %v6741_v20  ;;  %v3759_v54 = vsub.f32 0.0, %v3647_v1 }
0x11bd   : > { %v3654_v31 = vmul.f32 0.3275911, %v3646_v29  ;;  %v6750_v57 = vmul.f32 0.70710677, %v6744_v42  ;;  %v4848_v11 = vpop.f32.mrb[66].mxu1  ;;  %v3758_v44 = vsub.f32 0.0, %v3646_v29 }
0x11be   : > { %v3663_v47 = vadd.f32 1.0, %v3655_v4  ;;  %v3649_v19 = vand.u32 2147483647, %v6747_v38  ;;  %v3603_v26 = vpop.f32.mrb[67].mxu1  ;;  %v6759_v25 = vadd.f32 %v4848_v11, %v4213_v23  ;;  %v3767_v32 = vmul.f32 %v3759_v54, %v3647_v1 }
0x11bf   : > { %v3662_v43 = vadd.f32 1.0, %v3654_v31  ;;  %v3648_v33 = vand.u32 2147483647, %v6750_v57  ;;  %v6761_v12 = vadd.f32 %v4213_v23, %v3603_v26  ;;  %v3766_v0 = vmul.f32 %v3758_v44, %v3646_v29 }
0x11c0   : > { %5464 = vrcp.f32 %v3663_v47  ;;  %v3657_v30 = vmul.f32 0.3275911, %v3649_v19  ;;  %v6769_v63 = vmul.f32 0.70710677, %v6759_v25  ;;  %v3761_v17 = vsub.f32 0.0, %v3649_v19 }
0x11c1   : > { %v6753_v10 = vpop.eup %5460  ;;  %5466 = vrcp.f32 %v3662_v43  ;;  %v3656_v53 = vmul.f32 0.3275911, %v3648_v33  ;;  %v6780_v62 = vmul.f32 0.70710677, %v6761_v12  ;;  %v3776_v41 = vmul.f32 1.442695, %v3766_v0 }
0x11c2   : > { %v3685_v18 = vmul.f32 1.0614054, %v6753_v10  ;;  %v3665_v58 = vadd.f32 1.0, %v3657_v30  ;;  %v6776_v23 = vpop.eup %5462  ;;  %v3651_v28 = vand.u32 2147483647, %v6769_v63  ;;  %v3760_v22 = vsub.f32 0.0, %v3648_v33 }
0x11c3   : > { %v3664_v61 = vadd.f32 1.0, %v3656_v53  ;;  %v6786_v14 = vand.u32 2147483647, %v6780_v62  ;;  %v3684_v2 = vmul.f32 1.0614054, %v6776_v23  ;;  %v3769_v50 = vmul.f32 %v3761_v17, %v3649_v19 }
0x11c4   : > { %v3693_v21 = vadd.f32 -1.4531521, %v3685_v18  ;;  %5468 = vrcp.f32 %v3665_v58  ;;  %v3659_v39 = vmul.f32 0.3275911, %v3651_v28  ;;  %v3763_v43 = vsub.f32 0.0, %v3651_v28 }
0x11c5   : > { %5470 = vpow2.f32 %v3774_v45  ;;  %v3658_v4 = vmul.f32 0.3275911, %v6786_v14  ;;  %v3692_v47 = vadd.f32 -1.4531521, %v3684_v2  ;;  %v6805_v44 = vsel %vm3631_vm8, 1.0, %v5514_v35 }
0x11c6   : > { %v3701_v6 = vmul.f32 %v6753_v10, %v3693_v21  ;;  %5472 = vrcp.f32 %v3664_v61  ;;  %v3667_v29 = vadd.f32 1.0, %v3659_v39  ;;  %v3778_v58 = vmul.f32 1.442695, %v3767_v32 }
0x11c7   : > { %5474 = vpow2.f32 %v3772_v46  ;;  %v3666_v1 = vadd.f32 1.0, %v3658_v4  ;;  %v3700_v8 = vmul.f32 %v6776_v23, %v3692_v47  ;;  %v6810_v19 = vsel %vm3630_vm9, 1.0, %v5514_v35 }
0x11c8   : > { %v3709_v3 = vadd.f32 1.4214138, %v3701_v6  ;;  %5476 = vrcp.f32 %v3667_v29  ;;  %v3768_v21 = vmul.f32 %v3760_v22, %v3648_v33  ;;  %v3782_v61 = vmul.f32 1.442695, %v3769_v50 }
0x11c9   : > { %5478 = vrcp.f32 %v3666_v1  ;;  %v3708_v53 = vadd.f32 1.4214138, %v3700_v8  ;;  %v3771_v17 = vmul.f32 %v3763_v43, %v3651_v28  ;;  %v3762_v4 = vsub.f32 0.0, %v6786_v14 }
0x11ca   : > { %v6788_v48 = vpop.eup %5464  ;;  %v3717_v55 = vmul.f32 %v6753_v10, %v3709_v3  ;;  %5480 = vpow2.f32 %v3776_v41  ;;  %v3780_v33 = vmul.f32 1.442695, %v3768_v21  ;;  %vm3633_vm10 = vcmp.ge.f32.partialorder %v6747_v38, 0.0 }
0x11cb   : > { %v6793_v59 = vpop.eup %5466  ;;  %v3687_v18 = vmul.f32 1.0614054, %v6788_v48  ;;  %v3716_v56 = vmul.f32 %v6776_v23, %v3708_v53  ;;  %5482 = vpow2.f32 %v3778_v58  ;;  %v3770_v53 = vmul.f32 %v3762_v4, %v6786_v14 }
0x11cc   : > { %v3725_v31 = vadd.f32 -0.28449672, %v3717_v55  ;;  %v3686_v11 = vmul.f32 1.0614054, %v6793_v59  ;;  %5484 = vpow2.f32 %v3782_v61  ;;  %vm3632_vm11 = vcmp.ge.f32.partialorder %v6750_v57, 0.0 }
0x11cd   : > { %v3695_v0 = vadd.f32 -1.4531521, %v3687_v18  ;;  %v3724_v41 = vadd.f32 -0.28449672, %v3716_v56  ;;  %5486 = vpow2.f32 %v3780_v33  ;;  %vm3635_vm12 = vcmp.ge.f32.partialorder %v6769_v63, 0.0 }
0x11ce   : > { %v3733_v26 = vmul.f32 %v6753_v10, %v3725_v31  ;;  %v3694_v30 = vadd.f32 -1.4531521, %v3686_v11  ;;  %v6800_v45 = vpop.eup %5468  ;;  %v3786_v11 = vmul.f32 1.442695, %v3771_v17  ;;  %v3617_v57 = vmul.f32 0.5, %v6741_v20 }
0x11cf   : > { %v5471_v54 = vpop.eup %5470  ;;  %v3689_v27 = vmul.f32 1.0614054, %v6800_v45  ;;  %v3703_v55 = vmul.f32 %v6788_v48, %v3695_v0  ;;  %v3732_v50 = vmul.f32 %v6776_v23, %v3724_v41  ;;  %vm3634_vm13 = vcmp.ge.f32.partialorder %v6780_v62, 0.0  ;;  %v4222_v62 = vld [vmem:[%s6922_s19] ss:$0 sm:$0xff] }
0x11d0   : > { %v3741_v34 = vadd.f32 0.2548296, %v3733_v26  ;;  %v3702_v6 = vmul.f32 %v6793_v59, %v3694_v30  ;;  %v6814_v3 = vpop.eup %5472  ;;  %5488 = vpow2.f32 %v3786_v11 }
0x11d1   : > { %v3688_v32 = vmul.f32 1.0614054, %v6814_v3  ;;  %v3697_v2 = vadd.f32 -1.4531521, %v3689_v27  ;;  %v3711_v31 = vadd.f32 1.4214138, %v3703_v55  ;;  %v5475_v28 = vpop.eup %5474 }
0x11d2   : > { %v3749_v46 = vmul.f32 %v6753_v10, %v3741_v34  ;;  %v3710_v39 = vadd.f32 1.4214138, %v3702_v6  ;;  %v6824_v1 = vpop.eup %5476  ;;  %v3740_v58 = vadd.f32 0.2548296, %v3732_v50 }
0x11d3   : > { %v3696_v47 = vadd.f32 -1.4531521, %v3688_v32  ;;  %v3705_v10 = vmul.f32 %v6800_v45, %v3697_v2  ;;  %v3719_v26 = vmul.f32 %v6788_v48, %v3711_v31  ;;  %v3691_v34 = vmul.f32 1.0614054, %v6824_v1  ;;  %v6832_v0 = vpop.eup %5478 }
0x11d4   : > { %v3789_v22 = vmul.f32 %v5471_v54, %v3749_v46  ;;  %v3718_v29 = vmul.f32 %v6793_v59, %v3710_v39  ;;  %v3748_v27 = vmul.f32 %v6776_v23, %v3740_v58  ;;  %v5481_v56 = vpop.eup %5480  ;;  %v3690_v14 = vmul.f32 1.0614054, %v6832_v0 }
0x11d5   : > { %v3704_v8 = vmul.f32 %v6814_v3, %v3696_v47  ;;  %v3713_v30 = vadd.f32 1.4214138, %v3705_v10  ;;  %v3727_v6 = vadd.f32 -0.28449672, %v3719_v26  ;;  %v3699_v17 = vadd.f32 -1.4531521, %v3691_v34  ;;  %v5483_v47 = vpop.eup %5482 }
0x11d6   : > { %v3726_v43 = vadd.f32 -0.28449672, %v3718_v29  ;;  %v3797_v18 = vsub.f32 1.0, %v3789_v22  ;;  %v3788_v2 = vmul.f32 %v5475_v28, %v3748_v27  ;;  %v3698_v31 = vadd.f32 -1.4531521, %v3690_v14 }
0x11d7   : > { %v3712_v54 = vadd.f32 1.4214138, %v3704_v8  ;;  %v3721_v61 = vmul.f32 %v6800_v45, %v3713_v30  ;;  %v3735_v39 = vmul.f32 %v6788_v48, %v3727_v6  ;;  %v3707_v41 = vmul.f32 %v6824_v1, %v3699_v17  ;;  %v5485_v8 = vpop.eup %5484 }
0x11d8   : > { %v3734_v21 = vmul.f32 %v6793_v59, %v3726_v43  ;;  %v3805_v32 = vmul.f32 %v3797_v18, %v6764_v37  ;;  %v3784_v10 = vmul.f32 1.442695, %v3770_v53  ;;  %v3796_v11 = vsub.f32 1.0, %v3788_v2  ;;  %v5487_v34 = vpop.eup %5486 }
0x11d9   : > { %v3720_v33 = vmul.f32 %v6814_v3, %v3712_v54  ;;  %v3729_v55 = vadd.f32 -0.28449672, %v3721_v61  ;;  %v3743_v23 = vadd.f32 0.2548296, %v3735_v39  ;;  %v3715_v43 = vadd.f32 1.4214138, %v3707_v41 }
0x11da   : > { %v3742_v46 = vadd.f32 0.2548296, %v3734_v21  ;;  %v3813_v30 = vadd.f32 1.0, %v3805_v32  ;;  %v3804_v18 = vmul.f32 %v3796_v11, %v6774_v24  ;;  %5490 = vpow2.f32 %v3784_v10 }
0x11db   : > { %v3728_v29 = vadd.f32 -0.28449672, %v3720_v33  ;;  %v3737_v4 = vmul.f32 %v6800_v45, %v3729_v55  ;;  %v3751_v26 = vmul.f32 %v6788_v48, %v3743_v23  ;;  %v3723_v21 = vmul.f32 %v6824_v1, %v3715_v43  ;;  %v5489_v33 = vpop.eup %5488 }
0x11dc   : > { %v3750_v22 = vmul.f32 %v6793_v59, %v3742_v46  ;;  %v3706_v59 = vmul.f32 %v6832_v0, %v3698_v31  ;;  %v3812_v48 = vadd.f32 1.0, %v3804_v18  ;;  %v3821_v55 = vmul.f32 %v3813_v30, %v6755_v60 }
0x11dd   : > { %v3736_v37 = vmul.f32 %v6814_v3, %v3728_v29  ;;  %v3745_v28 = vadd.f32 0.2548296, %v3737_v4  ;;  %v3791_v6 = vmul.f32 %v5483_v47, %v3751_v26  ;;  %v3731_v46 = vadd.f32 -0.28449672, %v3723_v21 }
0x11de   : > { %v3790_v50 = vmul.f32 %v5481_v56, %v3750_v22  ;;  %v3714_v61 = vadd.f32 1.4214138, %v3706_v59  ;;  %v3820_v14 = vmul.f32 %v3812_v48, %v6766_v40  ;;  %v3615_v23 = vmul.f32 0.5, %v6733_v51 }
0x11df   : > { %v3744_v53 = vadd.f32 0.2548296, %v3736_v37  ;;  %v3753_v54 = vmul.f32 %v6800_v45, %v3745_v28  ;;  %v3799_v17 = vsub.f32 1.0, %v3791_v6  ;;  %v3739_v45 = vmul.f32 %v6824_v1, %v3731_v46 }
0x11e0   : > { %v3798_v58 = vsub.f32 1.0, %v3790_v50  ;;  %v3722_v24 = vmul.f32 %v6832_v0, %v3714_v61  ;;  %4881 = vmatprep.mubr.f32.mxu0 %v3820_v14  ;;  %v3616_v43 = vmul.f32 0.5, %v6744_v42  ;;  %v3642_v42 = vsel %vm3634_vm13, 1.0, %v5514_v35 }
0x11e1   : > { %v3752_v56 = vmul.f32 %v6814_v3, %v3744_v53  ;;  %v3793_v39 = vmul.f32 %v5485_v8, %v3753_v54  ;;  %v3807_v2 = vmul.f32 %v3799_v17, %v6805_v44  ;;  %v3641_v3 = vsel %vm3633_vm10, 1.0, %v5514_v35  ;;  %4882 = vmatmul.mubr.f32.vlgmr.msra.gmra.mrb[52].mxu0 %v3821_v55 }
0x11e2   : > { %v3806_v27 = vmul.f32 %v3798_v58, %v6810_v19  ;;  %v3730_v19 = vadd.f32 -0.28449672, %v3722_v24  ;;  %v3747_v60 = vadd.f32 0.2548296, %v3739_v45  ;;  %v3640_v44 = vsel %vm3632_vm11, 1.0, %v5514_v35 }
0x11e3   : > { %v3792_v22 = vmul.f32 %v5487_v34, %v3752_v56  ;;  %v3801_v41 = vsub.f32 1.0, %v3793_v39  ;;  %v3815_v40 = vadd.f32 1.0, %v3807_v2  ;;  %v3643_v8 = vsel %vm3635_vm12, 1.0, %v5514_v35 }
0x11e4   : > { %v3814_v32 = vadd.f32 1.0, %v3806_v27  ;;  %v3738_v47 = vmul.f32 %v6832_v0, %v3730_v19  ;;  %v3755_v51 = vmul.f32 %v6824_v1, %v3747_v60  ;;  %v5491_v28 = vpop.eup %5490  ;;  %v3618_v34 = vmul.f32 0.5, %v6761_v12 }
0x11e5   : > { %v3800_v4 = vsub.f32 1.0, %v3792_v22  ;;  %v3809_v31 = vmul.f32 %v3801_v41, %v3641_v3  ;;  %v3823_v10 = vmul.f32 %v3815_v40, %v3615_v23  ;;  %v3619_v6 = vmul.f32 0.5, %v6759_v25 }
0x11e6   : > { %v3822_v29 = vmul.f32 %v3814_v32, %v6782_v9  ;;  %v3746_v11 = vadd.f32 0.2548296, %v3738_v47  ;;  %v3795_v50 = vmul.f32 %v5489_v33, %v3755_v51 }
0x11e7   : > { %v3808_v38 = vmul.f32 %v3800_v4, %v3640_v44  ;;  %v3817_v9 = vadd.f32 1.0, %v3809_v31 }
0x11e8   : > { %4884 = vmatprep.mubr.f32.mxu0 %v3822_v29  ;;  %v3754_v37 = vmul.f32 %v6832_v0, %v3746_v11  ;;  %v3803_v59 = vsub.f32 1.0, %v3795_v50 }
0x11e9   : > { %4885 = vmatmul.mubr.f32.gmra.mrb[54].mxu0 %v3823_v10  ;;  %v3816_v26 = vadd.f32 1.0, %v3808_v38  ;;  %v3825_v18 = vmul.f32 %v3817_v9, %v3617_v57 }
0x11ea   : > { %v3794_v30 = vmul.f32 %v5491_v28, %v3754_v37  ;;  %v3811_v63 = vmul.f32 %v3803_v59, %v3643_v8 }
0x11eb   : > { %v3824_v1 = vmul.f32 %v3816_v26, %v3616_v43 }
0x11ec   : > { %v3802_v58 = vsub.f32 1.0, %v3794_v30  ;;  %v3819_v0 = vadd.f32 1.0, %v3811_v63 }
0x11ed   : > { %4887 = vmatprep.mubr.f32.mxu0 %v3824_v1 }
0x11ee   : > { %4888 = vmatmul.mubr.f32.gmra.mrb[56].mxu0 %v3825_v18  ;;  %v3810_v21 = vmul.f32 %v3802_v58, %v3642_v42  ;;  %v3827_v54 = vmul.f32 %v3819_v0, %v3619_v6 }
0x11f0   : > { %v3818_v20 = vadd.f32 1.0, %v3810_v21 }
0x11f2   : > { %v3826_v53 = vmul.f32 %v3818_v20, %v3618_v34 }
0x11f4   : > { %4890 = vmatprep.mubr.f32.mxu0 %v3826_v53 }
0x11f5   : > { %4891 = vmatmul.mubr.f32.gmra.mrb[58].mxu0 %v3827_v54 }
0x12b4   : > { %v4883_v61 = vpop.f32.mrb[52].mxu0 }
0x12b5   : > { %v3923_v48 = vadd.f32 %v4883_v61, %v4222_v62  ;;  %v3917_v27 = vpop.f32.mrb[53].mxu0 }
0x12b6   : > { %v3918_v12 = vadd.f32 %v4222_v62, %v3917_v27 }
0x12b7   : > { %v3957_v35 = vadd.f32 %v3923_v48, %v6561_v49 }
0x12b8   : > { %v3956_v25 = vadd.f32 %v3918_v12, %v6564_v7 }
0x12b9   : > { %3965 = vst.msk [vmem:[%s631_s30 + $0x8] sm:$0xff] %vm779_vm1, %v3957_v35 }
0x12ba   : > { %3964 = vst.msk [vmem:[%s631_s30] sm:$0xff] %vm779_vm1, %v3956_v25 }
0x12bc   : > { %v4886_v46 = vpop.f32.mrb[54].mxu0 }
0x12bd   : > { %v3933_v17 = vadd.f32 %v4886_v46, %v4222_v62  ;;  %v3927_v56 = vpop.f32.mrb[55].mxu0 }
0x12be   : > { %v3928_v39 = vadd.f32 %v4222_v62, %v3927_v56 }
0x12bf   : > { %v3959_v24 = vadd.f32 %v3933_v17, %v6571_v52 }
0x12c0   : > { %v3958_v33 = vadd.f32 %v3928_v39, %v6576_v13 }
0x12c1   : > { %3967 = vst.msk [vmem:[%s631_s30 + $0x18] sm:$0xff] %vm779_vm1, %v3959_v24  ;;  %v4889_v55 = vpop.f32.mrb[56].mxu0 }
0x12c2   : > { %3966 = vst.msk [vmem:[%s631_s30 + $0x10] sm:$0xff] %vm779_vm1, %v3958_v33  ;;  %v3943_v49 = vadd.f32 %v4889_v55, %v4222_v62  ;;  %v3937_v14 = vpop.f32.mrb[57].mxu0 }
0x12c3   : > { %v3938_v7 = vadd.f32 %v4222_v62, %v3937_v14 }
0x12c4   : > { %v3961_v32 = vadd.f32 %v3943_v49, %v6579_v16 }
0x12c5   : > { %v3960_v45 = vadd.f32 %v3938_v7, %v6582_v15 }
0x12c6   : > { %3969 = vst.msk [vmem:[%s631_s30 + $0x28] sm:$0xff] %vm779_vm1, %v3961_v32 }
0x12c7   : > { %3968 = vst.msk [vmem:[%s631_s30 + $0x20] sm:$0xff] %vm779_vm1, %v3960_v45 }
0x12c8   : > { %v4892_v2 = vpop.f32.mrb[58].mxu0 }
0x12c9   : > { %v3953_v52 = vadd.f32 %v4892_v2, %v4222_v62  ;;  %v3947_v22 = vpop.f32.mrb[59].mxu0 }
0x12ca   : > { %v3948_v13 = vadd.f32 %v4222_v62, %v3947_v22 }
0x12cb   : > { %v3963_v41 = vadd.f32 %v3953_v52, %v6589_v36 }
0x12cc   : > { %v3962_v19 = vadd.f32 %v3948_v13, %v6594_v5 }
0x12cd   : > { %3971 = vst.msk [vmem:[%s631_s30 + $0x38] sm:$0xff] %vm779_vm1, %v3963_v41 }
0x12ce   : > { %3970 = vst.msk [vmem:[%s631_s30 + $0x30] sm:$0xff] %vm779_vm1, %v3962_v19 }
0x12cf PF: > { %s30_s1 = sadd.s32 1, %s5506_s1  }
0x12d0   : > { %p27_p4 = scmp.ge.s32.totalorder %s30_s1, 4  }
0x12d2   :  { %29 = sbr.rel (!%p27_p4) target bundleno = 6 (0x6), region = 133 }

</bundles_post_ra>
